<compile_context>
chip_gen: v5e
topology: v5e:2x2
jax: 0.10.0
libtpu: 0.0.40
codegen_flags: <defaults>
</compile_context>

<pallas_src>
import jax
import jax.numpy as jnp
import numpy as np
from jax import lax
from jax.experimental import pallas as pl
from jax.experimental.pallas import tpu as pltpu


# ---------------------------------------------------------------------------
# Bilinear (align_corners=True) interpolation matrix -- used by the reference
# and to build the W-pass operator for the kernel.
# ---------------------------------------------------------------------------
def bilinear_matrix(n_in, scale=2):
    n_out = n_in * scale
    src = jnp.arange(n_out, dtype=jnp.float32) * (n_in - 1) / (n_out - 1)
    i0 = jnp.clip(jnp.floor(src).astype(jnp.int32), 0, n_in - 1)
    i1 = jnp.minimum(i0 + 1, n_in - 1)
    w1 = src - i0.astype(jnp.float32)
    w0 = 1.0 - w1
    return (w0[:, None] * jax.nn.one_hot(i0, n_in, dtype=jnp.float32)
            + w1[:, None] * jax.nn.one_hot(i1, n_in, dtype=jnp.float32))


# ---------------------------------------------------------------------------
# Parameters.  Conv weights stored as (9, Cout, Cin); tap t = 3*dy + dx
# corresponds to the PyTorch weight[:, :, dy, dx].
# ---------------------------------------------------------------------------
def init_params(key, features):
    f2 = features // 2
    ks = jax.random.split(key, 6)
    s = 0.1
    return {
        "w1": s * jax.random.normal(ks[0], (9, f2, features), jnp.float32),
        "b1": s * jax.random.normal(ks[1], (f2, 1), jnp.float32),
        "w2": s * jax.random.normal(ks[2], (9, 32, f2), jnp.float32),
        "b2": s * jax.random.normal(ks[3], (32, 1), jnp.float32),
        "w3": s * jax.random.normal(ks[4], (1, 32), jnp.float32),
        "b3": s * jax.random.normal(ks[5], (1,), jnp.float32),
    }


# ---------------------------------------------------------------------------
# Fused Pallas forward: (B, features, H, W) -> (B, 1, 2H, 2W)
# ---------------------------------------------------------------------------
def head_depth_forward(x_nchw, params, matmul_dtype=jnp.float32):
    B, Cin, H, W = x_nchw.shape
    f2 = params["w1"].shape[1]
    Ho, Wo = 2 * H, 2 * W
    S, So = H * W, Ho * Wo
    PW1, PW2 = W + 1, Wo + 1                       # flat zero-pad per side

    # NCHW kept; flattening spatial is free (row-major contiguous).
    x = x_nchw.reshape(B, Cin, S).astype(jnp.float32)

    # W-pass operator (align_corners=True), plain (W, Wo) -- no kron, no broadcast.
    rwt = bilinear_matrix(W, 2).T                  # (W, Wo)

    # Column-validity masks for the flat shift-and-accumulate conv (dx = 0, 1, 2).
    col1 = jnp.arange(S, dtype=jnp.int32) % W
    cm1 = jnp.stack([(col1 >= 1).astype(jnp.float32),
                     jnp.ones((S,), jnp.float32),
                     (col1 <= W - 2).astype(jnp.float32)])       # (3, S)
    col2 = jnp.arange(So, dtype=jnp.int32) % Wo
    cm2 = jnp.stack([(col2 >= 1).astype(jnp.float32),
                     jnp.ones((So,), jnp.float32),
                     (col2 <= Wo - 2).astype(jnp.float32)])      # (3, So)

    # Static H-pass lerp taps (align_corners=True, scale 2): per output row i,
    # out[i] = a0 * in[r0] + a1 * in[r1].  Pure trace-time Python constants.
    hpass = []
    for i in range(Ho):
        src = i * (H - 1) / (Ho - 1)
        r0 = min(int(np.floor(src)), H - 1)
        r1 = min(r0 + 1, H - 1)
        a1 = float(src - r0)
        hpass.append((r0, r1, 1.0 - a1, a1))

    mmt = matmul_dtype

    def kernel(x_ref, w1_ref, b1_ref, rwt_ref, cm1_ref,
               w2_ref, b2_ref, cm2_ref, w3_ref, b3_ref,
               o_ref, pad1_ref, uw_ref, pad2_ref):
        # ---------------- conv1: 3x3 / pad 1, channels-first, 9 accumulated matmuls ----
        pad1_ref[:, :PW1] = jnp.zeros((Cin, PW1), jnp.float32)          # borders only
        pad1_ref[:, PW1 + S:] = jnp.zeros((Cin, PW1), jnp.float32)
        pad1_ref[:, PW1:PW1 + S] = x_ref[0]                             # (Cin, S)

        acc1 = None
        for dx in range(3):
            part = None
            for dy in range(3):
                t = 3 * dy + dx
                sl = pad1_ref[:, dy * W + dx: dy * W + dx + S]          # (Cin, S)
                m = jnp.dot(w1_ref[t].astype(mmt), sl.astype(mmt),
                            preferred_element_type=jnp.float32)        # (f2, S)
                part = m if part is None else part + m
            if dx != 1:                       # mask column wrap-around of this dx group
                part = part * cm1_ref[dx:dx + 1, :]
            acc1 = part if acc1 is None else acc1 + part
        h1 = acc1 + b1_ref[...]                                          # (f2, S)

        # ---------------- bilinear x2 upsample (separable, align_corners=True) --------
        # W-pass: one (f2, W) @ (W, Wo) MXU matmul per input row.
        rwt_v = rwt_ref[...].astype(mmt)
        for h in range(H):
            v_h = h1[:, h * W:(h + 1) * W]                               # (f2, W)
            uw_ref[h] = jnp.dot(v_h.astype(mmt), rwt_v,
                                preferred_element_type=jnp.float32)     # (f2, Wo)

        # H-pass: static 2-tap row lerp, written directly into the conv2 pad buffer.
        pad2_ref[:, :PW2] = jnp.zeros((f2, PW2), jnp.float32)
        pad2_ref[:, PW2 + So:] = jnp.zeros((f2, PW2), jnp.float32)
        for i, (r0, r1, a0, a1) in enumerate(hpass):
            row = uw_ref[r0] * a0
            if a1 != 0.0:
                row = row + uw_ref[r1] * a1
            pad2_ref[:, PW2 + i * Wo: PW2 + (i + 1) * Wo] = row         # (f2, Wo)

        # ---------------- conv2: 3x3 / pad 1 + ReLU, output (32, So) lane-dense -------
        acc2 = None
        for dx in range(3):
            part = None
            for dy in range(3):
                t = 3 * dy + dx
                sl = pad2_ref[:, dy * Wo + dx: dy * Wo + dx + So]        # (f2, So)
                m = jnp.dot(w2_ref[t].astype(mmt), sl.astype(mmt),
                            preferred_element_type=jnp.float32)         # (32, So)
                part = m if part is None else part + m
            if dx != 1:
                part = part * cm2_ref[dx:dx + 1, :]
            acc2 = part if acc2 is None else acc2 + part
        h2 = jnp.maximum(acc2 + b2_ref[...], 0.0)                        # (32, So)

        # ---------------- conv3 (1x1 -> 1 ch) + sigmoid, fully lane-dense -------------
        y = jnp.dot(w3_ref[...], h2, preferred_element_type=jnp.float32)  # (1, So)
        y = jax.nn.sigmoid(y + b3_ref[0])
        o_ref[...] = y[None].astype(o_ref.dtype)                          # (1, 1, So)

    out_flat = pl.pallas_call(
        kernel,
        out_shape=jax.ShapeDtypeStruct((B, 1, So), jnp.float32),
        grid=(B,),
        in_specs=[
            pl.BlockSpec((1, Cin, S), lambda b: (b, 0, 0)),        # x
            pl.BlockSpec((9, f2, Cin), lambda b: (0, 0, 0)),       # w1
            pl.BlockSpec((f2, 1), lambda b: (0, 0)),               # b1
            pl.BlockSpec((W, Wo), lambda b: (0, 0)),               # rw^T
            pl.BlockSpec((3, S), lambda b: (0, 0)),                # conv1 col masks
            pl.BlockSpec((9, 32, f2), lambda b: (0, 0, 0)),        # w2
            pl.BlockSpec((32, 1), lambda b: (0, 0)),               # b2
            pl.BlockSpec((3, So), lambda b: (0, 0)),               # conv2 col masks
            pl.BlockSpec((1, 32), lambda b: (0, 0)),               # w3
            pl.BlockSpec(memory_space=pltpu.MemorySpace.SMEM),     # b3 scalar
        ],
        out_specs=pl.BlockSpec((1, 1, So), lambda b: (b, 0, 0)),
        scratch_shapes=[
            pltpu.VMEM((Cin, S + 2 * PW1), jnp.float32),           # conv1 flat-pad input
            pltpu.VMEM((H, f2, Wo), jnp.float32),                  # W-upsampled rows
            pltpu.VMEM((f2, So + 2 * PW2), jnp.float32),           # conv2 flat-pad input
        ],
        compiler_params=pltpu.CompilerParams(
            dimension_semantics=("parallel",),
            vmem_limit_bytes=32 * 1024 * 1024),
    )(x, params["w1"], params["b1"], rwt, cm1,
      params["w2"], params["b2"], cm2, params["w3"], params["b3"])

    return out_flat.reshape(B, 1, Ho, Wo)          # free reshape (no transpose)


# ---------------------------------------------------------------------------
# Pure-JAX reference (matches the PyTorch module semantics)
# ---------------------------------------------------------------------------
def reference_forward(x_nchw, params):
    x = jnp.transpose(x_nchw, (0, 2, 3, 1)).astype(jnp.float32)
    B, H, W, _ = x.shape
    dn = ("NHWC", "HWIO", "NHWC")
    hp = lax.Precision.HIGHEST

    def conv3(h, w9, b):                 # w9: (9, cout, cin)
        _, cout, cin = w9.shape
        w = jnp.transpose(w9.reshape(3, 3, cout, cin), (0, 1, 3, 2))   # HWIO
        return lax.conv_general_dilated(h, w, (1, 1), "SAME",
                                        dimension_numbers=dn,
                                        precision=hp) + b.reshape(1, 1, 1, -1)

    h1 = conv3(x, params["w1"], params["b1"])
    rh, rw = bilinear_matrix(H, 2), bilinear_matrix(W, 2)
    u = jnp.einsum("ih,jw,bhwc->bijc", rh, rw, h1, precision=hp)
    h2 = jnp.maximum(conv3(u, params["w2"], params["b2"]), 0.0)
    y = jax.nn.sigmoid(jnp.einsum("bhwc,oc->bhwo", h2, params["w3"], precision=hp)
                       + params["b3"].reshape(1, 1, 1, 1))
    return jnp.transpose(y, (0, 3, 1, 2))


if __name__ == "__main__":
    features, B, H, W = 8, 2, 16, 16
    key = jax.random.PRNGKey(0)
    kx, kp = jax.random.split(key)
    x = jax.random.normal(kx, (B, features, H, W), jnp.float32)
    params = init_params(kp, features)

    out = jax.block_until_ready(head_depth_forward(x, params))
    ref = jax.block_until_ready(reference_forward(x, params))

    assert out.shape == (B, 1, 2 * H, 2 * W), out.shape
    np.testing.assert_allclose(np.asarray(out), np.asarray(ref), rtol=5e-4, atol=5e-5)

    print("KERNEL_OK")
</pallas_src>

<mosaic_0001>
module attributes {stable_mosaic.version = 11 : i64} {
  func.func @kernel(%arg0: i32, %arg1: memref<1x8x256xf32, #tpu.memory_space<vmem>>, %arg2: memref<9x4x8xf32, #tpu.memory_space<vmem>>, %arg3: memref<4x1xf32, #tpu.memory_space<vmem>>, %arg4: memref<16x32xf32, #tpu.memory_space<vmem>>, %arg5: memref<3x256xf32, #tpu.memory_space<vmem>>, %arg6: memref<9x32x4xf32, #tpu.memory_space<vmem>>, %arg7: memref<32x1xf32, #tpu.memory_space<vmem>>, %arg8: memref<3x1024xf32, #tpu.memory_space<vmem>>, %arg9: memref<1x32xf32, #tpu.memory_space<vmem>>, %arg10: memref<1xf32, #tpu.memory_space<smem>>, %arg11: memref<1x1x1024xf32, #tpu.memory_space<vmem>>, %arg12: memref<8x290xf32, #tpu.memory_space<vmem>>, %arg13: memref<16x4x32xf32, #tpu.memory_space<vmem>>, %arg14: memref<4x1090xf32, #tpu.memory_space<vmem>>) attributes {dimension_semantics = [#tpu.dimension_semantics<parallel>], iteration_bounds = array<i64: 2>, scalar_prefetch = 0 : i64, scratch_operands = 3 : i64, tpu.core_type = #tpu.core_type<tc>, window_params = [{transform_indices = @transform_0, window_bounds = array<i64: 1, 8, 256>}, {pipeline_mode = #tpu.pipeline_mode<synchronous>, transform_indices = @transform_1, window_bounds = array<i64: 9, 4, 8>}, {pipeline_mode = #tpu.pipeline_mode<synchronous>, transform_indices = @transform_2, window_bounds = array<i64: 4, 1>}, {pipeline_mode = #tpu.pipeline_mode<synchronous>, transform_indices = @transform_3, window_bounds = array<i64: 16, 32>}, {pipeline_mode = #tpu.pipeline_mode<synchronous>, transform_indices = @transform_4, window_bounds = array<i64: 3, 256>}, {pipeline_mode = #tpu.pipeline_mode<synchronous>, transform_indices = @transform_5, window_bounds = array<i64: 9, 32, 4>}, {pipeline_mode = #tpu.pipeline_mode<synchronous>, transform_indices = @transform_6, window_bounds = array<i64: 32, 1>}, {pipeline_mode = #tpu.pipeline_mode<synchronous>, transform_indices = @transform_7, window_bounds = array<i64: 3, 1024>}, {pipeline_mode = #tpu.pipeline_mode<synchronous>, transform_indices = @transform_8, window_bounds = array<i64: 1, 32>}, {transform_indices = @transform_9, window_bounds = array<i64: 1>}, {transform_indices = @transform_10, window_bounds = array<i64: 1, 1, 1024>}]} {
    %cst = arith.constant 0.000000e+00 : f32
    %0 = vector.broadcast %cst : f32 to vector<8x17xf32>
    %c0 = arith.constant 0 : index
    %c0_0 = arith.constant 0 : index
    %1 = vector.load %arg12[%c0, %c0_0] : memref<8x290xf32, #tpu.memory_space<vmem>>, vector<8x17xf32>
    tpu.vector_store %arg12[%c0, %c0_0], %0 {strides = array<i32>} : memref<8x290xf32, #tpu.memory_space<vmem>>, vector<8x17xf32>,
    %cst_1 = arith.constant 0.000000e+00 : f32
    %2 = vector.broadcast %cst_1 : f32 to vector<8x17xf32>
    %c0_2 = arith.constant 0 : index
    %c273 = arith.constant 273 : index
    %3 = vector.load %arg12[%c0_2, %c273] : memref<8x290xf32, #tpu.memory_space<vmem>>, vector<8x17xf32>
    tpu.vector_store %arg12[%c0_2, %c273], %2 {strides = array<i32>} : memref<8x290xf32, #tpu.memory_space<vmem>>, vector<8x17xf32>,
    %c0_3 = arith.constant 0 : index
    %c0_4 = arith.constant 0 : index
    %c0_5 = arith.constant 0 : index
    %4 = vector.load %arg1[%c0_3, %c0_4, %c0_5] : memref<1x8x256xf32, #tpu.memory_space<vmem>>, vector<1x8x256xf32>
    %5 = vector.shape_cast %4 : vector<1x8x256xf32> to vector<8x256xf32>
    %c0_6 = arith.constant 0 : index
    %c17 = arith.constant 17 : index
    %6 = vector.load %arg12[%c0_6, %c17] : memref<8x290xf32, #tpu.memory_space<vmem>>, vector<8x256xf32>
    tpu.vector_store %arg12[%c0_6, %c17], %5 {strides = array<i32>} : memref<8x290xf32, #tpu.memory_space<vmem>>, vector<8x256xf32>,
    %c0_7 = arith.constant 0 : index
    %c0_8 = arith.constant 0 : index
    %7 = vector.load %arg12[%c0_7, %c0_8] : memref<8x290xf32, #tpu.memory_space<vmem>>, vector<8x256xf32>
    %c0_9 = arith.constant 0 : index
    %c0_10 = arith.constant 0 : index
    %c0_11 = arith.constant 0 : index
    %8 = vector.load %arg2[%c0_9, %c0_10, %c0_11] : memref<9x4x8xf32, #tpu.memory_space<vmem>>, vector<1x4x8xf32>
    %9 = vector.shape_cast %8 : vector<1x4x8xf32> to vector<4x8xf32>
    %cst_12 = arith.constant dense<0.000000e+00> : vector<4x256xf32>
    %10 = tpu.matmul %9, %7, %cst_12 {dimension_numbers = #tpu.dot_dimension_numbers<[1], [0], [0], [1], [0, 0, 1, 1], [], []>} : vector<4x8xf32>, vector<8x256xf32>, vector<4x256xf32> -> vector<4x256xf32>
    %c0_13 = arith.constant 0 : index
    %c16 = arith.constant 16 : index
    %11 = vector.load %arg12[%c0_13, %c16] : memref<8x290xf32, #tpu.memory_space<vmem>>, vector<8x256xf32>
    %c3 = arith.constant 3 : index
    %c0_14 = arith.constant 0 : index
    %c0_15 = arith.constant 0 : index
    %12 = vector.load %arg2[%c3, %c0_14, %c0_15] : memref<9x4x8xf32, #tpu.memory_space<vmem>>, vector<1x4x8xf32>
    %13 = vector.shape_cast %12 : vector<1x4x8xf32> to vector<4x8xf32>
    %cst_16 = arith.constant dense<0.000000e+00> : vector<4x256xf32>
    %14 = tpu.matmul %13, %11, %cst_16 {dimension_numbers = #tpu.dot_dimension_numbers<[1], [0], [0], [1], [0, 0, 1, 1], [], []>} : vector<4x8xf32>, vector<8x256xf32>, vector<4x256xf32> -> vector<4x256xf32>
    %15 = arith.addf %10, %14 : vector<4x256xf32>
    %c0_17 = arith.constant 0 : index
    %c32 = arith.constant 32 : index
    %16 = vector.load %arg12[%c0_17, %c32] : memref<8x290xf32, #tpu.memory_space<vmem>>, vector<8x256xf32>
    %c6 = arith.constant 6 : index
    %c0_18 = arith.constant 0 : index
    %c0_19 = arith.constant 0 : index
    %17 = vector.load %arg2[%c6, %c0_18, %c0_19] : memref<9x4x8xf32, #tpu.memory_space<vmem>>, vector<1x4x8xf32>
    %18 = vector.shape_cast %17 : vector<1x4x8xf32> to vector<4x8xf32>
    %cst_20 = arith.constant dense<0.000000e+00> : vector<4x256xf32>
    %19 = tpu.matmul %18, %16, %cst_20 {dimension_numbers = #tpu.dot_dimension_numbers<[1], [0], [0], [1], [0, 0, 1, 1], [], []>} : vector<4x8xf32>, vector<8x256xf32>, vector<4x256xf32> -> vector<4x256xf32>
    %20 = arith.addf %15, %19 : vector<4x256xf32>
    %c0_21 = arith.constant 0 : index
    %c0_22 = arith.constant 0 : index
    %21 = vector.load %arg5[%c0_21, %c0_22] : memref<3x256xf32, #tpu.memory_space<vmem>>, vector<1x256xf32>
    %22 = vector.broadcast %21 : vector<1x256xf32> to vector<4x256xf32>
    %23 = arith.mulf %20, %22 : vector<4x256xf32>
    %c0_23 = arith.constant 0 : index
    %c1 = arith.constant 1 : index
    %24 = vector.load %arg12[%c0_23, %c1] : memref<8x290xf32, #tpu.memory_space<vmem>>, vector<8x256xf32>
    %c1_24 = arith.constant 1 : index
    %c0_25 = arith.constant 0 : index
    %c0_26 = arith.constant 0 : index
    %25 = vector.load %arg2[%c1_24, %c0_25, %c0_26] : memref<9x4x8xf32, #tpu.memory_space<vmem>>, vector<1x4x8xf32>
    %26 = vector.shape_cast %25 : vector<1x4x8xf32> to vector<4x8xf32>
    %cst_27 = arith.constant dense<0.000000e+00> : vector<4x256xf32>
    %27 = tpu.matmul %26, %24, %cst_27 {dimension_numbers = #tpu.dot_dimension_numbers<[1], [0], [0], [1], [0, 0, 1, 1], [], []>} : vector<4x8xf32>, vector<8x256xf32>, vector<4x256xf32> -> vector<4x256xf32>
    %c0_28 = arith.constant 0 : index
    %c17_29 = arith.constant 17 : index
    %28 = vector.load %arg12[%c0_28, %c17_29] : memref<8x290xf32, #tpu.memory_space<vmem>>, vector<8x256xf32>
    %c4 = arith.constant 4 : index
    %c0_30 = arith.constant 0 : index
    %c0_31 = arith.constant 0 : index
    %29 = vector.load %arg2[%c4, %c0_30, %c0_31] : memref<9x4x8xf32, #tpu.memory_space<vmem>>, vector<1x4x8xf32>
    %30 = vector.shape_cast %29 : vector<1x4x8xf32> to vector<4x8xf32>
    %cst_32 = arith.constant dense<0.000000e+00> : vector<4x256xf32>
    %31 = tpu.matmul %30, %28, %cst_32 {dimension_numbers = #tpu.dot_dimension_numbers<[1], [0], [0], [1], [0, 0, 1, 1], [], []>} : vector<4x8xf32>, vector<8x256xf32>, vector<4x256xf32> -> vector<4x256xf32>
    %32 = arith.addf %27, %31 : vector<4x256xf32>
    %c0_33 = arith.constant 0 : index
    %c33 = arith.constant 33 : index
    %33 = vector.load %arg12[%c0_33, %c33] : memref<8x290xf32, #tpu.memory_space<vmem>>, vector<8x256xf32>
    %c7 = arith.constant 7 : index
    %c0_34 = arith.constant 0 : index
    %c0_35 = arith.constant 0 : index
    %34 = vector.load %arg2[%c7, %c0_34, %c0_35] : memref<9x4x8xf32, #tpu.memory_space<vmem>>, vector<1x4x8xf32>
    %35 = vector.shape_cast %34 : vector<1x4x8xf32> to vector<4x8xf32>
    %cst_36 = arith.constant dense<0.000000e+00> : vector<4x256xf32>
    %36 = tpu.matmul %35, %33, %cst_36 {dimension_numbers = #tpu.dot_dimension_numbers<[1], [0], [0], [1], [0, 0, 1, 1], [], []>} : vector<4x8xf32>, vector<8x256xf32>, vector<4x256xf32> -> vector<4x256xf32>
    %37 = arith.addf %32, %36 : vector<4x256xf32>
    %38 = arith.addf %23, %37 : vector<4x256xf32>
    %c0_37 = arith.constant 0 : index
    %c2 = arith.constant 2 : index
    %39 = vector.load %arg12[%c0_37, %c2] : memref<8x290xf32, #tpu.memory_space<vmem>>, vector<8x256xf32>
    %c2_38 = arith.constant 2 : index
    %c0_39 = arith.constant 0 : index
    %c0_40 = arith.constant 0 : index
    %40 = vector.load %arg2[%c2_38, %c0_39, %c0_40] : memref<9x4x8xf32, #tpu.memory_space<vmem>>, vector<1x4x8xf32>
    %41 = vector.shape_cast %40 : vector<1x4x8xf32> to vector<4x8xf32>
    %cst_41 = arith.constant dense<0.000000e+00> : vector<4x256xf32>
    %42 = tpu.matmul %41, %39, %cst_41 {dimension_numbers = #tpu.dot_dimension_numbers<[1], [0], [0], [1], [0, 0, 1, 1], [], []>} : vector<4x8xf32>, vector<8x256xf32>, vector<4x256xf32> -> vector<4x256xf32>
    %c0_42 = arith.constant 0 : index
    %c18 = arith.constant 18 : index
    %43 = vector.load %arg12[%c0_42, %c18] : memref<8x290xf32, #tpu.memory_space<vmem>>, vector<8x256xf32>
    %c5 = arith.constant 5 : index
    %c0_43 = arith.constant 0 : index
    %c0_44 = arith.constant 0 : index
    %44 = vector.load %arg2[%c5, %c0_43, %c0_44] : memref<9x4x8xf32, #tpu.memory_space<vmem>>, vector<1x4x8xf32>
    %45 = vector.shape_cast %44 : vector<1x4x8xf32> to vector<4x8xf32>
    %cst_45 = arith.constant dense<0.000000e+00> : vector<4x256xf32>
    %46 = tpu.matmul %45, %43, %cst_45 {dimension_numbers = #tpu.dot_dimension_numbers<[1], [0], [0], [1], [0, 0, 1, 1], [], []>} : vector<4x8xf32>, vector<8x256xf32>, vector<4x256xf32> -> vector<4x256xf32>
    %47 = arith.addf %42, %46 : vector<4x256xf32>
    %c0_46 = arith.constant 0 : index
    %c34 = arith.constant 34 : index
    %48 = vector.load %arg12[%c0_46, %c34] : memref<8x290xf32, #tpu.memory_space<vmem>>, vector<8x256xf32>
    %c8 = arith.constant 8 : index
    %c0_47 = arith.constant 0 : index
    %c0_48 = arith.constant 0 : index
    %49 = vector.load %arg2[%c8, %c0_47, %c0_48] : memref<9x4x8xf32, #tpu.memory_space<vmem>>, vector<1x4x8xf32>
    %50 = vector.shape_cast %49 : vector<1x4x8xf32> to vector<4x8xf32>
    %cst_49 = arith.constant dense<0.000000e+00> : vector<4x256xf32>
    %51 = tpu.matmul %50, %48, %cst_49 {dimension_numbers = #tpu.dot_dimension_numbers<[1], [0], [0], [1], [0, 0, 1, 1], [], []>} : vector<4x8xf32>, vector<8x256xf32>, vector<4x256xf32> -> vector<4x256xf32>
    %52 = arith.addf %47, %51 : vector<4x256xf32>
    %c2_50 = arith.constant 2 : index
    %c0_51 = arith.constant 0 : index
    %53 = vector.load %arg5[%c2_50, %c0_51] : memref<3x256xf32, #tpu.memory_space<vmem>>, vector<1x256xf32>
    %54 = vector.broadcast %53 : vector<1x256xf32> to vector<4x256xf32>
    %55 = arith.mulf %52, %54 : vector<4x256xf32>
    %56 = arith.addf %38, %55 : vector<4x256xf32>
    %c0_52 = arith.constant 0 : index
    %c0_53 = arith.constant 0 : index
    %57 = vector.load %arg3[%c0_52, %c0_53] : memref<4x1xf32, #tpu.memory_space<vmem>>, vector<4x1xf32>
    %58 = vector.broadcast %57 : vector<4x1xf32> to vector<4x256xf32>
    %59 = arith.addf %56, %58 : vector<4x256xf32>
    %c0_54 = arith.constant 0 : index
    %c0_55 = arith.constant 0 : index
    %60 = vector.load %arg4[%c0_54, %c0_55] : memref<16x32xf32, #tpu.memory_space<vmem>>, vector<16x32xf32>
    %61 = vector.extract_strided_slice %59 {offsets = [0, 0], sizes = [4, 16], strides = [1, 1]} : vector<4x256xf32> to vector<4x16xf32>
    %cst_56 = arith.constant dense<0.000000e+00> : vector<4x32xf32>
    %62 = tpu.matmul %61, %60, %cst_56 {dimension_numbers = #tpu.dot_dimension_numbers<[1], [0], [0], [1], [0, 0, 1, 1], [], []>} : vector<4x16xf32>, vector<16x32xf32>, vector<4x32xf32> -> vector<4x32xf32>
    %c0_57 = arith.constant 0 : index
    %c0_58 = arith.constant 0 : index
    %c0_59 = arith.constant 0 : index
    %63 = vector.load %arg13[%c0_57, %c0_58, %c0_59] : memref<16x4x32xf32, #tpu.memory_space<vmem>>, vector<1x4x32xf32>
    %64 = vector.shape_cast %63 : vector<1x4x32xf32> to vector<4x32xf32>
    %65 = vector.shape_cast %62 : vector<4x32xf32> to vector<1x4x32xf32>
    tpu.vector_store %arg13[%c0_57, %c0_58, %c0_59], %65 {strides = array<i32>} : memref<16x4x32xf32, #tpu.memory_space<vmem>>, vector<1x4x32xf32>,
    %66 = vector.extract_strided_slice %59 {offsets = [0, 16], sizes = [4, 16], strides = [1, 1]} : vector<4x256xf32> to vector<4x16xf32>
    %cst_60 = arith.constant dense<0.000000e+00> : vector<4x32xf32>
    %67 = tpu.matmul %66, %60, %cst_60 {dimension_numbers = #tpu.dot_dimension_numbers<[1], [0], [0], [1], [0, 0, 1, 1], [], []>} : vector<4x16xf32>, vector<16x32xf32>, vector<4x32xf32> -> vector<4x32xf32>
    %c1_61 = arith.constant 1 : index
    %c0_62 = arith.constant 0 : index
    %c0_63 = arith.constant 0 : index
    %68 = vector.load %arg13[%c1_61, %c0_62, %c0_63] : memref<16x4x32xf32, #tpu.memory_space<vmem>>, vector<1x4x32xf32>
    %69 = vector.shape_cast %68 : vector<1x4x32xf32> to vector<4x32xf32>
    %70 = vector.shape_cast %67 : vector<4x32xf32> to vector<1x4x32xf32>
    tpu.vector_store %arg13[%c1_61, %c0_62, %c0_63], %70 {strides = array<i32>} : memref<16x4x32xf32, #tpu.memory_space<vmem>>, vector<1x4x32xf32>,
    %71 = vector.extract_strided_slice %59 {offsets = [0, 32], sizes = [4, 16], strides = [1, 1]} : vector<4x256xf32> to vector<4x16xf32>
    %cst_64 = arith.constant dense<0.000000e+00> : vector<4x32xf32>
    %72 = tpu.matmul %71, %60, %cst_64 {dimension_numbers = #tpu.dot_dimension_numbers<[1], [0], [0], [1], [0, 0, 1, 1], [], []>} : vector<4x16xf32>, vector<16x32xf32>, vector<4x32xf32> -> vector<4x32xf32>
    %c2_65 = arith.constant 2 : index
    %c0_66 = arith.constant 0 : index
    %c0_67 = arith.constant 0 : index
    %73 = vector.load %arg13[%c2_65, %c0_66, %c0_67] : memref<16x4x32xf32, #tpu.memory_space<vmem>>, vector<1x4x32xf32>
    %74 = vector.shape_cast %73 : vector<1x4x32xf32> to vector<4x32xf32>
    %75 = vector.shape_cast %72 : vector<4x32xf32> to vector<1x4x32xf32>
    tpu.vector_store %arg13[%c2_65, %c0_66, %c0_67], %75 {strides = array<i32>} : memref<16x4x32xf32, #tpu.memory_space<vmem>>, vector<1x4x32xf32>,
    %76 = vector.extract_strided_slice %59 {offsets = [0, 48], sizes = [4, 16], strides = [1, 1]} : vector<4x256xf32> to vector<4x16xf32>
    %cst_68 = arith.constant dense<0.000000e+00> : vector<4x32xf32>
    %77 = tpu.matmul %76, %60, %cst_68 {dimension_numbers = #tpu.dot_dimension_numbers<[1], [0], [0], [1], [0, 0, 1, 1], [], []>} : vector<4x16xf32>, vector<16x32xf32>, vector<4x32xf32> -> vector<4x32xf32>
    %c3_69 = arith.constant 3 : index
    %c0_70 = arith.constant 0 : index
    %c0_71 = arith.constant 0 : index
    %78 = vector.load %arg13[%c3_69, %c0_70, %c0_71] : memref<16x4x32xf32, #tpu.memory_space<vmem>>, vector<1x4x32xf32>
    %79 = vector.shape_cast %78 : vector<1x4x32xf32> to vector<4x32xf32>
    %80 = vector.shape_cast %77 : vector<4x32xf32> to vector<1x4x32xf32>
    tpu.vector_store %arg13[%c3_69, %c0_70, %c0_71], %80 {strides = array<i32>} : memref<16x4x32xf32, #tpu.memory_space<vmem>>, vector<1x4x32xf32>,
    %81 = vector.extract_strided_slice %59 {offsets = [0, 64], sizes = [4, 16], strides = [1, 1]} : vector<4x256xf32> to vector<4x16xf32>
    %cst_72 = arith.constant dense<0.000000e+00> : vector<4x32xf32>
    %82 = tpu.matmul %81, %60, %cst_72 {dimension_numbers = #tpu.dot_dimension_numbers<[1], [0], [0], [1], [0, 0, 1, 1], [], []>} : vector<4x16xf32>, vector<16x32xf32>, vector<4x32xf32> -> vector<4x32xf32>
    %c4_73 = arith.constant 4 : index
    %c0_74 = arith.constant 0 : index
    %c0_75 = arith.constant 0 : index
    %83 = vector.load %arg13[%c4_73, %c0_74, %c0_75] : memref<16x4x32xf32, #tpu.memory_space<vmem>>, vector<1x4x32xf32>
    %84 = vector.shape_cast %83 : vector<1x4x32xf32> to vector<4x32xf32>
    %85 = vector.shape_cast %82 : vector<4x32xf32> to vector<1x4x32xf32>
    tpu.vector_store %arg13[%c4_73, %c0_74, %c0_75], %85 {strides = array<i32>} : memref<16x4x32xf32, #tpu.memory_space<vmem>>, vector<1x4x32xf32>,
    %86 = vector.extract_strided_slice %59 {offsets = [0, 80], sizes = [4, 16], strides = [1, 1]} : vector<4x256xf32> to vector<4x16xf32>
    %cst_76 = arith.constant dense<0.000000e+00> : vector<4x32xf32>
    %87 = tpu.matmul %86, %60, %cst_76 {dimension_numbers = #tpu.dot_dimension_numbers<[1], [0], [0], [1], [0, 0, 1, 1], [], []>} : vector<4x16xf32>, vector<16x32xf32>, vector<4x32xf32> -> vector<4x32xf32>
    %c5_77 = arith.constant 5 : index
    %c0_78 = arith.constant 0 : index
    %c0_79 = arith.constant 0 : index
    %88 = vector.load %arg13[%c5_77, %c0_78, %c0_79] : memref<16x4x32xf32, #tpu.memory_space<vmem>>, vector<1x4x32xf32>
    %89 = vector.shape_cast %88 : vector<1x4x32xf32> to vector<4x32xf32>
    %90 = vector.shape_cast %87 : vector<4x32xf32> to vector<1x4x32xf32>
    tpu.vector_store %arg13[%c5_77, %c0_78, %c0_79], %90 {strides = array<i32>} : memref<16x4x32xf32, #tpu.memory_space<vmem>>, vector<1x4x32xf32>,
    %91 = vector.extract_strided_slice %59 {offsets = [0, 96], sizes = [4, 16], strides = [1, 1]} : vector<4x256xf32> to vector<4x16xf32>
    %cst_80 = arith.constant dense<0.000000e+00> : vector<4x32xf32>
    %92 = tpu.matmul %91, %60, %cst_80 {dimension_numbers = #tpu.dot_dimension_numbers<[1], [0], [0], [1], [0, 0, 1, 1], [], []>} : vector<4x16xf32>, vector<16x32xf32>, vector<4x32xf32> -> vector<4x32xf32>
    %c6_81 = arith.constant 6 : index
    %c0_82 = arith.constant 0 : index
    %c0_83 = arith.constant 0 : index
    %93 = vector.load %arg13[%c6_81, %c0_82, %c0_83] : memref<16x4x32xf32, #tpu.memory_space<vmem>>, vector<1x4x32xf32>
    %94 = vector.shape_cast %93 : vector<1x4x32xf32> to vector<4x32xf32>
    %95 = vector.shape_cast %92 : vector<4x32xf32> to vector<1x4x32xf32>
    tpu.vector_store %arg13[%c6_81, %c0_82, %c0_83], %95 {strides = array<i32>} : memref<16x4x32xf32, #tpu.memory_space<vmem>>, vector<1x4x32xf32>,
    %96 = vector.extract_strided_slice %59 {offsets = [0, 112], sizes = [4, 16], strides = [1, 1]} : vector<4x256xf32> to vector<4x16xf32>
    %cst_84 = arith.constant dense<0.000000e+00> : vector<4x32xf32>
    %97 = tpu.matmul %96, %60, %cst_84 {dimension_numbers = #tpu.dot_dimension_numbers<[1], [0], [0], [1], [0, 0, 1, 1], [], []>} : vector<4x16xf32>, vector<16x32xf32>, vector<4x32xf32> -> vector<4x32xf32>
    %c7_85 = arith.constant 7 : index
    %c0_86 = arith.constant 0 : index
    %c0_87 = arith.constant 0 : index
    %98 = vector.load %arg13[%c7_85, %c0_86, %c0_87] : memref<16x4x32xf32, #tpu.memory_space<vmem>>, vector<1x4x32xf32>
    %99 = vector.shape_cast %98 : vector<1x4x32xf32> to vector<4x32xf32>
    %100 = vector.shape_cast %97 : vector<4x32xf32> to vector<1x4x32xf32>
    tpu.vector_store %arg13[%c7_85, %c0_86, %c0_87], %100 {strides = array<i32>} : memref<16x4x32xf32, #tpu.memory_space<vmem>>, vector<1x4x32xf32>,
    %101 = vector.extract_strided_slice %59 {offsets = [0, 128], sizes = [4, 16], strides = [1, 1]} : vector<4x256xf32> to vector<4x16xf32>
    %cst_88 = arith.constant dense<0.000000e+00> : vector<4x32xf32>
    %102 = tpu.matmul %101, %60, %cst_88 {dimension_numbers = #tpu.dot_dimension_numbers<[1], [0], [0], [1], [0, 0, 1, 1], [], []>} : vector<4x16xf32>, vector<16x32xf32>, vector<4x32xf32> -> vector<4x32xf32>
    %c8_89 = arith.constant 8 : index
    %c0_90 = arith.constant 0 : index
    %c0_91 = arith.constant 0 : index
    %103 = vector.load %arg13[%c8_89, %c0_90, %c0_91] : memref<16x4x32xf32, #tpu.memory_space<vmem>>, vector<1x4x32xf32>
    %104 = vector.shape_cast %103 : vector<1x4x32xf32> to vector<4x32xf32>
    %105 = vector.shape_cast %102 : vector<4x32xf32> to vector<1x4x32xf32>
    tpu.vector_store %arg13[%c8_89, %c0_90, %c0_91], %105 {strides = array<i32>} : memref<16x4x32xf32, #tpu.memory_space<vmem>>, vector<1x4x32xf32>,
    %106 = vector.extract_strided_slice %59 {offsets = [0, 144], sizes = [4, 16], strides = [1, 1]} : vector<4x256xf32> to vector<4x16xf32>
    %cst_92 = arith.constant dense<0.000000e+00> : vector<4x32xf32>
    %107 = tpu.matmul %106, %60, %cst_92 {dimension_numbers = #tpu.dot_dimension_numbers<[1], [0], [0], [1], [0, 0, 1, 1], [], []>} : vector<4x16xf32>, vector<16x32xf32>, vector<4x32xf32> -> vector<4x32xf32>
    %c9 = arith.constant 9 : index
    %c0_93 = arith.constant 0 : index
    %c0_94 = arith.constant 0 : index
    %108 = vector.load %arg13[%c9, %c0_93, %c0_94] : memref<16x4x32xf32, #tpu.memory_space<vmem>>, vector<1x4x32xf32>
    %109 = vector.shape_cast %108 : vector<1x4x32xf32> to vector<4x32xf32>
    %110 = vector.shape_cast %107 : vector<4x32xf32> to vector<1x4x32xf32>
    tpu.vector_store %arg13[%c9, %c0_93, %c0_94], %110 {strides = array<i32>} : memref<16x4x32xf32, #tpu.memory_space<vmem>>, vector<1x4x32xf32>,
    %111 = vector.extract_strided_slice %59 {offsets = [0, 160], sizes = [4, 16], strides = [1, 1]} : vector<4x256xf32> to vector<4x16xf32>
    %cst_95 = arith.constant dense<0.000000e+00> : vector<4x32xf32>
    %112 = tpu.matmul %111, %60, %cst_95 {dimension_numbers = #tpu.dot_dimension_numbers<[1], [0], [0], [1], [0, 0, 1, 1], [], []>} : vector<4x16xf32>, vector<16x32xf32>, vector<4x32xf32> -> vector<4x32xf32>
    %c10 = arith.constant 10 : index
    %c0_96 = arith.constant 0 : index
    %c0_97 = arith.constant 0 : index
    %113 = vector.load %arg13[%c10, %c0_96, %c0_97] : memref<16x4x32xf32, #tpu.memory_space<vmem>>, vector<1x4x32xf32>
    %114 = vector.shape_cast %113 : vector<1x4x32xf32> to vector<4x32xf32>
    %115 = vector.shape_cast %112 : vector<4x32xf32> to vector<1x4x32xf32>
    tpu.vector_store %arg13[%c10, %c0_96, %c0_97], %115 {strides = array<i32>} : memref<16x4x32xf32, #tpu.memory_space<vmem>>, vector<1x4x32xf32>,
    %116 = vector.extract_strided_slice %59 {offsets = [0, 176], sizes = [4, 16], strides = [1, 1]} : vector<4x256xf32> to vector<4x16xf32>
    %cst_98 = arith.constant dense<0.000000e+00> : vector<4x32xf32>
    %117 = tpu.matmul %116, %60, %cst_98 {dimension_numbers = #tpu.dot_dimension_numbers<[1], [0], [0], [1], [0, 0, 1, 1], [], []>} : vector<4x16xf32>, vector<16x32xf32>, vector<4x32xf32> -> vector<4x32xf32>
    %c11 = arith.constant 11 : index
    %c0_99 = arith.constant 0 : index
    %c0_100 = arith.constant 0 : index
    %118 = vector.load %arg13[%c11, %c0_99, %c0_100] : memref<16x4x32xf32, #tpu.memory_space<vmem>>, vector<1x4x32xf32>
    %119 = vector.shape_cast %118 : vector<1x4x32xf32> to vector<4x32xf32>
    %120 = vector.shape_cast %117 : vector<4x32xf32> to vector<1x4x32xf32>
    tpu.vector_store %arg13[%c11, %c0_99, %c0_100], %120 {strides = array<i32>} : memref<16x4x32xf32, #tpu.memory_space<vmem>>, vector<1x4x32xf32>,
    %121 = vector.extract_strided_slice %59 {offsets = [0, 192], sizes = [4, 16], strides = [1, 1]} : vector<4x256xf32> to vector<4x16xf32>
    %cst_101 = arith.constant dense<0.000000e+00> : vector<4x32xf32>
    %122 = tpu.matmul %121, %60, %cst_101 {dimension_numbers = #tpu.dot_dimension_numbers<[1], [0], [0], [1], [0, 0, 1, 1], [], []>} : vector<4x16xf32>, vector<16x32xf32>, vector<4x32xf32> -> vector<4x32xf32>
    %c12 = arith.constant 12 : index
    %c0_102 = arith.constant 0 : index
    %c0_103 = arith.constant 0 : index
    %123 = vector.load %arg13[%c12, %c0_102, %c0_103] : memref<16x4x32xf32, #tpu.memory_space<vmem>>, vector<1x4x32xf32>
    %124 = vector.shape_cast %123 : vector<1x4x32xf32> to vector<4x32xf32>
    %125 = vector.shape_cast %122 : vector<4x32xf32> to vector<1x4x32xf32>
    tpu.vector_store %arg13[%c12, %c0_102, %c0_103], %125 {strides = array<i32>} : memref<16x4x32xf32, #tpu.memory_space<vmem>>, vector<1x4x32xf32>,
    %126 = vector.extract_strided_slice %59 {offsets = [0, 208], sizes = [4, 16], strides = [1, 1]} : vector<4x256xf32> to vector<4x16xf32>
    %cst_104 = arith.constant dense<0.000000e+00> : vector<4x32xf32>
    %127 = tpu.matmul %126, %60, %cst_104 {dimension_numbers = #tpu.dot_dimension_numbers<[1], [0], [0], [1], [0, 0, 1, 1], [], []>} : vector<4x16xf32>, vector<16x32xf32>, vector<4x32xf32> -> vector<4x32xf32>
    %c13 = arith.constant 13 : index
    %c0_105 = arith.constant 0 : index
    %c0_106 = arith.constant 0 : index
    %128 = vector.load %arg13[%c13, %c0_105, %c0_106] : memref<16x4x32xf32, #tpu.memory_space<vmem>>, vector<1x4x32xf32>
    %129 = vector.shape_cast %128 : vector<1x4x32xf32> to vector<4x32xf32>
    %130 = vector.shape_cast %127 : vector<4x32xf32> to vector<1x4x32xf32>
    tpu.vector_store %arg13[%c13, %c0_105, %c0_106], %130 {strides = array<i32>} : memref<16x4x32xf32, #tpu.memory_space<vmem>>, vector<1x4x32xf32>,
    %131 = vector.extract_strided_slice %59 {offsets = [0, 224], sizes = [4, 16], strides = [1, 1]} : vector<4x256xf32> to vector<4x16xf32>
    %cst_107 = arith.constant dense<0.000000e+00> : vector<4x32xf32>
    %132 = tpu.matmul %131, %60, %cst_107 {dimension_numbers = #tpu.dot_dimension_numbers<[1], [0], [0], [1], [0, 0, 1, 1], [], []>} : vector<4x16xf32>, vector<16x32xf32>, vector<4x32xf32> -> vector<4x32xf32>
    %c14 = arith.constant 14 : index
    %c0_108 = arith.constant 0 : index
    %c0_109 = arith.constant 0 : index
    %133 = vector.load %arg13[%c14, %c0_108, %c0_109] : memref<16x4x32xf32, #tpu.memory_space<vmem>>, vector<1x4x32xf32>
    %134 = vector.shape_cast %133 : vector<1x4x32xf32> to vector<4x32xf32>
    %135 = vector.shape_cast %132 : vector<4x32xf32> to vector<1x4x32xf32>
    tpu.vector_store %arg13[%c14, %c0_108, %c0_109], %135 {strides = array<i32>} : memref<16x4x32xf32, #tpu.memory_space<vmem>>, vector<1x4x32xf32>,
    %136 = vector.extract_strided_slice %59 {offsets = [0, 240], sizes = [4, 16], strides = [1, 1]} : vector<4x256xf32> to vector<4x16xf32>
    %cst_110 = arith.constant dense<0.000000e+00> : vector<4x32xf32>
    %137 = tpu.matmul %136, %60, %cst_110 {dimension_numbers = #tpu.dot_dimension_numbers<[1], [0], [0], [1], [0, 0, 1, 1], [], []>} : vector<4x16xf32>, vector<16x32xf32>, vector<4x32xf32> -> vector<4x32xf32>
    %c15 = arith.constant 15 : index
    %c0_111 = arith.constant 0 : index
    %c0_112 = arith.constant 0 : index
    %138 = vector.load %arg13[%c15, %c0_111, %c0_112] : memref<16x4x32xf32, #tpu.memory_space<vmem>>, vector<1x4x32xf32>
    %139 = vector.shape_cast %138 : vector<1x4x32xf32> to vector<4x32xf32>
    %140 = vector.shape_cast %137 : vector<4x32xf32> to vector<1x4x32xf32>
    tpu.vector_store %arg13[%c15, %c0_111, %c0_112], %140 {strides = array<i32>} : memref<16x4x32xf32, #tpu.memory_space<vmem>>, vector<1x4x32xf32>,
    %cst_113 = arith.constant 0.000000e+00 : f32
    %141 = vector.broadcast %cst_113 : f32 to vector<4x33xf32>
    %c0_114 = arith.constant 0 : index
    %c0_115 = arith.constant 0 : index
    %142 = vector.load %arg14[%c0_114, %c0_115] : memref<4x1090xf32, #tpu.memory_space<vmem>>, vector<4x33xf32>
    tpu.vector_store %arg14[%c0_114, %c0_115], %141 {strides = array<i32>} : memref<4x1090xf32, #tpu.memory_space<vmem>>, vector<4x33xf32>,
    %cst_116 = arith.constant 0.000000e+00 : f32
    %143 = vector.broadcast %cst_116 : f32 to vector<4x33xf32>
    %c0_117 = arith.constant 0 : index
    %c1057 = arith.constant 1057 : index
    %144 = vector.load %arg14[%c0_117, %c1057] : memref<4x1090xf32, #tpu.memory_space<vmem>>, vector<4x33xf32>
    tpu.vector_store %arg14[%c0_117, %c1057], %143 {strides = array<i32>} : memref<4x1090xf32, #tpu.memory_space<vmem>>, vector<4x33xf32>,
    %c0_118 = arith.constant 0 : index
    %c0_119 = arith.constant 0 : index
    %c0_120 = arith.constant 0 : index
    %145 = vector.load %arg13[%c0_118, %c0_119, %c0_120] : memref<16x4x32xf32, #tpu.memory_space<vmem>>, vector<1x4x32xf32>
    %146 = vector.shape_cast %145 : vector<1x4x32xf32> to vector<4x32xf32>
    %cst_121 = arith.constant 1.000000e+00 : f32
    %147 = vector.broadcast %cst_121 : f32 to vector<4x32xf32>
    %148 = arith.mulf %146, %147 : vector<4x32xf32>
    %c0_122 = arith.constant 0 : index
    %c33_123 = arith.constant 33 : index
    %149 = vector.load %arg14[%c0_122, %c33_123] : memref<4x1090xf32, #tpu.memory_space<vmem>>, vector<4x32xf32>
    tpu.vector_store %arg14[%c0_122, %c33_123], %148 {strides = array<i32>} : memref<4x1090xf32, #tpu.memory_space<vmem>>, vector<4x32xf32>,
    %c0_124 = arith.constant 0 : index
    %c0_125 = arith.constant 0 : index
    %c0_126 = arith.constant 0 : index
    %150 = vector.load %arg13[%c0_124, %c0_125, %c0_126] : memref<16x4x32xf32, #tpu.memory_space<vmem>>, vector<1x4x32xf32>
    %151 = vector.shape_cast %150 : vector<1x4x32xf32> to vector<4x32xf32>
    %cst_127 = arith.constant 5.161290e-01 : f32
    %152 = vector.broadcast %cst_127 : f32 to vector<4x32xf32>
    %153 = arith.mulf %151, %152 : vector<4x32xf32>
    %c1_128 = arith.constant 1 : index
    %c0_129 = arith.constant 0 : index
    %c0_130 = arith.constant 0 : index
    %154 = vector.load %arg13[%c1_128, %c0_129, %c0_130] : memref<16x4x32xf32, #tpu.memory_space<vmem>>, vector<1x4x32xf32>
    %155 = vector.shape_cast %154 : vector<1x4x32xf32> to vector<4x32xf32>
    %cst_131 = arith.constant 0.483870953 : f32
    %156 = vector.broadcast %cst_131 : f32 to vector<4x32xf32>
    %157 = arith.mulf %155, %156 : vector<4x32xf32>
    %158 = arith.addf %153, %157 : vector<4x32xf32>
    %c0_132 = arith.constant 0 : index
    %c65 = arith.constant 65 : index
    %159 = vector.load %arg14[%c0_132, %c65] : memref<4x1090xf32, #tpu.memory_space<vmem>>, vector<4x32xf32>
    tpu.vector_store %arg14[%c0_132, %c65], %158 {strides = array<i32>} : memref<4x1090xf32, #tpu.memory_space<vmem>>, vector<4x32xf32>,
    %c0_133 = arith.constant 0 : index
    %c0_134 = arith.constant 0 : index
    %c0_135 = arith.constant 0 : index
    %160 = vector.load %arg13[%c0_133, %c0_134, %c0_135] : memref<16x4x32xf32, #tpu.memory_space<vmem>>, vector<1x4x32xf32>
    %161 = vector.shape_cast %160 : vector<1x4x32xf32> to vector<4x32xf32>
    %cst_136 = arith.constant 0.0322580636 : f32
    %162 = vector.broadcast %cst_136 : f32 to vector<4x32xf32>
    %163 = arith.mulf %161, %162 : vector<4x32xf32>
    %c1_137 = arith.constant 1 : index
    %c0_138 = arith.constant 0 : index
    %c0_139 = arith.constant 0 : index
    %164 = vector.load %arg13[%c1_137, %c0_138, %c0_139] : memref<16x4x32xf32, #tpu.memory_space<vmem>>, vector<1x4x32xf32>
    %165 = vector.shape_cast %164 : vector<1x4x32xf32> to vector<4x32xf32>
    %cst_140 = arith.constant 0.967741906 : f32
    %166 = vector.broadcast %cst_140 : f32 to vector<4x32xf32>
    %167 = arith.mulf %165, %166 : vector<4x32xf32>
    %168 = arith.addf %163, %167 : vector<4x32xf32>
    %c0_141 = arith.constant 0 : index
    %c97 = arith.constant 97 : index
    %169 = vector.load %arg14[%c0_141, %c97] : memref<4x1090xf32, #tpu.memory_space<vmem>>, vector<4x32xf32>
    tpu.vector_store %arg14[%c0_141, %c97], %168 {strides = array<i32>} : memref<4x1090xf32, #tpu.memory_space<vmem>>, vector<4x32xf32>,
    %c1_142 = arith.constant 1 : index
    %c0_143 = arith.constant 0 : index
    %c0_144 = arith.constant 0 : index
    %170 = vector.load %arg13[%c1_142, %c0_143, %c0_144] : memref<16x4x32xf32, #tpu.memory_space<vmem>>, vector<1x4x32xf32>
    %171 = vector.shape_cast %170 : vector<1x4x32xf32> to vector<4x32xf32>
    %cst_145 = arith.constant 0.54838711 : f32
    %172 = vector.broadcast %cst_145 : f32 to vector<4x32xf32>
    %173 = arith.mulf %171, %172 : vector<4x32xf32>
    %c2_146 = arith.constant 2 : index
    %c0_147 = arith.constant 0 : index
    %c0_148 = arith.constant 0 : index
    %174 = vector.load %arg13[%c2_146, %c0_147, %c0_148] : memref<16x4x32xf32, #tpu.memory_space<vmem>>, vector<1x4x32xf32>
    %175 = vector.shape_cast %174 : vector<1x4x32xf32> to vector<4x32xf32>
    %cst_149 = arith.constant 0.45161289 : f32
    %176 = vector.broadcast %cst_149 : f32 to vector<4x32xf32>
    %177 = arith.mulf %175, %176 : vector<4x32xf32>
    %178 = arith.addf %173, %177 : vector<4x32xf32>
    %c0_150 = arith.constant 0 : index
    %c129 = arith.constant 129 : index
    %179 = vector.load %arg14[%c0_150, %c129] : memref<4x1090xf32, #tpu.memory_space<vmem>>, vector<4x32xf32>
    tpu.vector_store %arg14[%c0_150, %c129], %178 {strides = array<i32>} : memref<4x1090xf32, #tpu.memory_space<vmem>>, vector<4x32xf32>,
    %c1_151 = arith.constant 1 : index
    %c0_152 = arith.constant 0 : index
    %c0_153 = arith.constant 0 : index
    %180 = vector.load %arg13[%c1_151, %c0_152, %c0_153] : memref<16x4x32xf32, #tpu.memory_space<vmem>>, vector<1x4x32xf32>
    %181 = vector.shape_cast %180 : vector<1x4x32xf32> to vector<4x32xf32>
    %cst_154 = arith.constant 0.0645161271 : f32
    %182 = vector.broadcast %cst_154 : f32 to vector<4x32xf32>
    %183 = arith.mulf %181, %182 : vector<4x32xf32>
    %c2_155 = arith.constant 2 : index
    %c0_156 = arith.constant 0 : index
    %c0_157 = arith.constant 0 : index
    %184 = vector.load %arg13[%c2_155, %c0_156, %c0_157] : memref<16x4x32xf32, #tpu.memory_space<vmem>>, vector<1x4x32xf32>
    %185 = vector.shape_cast %184 : vector<1x4x32xf32> to vector<4x32xf32>
    %cst_158 = arith.constant 0.935483872 : f32
    %186 = vector.broadcast %cst_158 : f32 to vector<4x32xf32>
    %187 = arith.mulf %185, %186 : vector<4x32xf32>
    %188 = arith.addf %183, %187 : vector<4x32xf32>
    %c0_159 = arith.constant 0 : index
    %c161 = arith.constant 161 : index
    %189 = vector.load %arg14[%c0_159, %c161] : memref<4x1090xf32, #tpu.memory_space<vmem>>, vector<4x32xf32>
    tpu.vector_store %arg14[%c0_159, %c161], %188 {strides = array<i32>} : memref<4x1090xf32, #tpu.memory_space<vmem>>, vector<4x32xf32>,
    %c2_160 = arith.constant 2 : index
    %c0_161 = arith.constant 0 : index
    %c0_162 = arith.constant 0 : index
    %190 = vector.load %arg13[%c2_160, %c0_161, %c0_162] : memref<16x4x32xf32, #tpu.memory_space<vmem>>, vector<1x4x32xf32>
    %191 = vector.shape_cast %190 : vector<1x4x32xf32> to vector<4x32xf32>
    %cst_163 = arith.constant 0.580645144 : f32
    %192 = vector.broadcast %cst_163 : f32 to vector<4x32xf32>
    %193 = arith.mulf %191, %192 : vector<4x32xf32>
    %c3_164 = arith.constant 3 : index
    %c0_165 = arith.constant 0 : index
    %c0_166 = arith.constant 0 : index
    %194 = vector.load %arg13[%c3_164, %c0_165, %c0_166] : memref<16x4x32xf32, #tpu.memory_space<vmem>>, vector<1x4x32xf32>
    %195 = vector.shape_cast %194 : vector<1x4x32xf32> to vector<4x32xf32>
    %cst_167 = arith.constant 0.419354826 : f32
    %196 = vector.broadcast %cst_167 : f32 to vector<4x32xf32>
    %197 = arith.mulf %195, %196 : vector<4x32xf32>
    %198 = arith.addf %193, %197 : vector<4x32xf32>
    %c0_168 = arith.constant 0 : index
    %c193 = arith.constant 193 : index
    %199 = vector.load %arg14[%c0_168, %c193] : memref<4x1090xf32, #tpu.memory_space<vmem>>, vector<4x32xf32>
    tpu.vector_store %arg14[%c0_168, %c193], %198 {strides = array<i32>} : memref<4x1090xf32, #tpu.memory_space<vmem>>, vector<4x32xf32>,
    %c2_169 = arith.constant 2 : index
    %c0_170 = arith.constant 0 : index
    %c0_171 = arith.constant 0 : index
    %200 = vector.load %arg13[%c2_169, %c0_170, %c0_171] : memref<16x4x32xf32, #tpu.memory_space<vmem>>, vector<1x4x32xf32>
    %201 = vector.shape_cast %200 : vector<1x4x32xf32> to vector<4x32xf32>
    %cst_172 = arith.constant 0.0967741906 : f32
    %202 = vector.broadcast %cst_172 : f32 to vector<4x32xf32>
    %203 = arith.mulf %201, %202 : vector<4x32xf32>
    %c3_173 = arith.constant 3 : index
    %c0_174 = arith.constant 0 : index
    %c0_175 = arith.constant 0 : index
    %204 = vector.load %arg13[%c3_173, %c0_174, %c0_175] : memref<16x4x32xf32, #tpu.memory_space<vmem>>, vector<1x4x32xf32>
    %205 = vector.shape_cast %204 : vector<1x4x32xf32> to vector<4x32xf32>
    %cst_176 = arith.constant 0.903225779 : f32
    %206 = vector.broadcast %cst_176 : f32 to vector<4x32xf32>
    %207 = arith.mulf %205, %206 : vector<4x32xf32>
    %208 = arith.addf %203, %207 : vector<4x32xf32>
    %c0_177 = arith.constant 0 : index
    %c225 = arith.constant 225 : index
    %209 = vector.load %arg14[%c0_177, %c225] : memref<4x1090xf32, #tpu.memory_space<vmem>>, vector<4x32xf32>
    tpu.vector_store %arg14[%c0_177, %c225], %208 {strides = array<i32>} : memref<4x1090xf32, #tpu.memory_space<vmem>>, vector<4x32xf32>,
    %c3_178 = arith.constant 3 : index
    %c0_179 = arith.constant 0 : index
    %c0_180 = arith.constant 0 : index
    %210 = vector.load %arg13[%c3_178, %c0_179, %c0_180] : memref<16x4x32xf32, #tpu.memory_space<vmem>>, vector<1x4x32xf32>
    %211 = vector.shape_cast %210 : vector<1x4x32xf32> to vector<4x32xf32>
    %cst_181 = arith.constant 0.612903237 : f32
    %212 = vector.broadcast %cst_181 : f32 to vector<4x32xf32>
    %213 = arith.mulf %211, %212 : vector<4x32xf32>
    %c4_182 = arith.constant 4 : index
    %c0_183 = arith.constant 0 : index
    %c0_184 = arith.constant 0 : index
    %214 = vector.load %arg13[%c4_182, %c0_183, %c0_184] : memref<16x4x32xf32, #tpu.memory_space<vmem>>, vector<1x4x32xf32>
    %215 = vector.shape_cast %214 : vector<1x4x32xf32> to vector<4x32xf32>
    %cst_185 = arith.constant 0.387096763 : f32
    %216 = vector.broadcast %cst_185 : f32 to vector<4x32xf32>
    %217 = arith.mulf %215, %216 : vector<4x32xf32>
    %218 = arith.addf %213, %217 : vector<4x32xf32>
    %c0_186 = arith.constant 0 : index
    %c257 = arith.constant 257 : index
    %219 = vector.load %arg14[%c0_186, %c257] : memref<4x1090xf32, #tpu.memory_space<vmem>>, vector<4x32xf32>
    tpu.vector_store %arg14[%c0_186, %c257], %218 {strides = array<i32>} : memref<4x1090xf32, #tpu.memory_space<vmem>>, vector<4x32xf32>,
    %c3_187 = arith.constant 3 : index
    %c0_188 = arith.constant 0 : index
    %c0_189 = arith.constant 0 : index
    %220 = vector.load %arg13[%c3_187, %c0_188, %c0_189] : memref<16x4x32xf32, #tpu.memory_space<vmem>>, vector<1x4x32xf32>
    %221 = vector.shape_cast %220 : vector<1x4x32xf32> to vector<4x32xf32>
    %cst_190 = arith.constant 0.129032254 : f32
    %222 = vector.broadcast %cst_190 : f32 to vector<4x32xf32>
    %223 = arith.mulf %221, %222 : vector<4x32xf32>
    %c4_191 = arith.constant 4 : index
    %c0_192 = arith.constant 0 : index
    %c0_193 = arith.constant 0 : index
    %224 = vector.load %arg13[%c4_191, %c0_192, %c0_193] : memref<16x4x32xf32, #tpu.memory_space<vmem>>, vector<1x4x32xf32>
    %225 = vector.shape_cast %224 : vector<1x4x32xf32> to vector<4x32xf32>
    %cst_194 = arith.constant 0.870967745 : f32
    %226 = vector.broadcast %cst_194 : f32 to vector<4x32xf32>
    %227 = arith.mulf %225, %226 : vector<4x32xf32>
    %228 = arith.addf %223, %227 : vector<4x32xf32>
    %c0_195 = arith.constant 0 : index
    %c289 = arith.constant 289 : index
    %229 = vector.load %arg14[%c0_195, %c289] : memref<4x1090xf32, #tpu.memory_space<vmem>>, vector<4x32xf32>
    tpu.vector_store %arg14[%c0_195, %c289], %228 {strides = array<i32>} : memref<4x1090xf32, #tpu.memory_space<vmem>>, vector<4x32xf32>,
    %c4_196 = arith.constant 4 : index
    %c0_197 = arith.constant 0 : index
    %c0_198 = arith.constant 0 : index
    %230 = vector.load %arg13[%c4_196, %c0_197, %c0_198] : memref<16x4x32xf32, #tpu.memory_space<vmem>>, vector<1x4x32xf32>
    %231 = vector.shape_cast %230 : vector<1x4x32xf32> to vector<4x32xf32>
    %cst_199 = arith.constant 0.645161271 : f32
    %232 = vector.broadcast %cst_199 : f32 to vector<4x32xf32>
    %233 = arith.mulf %231, %232 : vector<4x32xf32>
    %c5_200 = arith.constant 5 : index
    %c0_201 = arith.constant 0 : index
    %c0_202 = arith.constant 0 : index
    %234 = vector.load %arg13[%c5_200, %c0_201, %c0_202] : memref<16x4x32xf32, #tpu.memory_space<vmem>>, vector<1x4x32xf32>
    %235 = vector.shape_cast %234 : vector<1x4x32xf32> to vector<4x32xf32>
    %cst_203 = arith.constant 0.354838699 : f32
    %236 = vector.broadcast %cst_203 : f32 to vector<4x32xf32>
    %237 = arith.mulf %235, %236 : vector<4x32xf32>
    %238 = arith.addf %233, %237 : vector<4x32xf32>
    %c0_204 = arith.constant 0 : index
    %c321 = arith.constant 321 : index
    %239 = vector.load %arg14[%c0_204, %c321] : memref<4x1090xf32, #tpu.memory_space<vmem>>, vector<4x32xf32>
    tpu.vector_store %arg14[%c0_204, %c321], %238 {strides = array<i32>} : memref<4x1090xf32, #tpu.memory_space<vmem>>, vector<4x32xf32>,
    %c4_205 = arith.constant 4 : index
    %c0_206 = arith.constant 0 : index
    %c0_207 = arith.constant 0 : index
    %240 = vector.load %arg13[%c4_205, %c0_206, %c0_207] : memref<16x4x32xf32, #tpu.memory_space<vmem>>, vector<1x4x32xf32>
    %241 = vector.shape_cast %240 : vector<1x4x32xf32> to vector<4x32xf32>
    %cst_208 = arith.constant 0.161290318 : f32
    %242 = vector.broadcast %cst_208 : f32 to vector<4x32xf32>
    %243 = arith.mulf %241, %242 : vector<4x32xf32>
    %c5_209 = arith.constant 5 : index
    %c0_210 = arith.constant 0 : index
    %c0_211 = arith.constant 0 : index
    %244 = vector.load %arg13[%c5_209, %c0_210, %c0_211] : memref<16x4x32xf32, #tpu.memory_space<vmem>>, vector<1x4x32xf32>
    %245 = vector.shape_cast %244 : vector<1x4x32xf32> to vector<4x32xf32>
    %cst_212 = arith.constant 0.838709652 : f32
    %246 = vector.broadcast %cst_212 : f32 to vector<4x32xf32>
    %247 = arith.mulf %245, %246 : vector<4x32xf32>
    %248 = arith.addf %243, %247 : vector<4x32xf32>
    %c0_213 = arith.constant 0 : index
    %c353 = arith.constant 353 : index
    %249 = vector.load %arg14[%c0_213, %c353] : memref<4x1090xf32, #tpu.memory_space<vmem>>, vector<4x32xf32>
    tpu.vector_store %arg14[%c0_213, %c353], %248 {strides = array<i32>} : memref<4x1090xf32, #tpu.memory_space<vmem>>, vector<4x32xf32>,
    %c5_214 = arith.constant 5 : index
    %c0_215 = arith.constant 0 : index
    %c0_216 = arith.constant 0 : index
    %250 = vector.load %arg13[%c5_214, %c0_215, %c0_216] : memref<16x4x32xf32, #tpu.memory_space<vmem>>, vector<1x4x32xf32>
    %251 = vector.shape_cast %250 : vector<1x4x32xf32> to vector<4x32xf32>
    %cst_217 = arith.constant 0.677419364 : f32
    %252 = vector.broadcast %cst_217 : f32 to vector<4x32xf32>
    %253 = arith.mulf %251, %252 : vector<4x32xf32>
    %c6_218 = arith.constant 6 : index
    %c0_219 = arith.constant 0 : index
    %c0_220 = arith.constant 0 : index
    %254 = vector.load %arg13[%c6_218, %c0_219, %c0_220] : memref<16x4x32xf32, #tpu.memory_space<vmem>>, vector<1x4x32xf32>
    %255 = vector.shape_cast %254 : vector<1x4x32xf32> to vector<4x32xf32>
    %cst_221 = arith.constant 0.322580636 : f32
    %256 = vector.broadcast %cst_221 : f32 to vector<4x32xf32>
    %257 = arith.mulf %255, %256 : vector<4x32xf32>
    %258 = arith.addf %253, %257 : vector<4x32xf32>
    %c0_222 = arith.constant 0 : index
    %c385 = arith.constant 385 : index
    %259 = vector.load %arg14[%c0_222, %c385] : memref<4x1090xf32, #tpu.memory_space<vmem>>, vector<4x32xf32>
    tpu.vector_store %arg14[%c0_222, %c385], %258 {strides = array<i32>} : memref<4x1090xf32, #tpu.memory_space<vmem>>, vector<4x32xf32>,
    %c5_223 = arith.constant 5 : index
    %c0_224 = arith.constant 0 : index
    %c0_225 = arith.constant 0 : index
    %260 = vector.load %arg13[%c5_223, %c0_224, %c0_225] : memref<16x4x32xf32, #tpu.memory_space<vmem>>, vector<1x4x32xf32>
    %261 = vector.shape_cast %260 : vector<1x4x32xf32> to vector<4x32xf32>
    %cst_226 = arith.constant 0.193548381 : f32
    %262 = vector.broadcast %cst_226 : f32 to vector<4x32xf32>
    %263 = arith.mulf %261, %262 : vector<4x32xf32>
    %c6_227 = arith.constant 6 : index
    %c0_228 = arith.constant 0 : index
    %c0_229 = arith.constant 0 : index
    %264 = vector.load %arg13[%c6_227, %c0_228, %c0_229] : memref<16x4x32xf32, #tpu.memory_space<vmem>>, vector<1x4x32xf32>
    %265 = vector.shape_cast %264 : vector<1x4x32xf32> to vector<4x32xf32>
    %cst_230 = arith.constant 0.806451618 : f32
    %266 = vector.broadcast %cst_230 : f32 to vector<4x32xf32>
    %267 = arith.mulf %265, %266 : vector<4x32xf32>
    %268 = arith.addf %263, %267 : vector<4x32xf32>
    %c0_231 = arith.constant 0 : index
    %c417 = arith.constant 417 : index
    %269 = vector.load %arg14[%c0_231, %c417] : memref<4x1090xf32, #tpu.memory_space<vmem>>, vector<4x32xf32>
    tpu.vector_store %arg14[%c0_231, %c417], %268 {strides = array<i32>} : memref<4x1090xf32, #tpu.memory_space<vmem>>, vector<4x32xf32>,
    %c6_232 = arith.constant 6 : index
    %c0_233 = arith.constant 0 : index
    %c0_234 = arith.constant 0 : index
    %270 = vector.load %arg13[%c6_232, %c0_233, %c0_234] : memref<16x4x32xf32, #tpu.memory_space<vmem>>, vector<1x4x32xf32>
    %271 = vector.shape_cast %270 : vector<1x4x32xf32> to vector<4x32xf32>
    %cst_235 = arith.constant 0.709677398 : f32
    %272 = vector.broadcast %cst_235 : f32 to vector<4x32xf32>
    %273 = arith.mulf %271, %272 : vector<4x32xf32>
    %c7_236 = arith.constant 7 : index
    %c0_237 = arith.constant 0 : index
    %c0_238 = arith.constant 0 : index
    %274 = vector.load %arg13[%c7_236, %c0_237, %c0_238] : memref<16x4x32xf32, #tpu.memory_space<vmem>>, vector<1x4x32xf32>
    %275 = vector.shape_cast %274 : vector<1x4x32xf32> to vector<4x32xf32>
    %cst_239 = arith.constant 0.290322572 : f32
    %276 = vector.broadcast %cst_239 : f32 to vector<4x32xf32>
    %277 = arith.mulf %275, %276 : vector<4x32xf32>
    %278 = arith.addf %273, %277 : vector<4x32xf32>
    %c0_240 = arith.constant 0 : index
    %c449 = arith.constant 449 : index
    %279 = vector.load %arg14[%c0_240, %c449] : memref<4x1090xf32, #tpu.memory_space<vmem>>, vector<4x32xf32>
    tpu.vector_store %arg14[%c0_240, %c449], %278 {strides = array<i32>} : memref<4x1090xf32, #tpu.memory_space<vmem>>, vector<4x32xf32>,
    %c6_241 = arith.constant 6 : index
    %c0_242 = arith.constant 0 : index
    %c0_243 = arith.constant 0 : index
    %280 = vector.load %arg13[%c6_241, %c0_242, %c0_243] : memref<16x4x32xf32, #tpu.memory_space<vmem>>, vector<1x4x32xf32>
    %281 = vector.shape_cast %280 : vector<1x4x32xf32> to vector<4x32xf32>
    %cst_244 = arith.constant 0.225806445 : f32
    %282 = vector.broadcast %cst_244 : f32 to vector<4x32xf32>
    %283 = arith.mulf %281, %282 : vector<4x32xf32>
    %c7_245 = arith.constant 7 : index
    %c0_246 = arith.constant 0 : index
    %c0_247 = arith.constant 0 : index
    %284 = vector.load %arg13[%c7_245, %c0_246, %c0_247] : memref<16x4x32xf32, #tpu.memory_space<vmem>>, vector<1x4x32xf32>
    %285 = vector.shape_cast %284 : vector<1x4x32xf32> to vector<4x32xf32>
    %cst_248 = arith.constant 0.774193525 : f32
    %286 = vector.broadcast %cst_248 : f32 to vector<4x32xf32>
    %287 = arith.mulf %285, %286 : vector<4x32xf32>
    %288 = arith.addf %283, %287 : vector<4x32xf32>
    %c0_249 = arith.constant 0 : index
    %c481 = arith.constant 481 : index
    %289 = vector.load %arg14[%c0_249, %c481] : memref<4x1090xf32, #tpu.memory_space<vmem>>, vector<4x32xf32>
    tpu.vector_store %arg14[%c0_249, %c481], %288 {strides = array<i32>} : memref<4x1090xf32, #tpu.memory_space<vmem>>, vector<4x32xf32>,
    %c7_250 = arith.constant 7 : index
    %c0_251 = arith.constant 0 : index
    %c0_252 = arith.constant 0 : index
    %290 = vector.load %arg13[%c7_250, %c0_251, %c0_252] : memref<16x4x32xf32, #tpu.memory_space<vmem>>, vector<1x4x32xf32>
    %291 = vector.shape_cast %290 : vector<1x4x32xf32> to vector<4x32xf32>
    %cst_253 = arith.constant 0.741935492 : f32
    %292 = vector.broadcast %cst_253 : f32 to vector<4x32xf32>
    %293 = arith.mulf %291, %292 : vector<4x32xf32>
    %c8_254 = arith.constant 8 : index
    %c0_255 = arith.constant 0 : index
    %c0_256 = arith.constant 0 : index
    %294 = vector.load %arg13[%c8_254, %c0_255, %c0_256] : memref<16x4x32xf32, #tpu.memory_space<vmem>>, vector<1x4x32xf32>
    %295 = vector.shape_cast %294 : vector<1x4x32xf32> to vector<4x32xf32>
    %cst_257 = arith.constant 0.258064508 : f32
    %296 = vector.broadcast %cst_257 : f32 to vector<4x32xf32>
    %297 = arith.mulf %295, %296 : vector<4x32xf32>
    %298 = arith.addf %293, %297 : vector<4x32xf32>
    %c0_258 = arith.constant 0 : index
    %c513 = arith.constant 513 : index
    %299 = vector.load %arg14[%c0_258, %c513] : memref<4x1090xf32, #tpu.memory_space<vmem>>, vector<4x32xf32>
    tpu.vector_store %arg14[%c0_258, %c513], %298 {strides = array<i32>} : memref<4x1090xf32, #tpu.memory_space<vmem>>, vector<4x32xf32>,
    %c7_259 = arith.constant 7 : index
    %c0_260 = arith.constant 0 : index
    %c0_261 = arith.constant 0 : index
    %300 = vector.load %arg13[%c7_259, %c0_260, %c0_261] : memref<16x4x32xf32, #tpu.memory_space<vmem>>, vector<1x4x32xf32>
    %301 = vector.shape_cast %300 : vector<1x4x32xf32> to vector<4x32xf32>
    %cst_262 = arith.constant 0.258064508 : f32
    %302 = vector.broadcast %cst_262 : f32 to vector<4x32xf32>
    %303 = arith.mulf %301, %302 : vector<4x32xf32>
    %c8_263 = arith.constant 8 : index
    %c0_264 = arith.constant 0 : index
    %c0_265 = arith.constant 0 : index
    %304 = vector.load %arg13[%c8_263, %c0_264, %c0_265] : memref<16x4x32xf32, #tpu.memory_space<vmem>>, vector<1x4x32xf32>
    %305 = vector.shape_cast %304 : vector<1x4x32xf32> to vector<4x32xf32>
    %cst_266 = arith.constant 0.741935492 : f32
    %306 = vector.broadcast %cst_266 : f32 to vector<4x32xf32>
    %307 = arith.mulf %305, %306 : vector<4x32xf32>
    %308 = arith.addf %303, %307 : vector<4x32xf32>
    %c0_267 = arith.constant 0 : index
    %c545 = arith.constant 545 : index
    %309 = vector.load %arg14[%c0_267, %c545] : memref<4x1090xf32, #tpu.memory_space<vmem>>, vector<4x32xf32>
    tpu.vector_store %arg14[%c0_267, %c545], %308 {strides = array<i32>} : memref<4x1090xf32, #tpu.memory_space<vmem>>, vector<4x32xf32>,
    %c8_268 = arith.constant 8 : index
    %c0_269 = arith.constant 0 : index
    %c0_270 = arith.constant 0 : index
    %310 = vector.load %arg13[%c8_268, %c0_269, %c0_270] : memref<16x4x32xf32, #tpu.memory_space<vmem>>, vector<1x4x32xf32>
    %311 = vector.shape_cast %310 : vector<1x4x32xf32> to vector<4x32xf32>
    %cst_271 = arith.constant 0.774193525 : f32
    %312 = vector.broadcast %cst_271 : f32 to vector<4x32xf32>
    %313 = arith.mulf %311, %312 : vector<4x32xf32>
    %c9_272 = arith.constant 9 : index
    %c0_273 = arith.constant 0 : index
    %c0_274 = arith.constant 0 : index
    %314 = vector.load %arg13[%c9_272, %c0_273, %c0_274] : memref<16x4x32xf32, #tpu.memory_space<vmem>>, vector<1x4x32xf32>
    %315 = vector.shape_cast %314 : vector<1x4x32xf32> to vector<4x32xf32>
    %cst_275 = arith.constant 0.225806445 : f32
    %316 = vector.broadcast %cst_275 : f32 to vector<4x32xf32>
    %317 = arith.mulf %315, %316 : vector<4x32xf32>
    %318 = arith.addf %313, %317 : vector<4x32xf32>
    %c0_276 = arith.constant 0 : index
    %c577 = arith.constant 577 : index
    %319 = vector.load %arg14[%c0_276, %c577] : memref<4x1090xf32, #tpu.memory_space<vmem>>, vector<4x32xf32>
    tpu.vector_store %arg14[%c0_276, %c577], %318 {strides = array<i32>} : memref<4x1090xf32, #tpu.memory_space<vmem>>, vector<4x32xf32>,
    %c8_277 = arith.constant 8 : index
    %c0_278 = arith.constant 0 : index
    %c0_279 = arith.constant 0 : index
    %320 = vector.load %arg13[%c8_277, %c0_278, %c0_279] : memref<16x4x32xf32, #tpu.memory_space<vmem>>, vector<1x4x32xf32>
    %321 = vector.shape_cast %320 : vector<1x4x32xf32> to vector<4x32xf32>
    %cst_280 = arith.constant 0.290322572 : f32
    %322 = vector.broadcast %cst_280 : f32 to vector<4x32xf32>
    %323 = arith.mulf %321, %322 : vector<4x32xf32>
    %c9_281 = arith.constant 9 : index
    %c0_282 = arith.constant 0 : index
    %c0_283 = arith.constant 0 : index
    %324 = vector.load %arg13[%c9_281, %c0_282, %c0_283] : memref<16x4x32xf32, #tpu.memory_space<vmem>>, vector<1x4x32xf32>
    %325 = vector.shape_cast %324 : vector<1x4x32xf32> to vector<4x32xf32>
    %cst_284 = arith.constant 0.709677398 : f32
    %326 = vector.broadcast %cst_284 : f32 to vector<4x32xf32>
    %327 = arith.mulf %325, %326 : vector<4x32xf32>
    %328 = arith.addf %323, %327 : vector<4x32xf32>
    %c0_285 = arith.constant 0 : index
    %c609 = arith.constant 609 : index
    %329 = vector.load %arg14[%c0_285, %c609] : memref<4x1090xf32, #tpu.memory_space<vmem>>, vector<4x32xf32>
    tpu.vector_store %arg14[%c0_285, %c609], %328 {strides = array<i32>} : memref<4x1090xf32, #tpu.memory_space<vmem>>, vector<4x32xf32>,
    %c9_286 = arith.constant 9 : index
    %c0_287 = arith.constant 0 : index
    %c0_288 = arith.constant 0 : index
    %330 = vector.load %arg13[%c9_286, %c0_287, %c0_288] : memref<16x4x32xf32, #tpu.memory_space<vmem>>, vector<1x4x32xf32>
    %331 = vector.shape_cast %330 : vector<1x4x32xf32> to vector<4x32xf32>
    %cst_289 = arith.constant 0.806451618 : f32
    %332 = vector.broadcast %cst_289 : f32 to vector<4x32xf32>
    %333 = arith.mulf %331, %332 : vector<4x32xf32>
    %c10_290 = arith.constant 10 : index
    %c0_291 = arith.constant 0 : index
    %c0_292 = arith.constant 0 : index
    %334 = vector.load %arg13[%c10_290, %c0_291, %c0_292] : memref<16x4x32xf32, #tpu.memory_space<vmem>>, vector<1x4x32xf32>
    %335 = vector.shape_cast %334 : vector<1x4x32xf32> to vector<4x32xf32>
    %cst_293 = arith.constant 0.193548381 : f32
    %336 = vector.broadcast %cst_293 : f32 to vector<4x32xf32>
    %337 = arith.mulf %335, %336 : vector<4x32xf32>
    %338 = arith.addf %333, %337 : vector<4x32xf32>
    %c0_294 = arith.constant 0 : index
    %c641 = arith.constant 641 : index
    %339 = vector.load %arg14[%c0_294, %c641] : memref<4x1090xf32, #tpu.memory_space<vmem>>, vector<4x32xf32>
    tpu.vector_store %arg14[%c0_294, %c641], %338 {strides = array<i32>} : memref<4x1090xf32, #tpu.memory_space<vmem>>, vector<4x32xf32>,
    %c9_295 = arith.constant 9 : index
    %c0_296 = arith.constant 0 : index
    %c0_297 = arith.constant 0 : index
    %340 = vector.load %arg13[%c9_295, %c0_296, %c0_297] : memref<16x4x32xf32, #tpu.memory_space<vmem>>, vector<1x4x32xf32>
    %341 = vector.shape_cast %340 : vector<1x4x32xf32> to vector<4x32xf32>
    %cst_298 = arith.constant 0.322580636 : f32
    %342 = vector.broadcast %cst_298 : f32 to vector<4x32xf32>
    %343 = arith.mulf %341, %342 : vector<4x32xf32>
    %c10_299 = arith.constant 10 : index
    %c0_300 = arith.constant 0 : index
    %c0_301 = arith.constant 0 : index
    %344 = vector.load %arg13[%c10_299, %c0_300, %c0_301] : memref<16x4x32xf32, #tpu.memory_space<vmem>>, vector<1x4x32xf32>
    %345 = vector.shape_cast %344 : vector<1x4x32xf32> to vector<4x32xf32>
    %cst_302 = arith.constant 0.677419364 : f32
    %346 = vector.broadcast %cst_302 : f32 to vector<4x32xf32>
    %347 = arith.mulf %345, %346 : vector<4x32xf32>
    %348 = arith.addf %343, %347 : vector<4x32xf32>
    %c0_303 = arith.constant 0 : index
    %c673 = arith.constant 673 : index
    %349 = vector.load %arg14[%c0_303, %c673] : memref<4x1090xf32, #tpu.memory_space<vmem>>, vector<4x32xf32>
    tpu.vector_store %arg14[%c0_303, %c673], %348 {strides = array<i32>} : memref<4x1090xf32, #tpu.memory_space<vmem>>, vector<4x32xf32>,
    %c10_304 = arith.constant 10 : index
    %c0_305 = arith.constant 0 : index
    %c0_306 = arith.constant 0 : index
    %350 = vector.load %arg13[%c10_304, %c0_305, %c0_306] : memref<16x4x32xf32, #tpu.memory_space<vmem>>, vector<1x4x32xf32>
    %351 = vector.shape_cast %350 : vector<1x4x32xf32> to vector<4x32xf32>
    %cst_307 = arith.constant 0.838709652 : f32
    %352 = vector.broadcast %cst_307 : f32 to vector<4x32xf32>
    %353 = arith.mulf %351, %352 : vector<4x32xf32>
    %c11_308 = arith.constant 11 : index
    %c0_309 = arith.constant 0 : index
    %c0_310 = arith.constant 0 : index
    %354 = vector.load %arg13[%c11_308, %c0_309, %c0_310] : memref<16x4x32xf32, #tpu.memory_space<vmem>>, vector<1x4x32xf32>
    %355 = vector.shape_cast %354 : vector<1x4x32xf32> to vector<4x32xf32>
    %cst_311 = arith.constant 0.161290318 : f32
    %356 = vector.broadcast %cst_311 : f32 to vector<4x32xf32>
    %357 = arith.mulf %355, %356 : vector<4x32xf32>
    %358 = arith.addf %353, %357 : vector<4x32xf32>
    %c0_312 = arith.constant 0 : index
    %c705 = arith.constant 705 : index
    %359 = vector.load %arg14[%c0_312, %c705] : memref<4x1090xf32, #tpu.memory_space<vmem>>, vector<4x32xf32>
    tpu.vector_store %arg14[%c0_312, %c705], %358 {strides = array<i32>} : memref<4x1090xf32, #tpu.memory_space<vmem>>, vector<4x32xf32>,
    %c10_313 = arith.constant 10 : index
    %c0_314 = arith.constant 0 : index
    %c0_315 = arith.constant 0 : index
    %360 = vector.load %arg13[%c10_313, %c0_314, %c0_315] : memref<16x4x32xf32, #tpu.memory_space<vmem>>, vector<1x4x32xf32>
    %361 = vector.shape_cast %360 : vector<1x4x32xf32> to vector<4x32xf32>
    %cst_316 = arith.constant 0.354838699 : f32
    %362 = vector.broadcast %cst_316 : f32 to vector<4x32xf32>
    %363 = arith.mulf %361, %362 : vector<4x32xf32>
    %c11_317 = arith.constant 11 : index
    %c0_318 = arith.constant 0 : index
    %c0_319 = arith.constant 0 : index
    %364 = vector.load %arg13[%c11_317, %c0_318, %c0_319] : memref<16x4x32xf32, #tpu.memory_space<vmem>>, vector<1x4x32xf32>
    %365 = vector.shape_cast %364 : vector<1x4x32xf32> to vector<4x32xf32>
    %cst_320 = arith.constant 0.645161271 : f32
    %366 = vector.broadcast %cst_320 : f32 to vector<4x32xf32>
    %367 = arith.mulf %365, %366 : vector<4x32xf32>
    %368 = arith.addf %363, %367 : vector<4x32xf32>
    %c0_321 = arith.constant 0 : index
    %c737 = arith.constant 737 : index
    %369 = vector.load %arg14[%c0_321, %c737] : memref<4x1090xf32, #tpu.memory_space<vmem>>, vector<4x32xf32>
    tpu.vector_store %arg14[%c0_321, %c737], %368 {strides = array<i32>} : memref<4x1090xf32, #tpu.memory_space<vmem>>, vector<4x32xf32>,
    %c11_322 = arith.constant 11 : index
    %c0_323 = arith.constant 0 : index
    %c0_324 = arith.constant 0 : index
    %370 = vector.load %arg13[%c11_322, %c0_323, %c0_324] : memref<16x4x32xf32, #tpu.memory_space<vmem>>, vector<1x4x32xf32>
    %371 = vector.shape_cast %370 : vector<1x4x32xf32> to vector<4x32xf32>
    %cst_325 = arith.constant 0.870967745 : f32
    %372 = vector.broadcast %cst_325 : f32 to vector<4x32xf32>
    %373 = arith.mulf %371, %372 : vector<4x32xf32>
    %c12_326 = arith.constant 12 : index
    %c0_327 = arith.constant 0 : index
    %c0_328 = arith.constant 0 : index
    %374 = vector.load %arg13[%c12_326, %c0_327, %c0_328] : memref<16x4x32xf32, #tpu.memory_space<vmem>>, vector<1x4x32xf32>
    %375 = vector.shape_cast %374 : vector<1x4x32xf32> to vector<4x32xf32>
    %cst_329 = arith.constant 0.129032254 : f32
    %376 = vector.broadcast %cst_329 : f32 to vector<4x32xf32>
    %377 = arith.mulf %375, %376 : vector<4x32xf32>
    %378 = arith.addf %373, %377 : vector<4x32xf32>
    %c0_330 = arith.constant 0 : index
    %c769 = arith.constant 769 : index
    %379 = vector.load %arg14[%c0_330, %c769] : memref<4x1090xf32, #tpu.memory_space<vmem>>, vector<4x32xf32>
    tpu.vector_store %arg14[%c0_330, %c769], %378 {strides = array<i32>} : memref<4x1090xf32, #tpu.memory_space<vmem>>, vector<4x32xf32>,
    %c11_331 = arith.constant 11 : index
    %c0_332 = arith.constant 0 : index
    %c0_333 = arith.constant 0 : index
    %380 = vector.load %arg13[%c11_331, %c0_332, %c0_333] : memref<16x4x32xf32, #tpu.memory_space<vmem>>, vector<1x4x32xf32>
    %381 = vector.shape_cast %380 : vector<1x4x32xf32> to vector<4x32xf32>
    %cst_334 = arith.constant 0.387096763 : f32
    %382 = vector.broadcast %cst_334 : f32 to vector<4x32xf32>
    %383 = arith.mulf %381, %382 : vector<4x32xf32>
    %c12_335 = arith.constant 12 : index
    %c0_336 = arith.constant 0 : index
    %c0_337 = arith.constant 0 : index
    %384 = vector.load %arg13[%c12_335, %c0_336, %c0_337] : memref<16x4x32xf32, #tpu.memory_space<vmem>>, vector<1x4x32xf32>
    %385 = vector.shape_cast %384 : vector<1x4x32xf32> to vector<4x32xf32>
    %cst_338 = arith.constant 0.612903237 : f32
    %386 = vector.broadcast %cst_338 : f32 to vector<4x32xf32>
    %387 = arith.mulf %385, %386 : vector<4x32xf32>
    %388 = arith.addf %383, %387 : vector<4x32xf32>
    %c0_339 = arith.constant 0 : index
    %c801 = arith.constant 801 : index
    %389 = vector.load %arg14[%c0_339, %c801] : memref<4x1090xf32, #tpu.memory_space<vmem>>, vector<4x32xf32>
    tpu.vector_store %arg14[%c0_339, %c801], %388 {strides = array<i32>} : memref<4x1090xf32, #tpu.memory_space<vmem>>, vector<4x32xf32>,
    %c12_340 = arith.constant 12 : index
    %c0_341 = arith.constant 0 : index
    %c0_342 = arith.constant 0 : index
    %390 = vector.load %arg13[%c12_340, %c0_341, %c0_342] : memref<16x4x32xf32, #tpu.memory_space<vmem>>, vector<1x4x32xf32>
    %391 = vector.shape_cast %390 : vector<1x4x32xf32> to vector<4x32xf32>
    %cst_343 = arith.constant 0.903225779 : f32
    %392 = vector.broadcast %cst_343 : f32 to vector<4x32xf32>
    %393 = arith.mulf %391, %392 : vector<4x32xf32>
    %c13_344 = arith.constant 13 : index
    %c0_345 = arith.constant 0 : index
    %c0_346 = arith.constant 0 : index
    %394 = vector.load %arg13[%c13_344, %c0_345, %c0_346] : memref<16x4x32xf32, #tpu.memory_space<vmem>>, vector<1x4x32xf32>
    %395 = vector.shape_cast %394 : vector<1x4x32xf32> to vector<4x32xf32>
    %cst_347 = arith.constant 0.0967741906 : f32
    %396 = vector.broadcast %cst_347 : f32 to vector<4x32xf32>
    %397 = arith.mulf %395, %396 : vector<4x32xf32>
    %398 = arith.addf %393, %397 : vector<4x32xf32>
    %c0_348 = arith.constant 0 : index
    %c833 = arith.constant 833 : index
    %399 = vector.load %arg14[%c0_348, %c833] : memref<4x1090xf32, #tpu.memory_space<vmem>>, vector<4x32xf32>
    tpu.vector_store %arg14[%c0_348, %c833], %398 {strides = array<i32>} : memref<4x1090xf32, #tpu.memory_space<vmem>>, vector<4x32xf32>,
    %c12_349 = arith.constant 12 : index
    %c0_350 = arith.constant 0 : index
    %c0_351 = arith.constant 0 : index
    %400 = vector.load %arg13[%c12_349, %c0_350, %c0_351] : memref<16x4x32xf32, #tpu.memory_space<vmem>>, vector<1x4x32xf32>
    %401 = vector.shape_cast %400 : vector<1x4x32xf32> to vector<4x32xf32>
    %cst_352 = arith.constant 0.419354826 : f32
    %402 = vector.broadcast %cst_352 : f32 to vector<4x32xf32>
    %403 = arith.mulf %401, %402 : vector<4x32xf32>
    %c13_353 = arith.constant 13 : index
    %c0_354 = arith.constant 0 : index
    %c0_355 = arith.constant 0 : index
    %404 = vector.load %arg13[%c13_353, %c0_354, %c0_355] : memref<16x4x32xf32, #tpu.memory_space<vmem>>, vector<1x4x32xf32>
    %405 = vector.shape_cast %404 : vector<1x4x32xf32> to vector<4x32xf32>
    %cst_356 = arith.constant 0.580645144 : f32
    %406 = vector.broadcast %cst_356 : f32 to vector<4x32xf32>
    %407 = arith.mulf %405, %406 : vector<4x32xf32>
    %408 = arith.addf %403, %407 : vector<4x32xf32>
    %c0_357 = arith.constant 0 : index
    %c865 = arith.constant 865 : index
    %409 = vector.load %arg14[%c0_357, %c865] : memref<4x1090xf32, #tpu.memory_space<vmem>>, vector<4x32xf32>
    tpu.vector_store %arg14[%c0_357, %c865], %408 {strides = array<i32>} : memref<4x1090xf32, #tpu.memory_space<vmem>>, vector<4x32xf32>,
    %c13_358 = arith.constant 13 : index
    %c0_359 = arith.constant 0 : index
    %c0_360 = arith.constant 0 : index
    %410 = vector.load %arg13[%c13_358, %c0_359, %c0_360] : memref<16x4x32xf32, #tpu.memory_space<vmem>>, vector<1x4x32xf32>
    %411 = vector.shape_cast %410 : vector<1x4x32xf32> to vector<4x32xf32>
    %cst_361 = arith.constant 0.935483872 : f32
    %412 = vector.broadcast %cst_361 : f32 to vector<4x32xf32>
    %413 = arith.mulf %411, %412 : vector<4x32xf32>
    %c14_362 = arith.constant 14 : index
    %c0_363 = arith.constant 0 : index
    %c0_364 = arith.constant 0 : index
    %414 = vector.load %arg13[%c14_362, %c0_363, %c0_364] : memref<16x4x32xf32, #tpu.memory_space<vmem>>, vector<1x4x32xf32>
    %415 = vector.shape_cast %414 : vector<1x4x32xf32> to vector<4x32xf32>
    %cst_365 = arith.constant 0.0645161271 : f32
    %416 = vector.broadcast %cst_365 : f32 to vector<4x32xf32>
    %417 = arith.mulf %415, %416 : vector<4x32xf32>
    %418 = arith.addf %413, %417 : vector<4x32xf32>
    %c0_366 = arith.constant 0 : index
    %c897 = arith.constant 897 : index
    %419 = vector.load %arg14[%c0_366, %c897] : memref<4x1090xf32, #tpu.memory_space<vmem>>, vector<4x32xf32>
    tpu.vector_store %arg14[%c0_366, %c897], %418 {strides = array<i32>} : memref<4x1090xf32, #tpu.memory_space<vmem>>, vector<4x32xf32>,
    %c13_367 = arith.constant 13 : index
    %c0_368 = arith.constant 0 : index
    %c0_369 = arith.constant 0 : index
    %420 = vector.load %arg13[%c13_367, %c0_368, %c0_369] : memref<16x4x32xf32, #tpu.memory_space<vmem>>, vector<1x4x32xf32>
    %421 = vector.shape_cast %420 : vector<1x4x32xf32> to vector<4x32xf32>
    %cst_370 = arith.constant 0.45161289 : f32
    %422 = vector.broadcast %cst_370 : f32 to vector<4x32xf32>
    %423 = arith.mulf %421, %422 : vector<4x32xf32>
    %c14_371 = arith.constant 14 : index
    %c0_372 = arith.constant 0 : index
    %c0_373 = arith.constant 0 : index
    %424 = vector.load %arg13[%c14_371, %c0_372, %c0_373] : memref<16x4x32xf32, #tpu.memory_space<vmem>>, vector<1x4x32xf32>
    %425 = vector.shape_cast %424 : vector<1x4x32xf32> to vector<4x32xf32>
    %cst_374 = arith.constant 0.54838711 : f32
    %426 = vector.broadcast %cst_374 : f32 to vector<4x32xf32>
    %427 = arith.mulf %425, %426 : vector<4x32xf32>
    %428 = arith.addf %423, %427 : vector<4x32xf32>
    %c0_375 = arith.constant 0 : index
    %c929 = arith.constant 929 : index
    %429 = vector.load %arg14[%c0_375, %c929] : memref<4x1090xf32, #tpu.memory_space<vmem>>, vector<4x32xf32>
    tpu.vector_store %arg14[%c0_375, %c929], %428 {strides = array<i32>} : memref<4x1090xf32, #tpu.memory_space<vmem>>, vector<4x32xf32>,
    %c14_376 = arith.constant 14 : index
    %c0_377 = arith.constant 0 : index
    %c0_378 = arith.constant 0 : index
    %430 = vector.load %arg13[%c14_376, %c0_377, %c0_378] : memref<16x4x32xf32, #tpu.memory_space<vmem>>, vector<1x4x32xf32>
    %431 = vector.shape_cast %430 : vector<1x4x32xf32> to vector<4x32xf32>
    %cst_379 = arith.constant 0.967741906 : f32
    %432 = vector.broadcast %cst_379 : f32 to vector<4x32xf32>
    %433 = arith.mulf %431, %432 : vector<4x32xf32>
    %c15_380 = arith.constant 15 : index
    %c0_381 = arith.constant 0 : index
    %c0_382 = arith.constant 0 : index
    %434 = vector.load %arg13[%c15_380, %c0_381, %c0_382] : memref<16x4x32xf32, #tpu.memory_space<vmem>>, vector<1x4x32xf32>
    %435 = vector.shape_cast %434 : vector<1x4x32xf32> to vector<4x32xf32>
    %cst_383 = arith.constant 0.0322580636 : f32
    %436 = vector.broadcast %cst_383 : f32 to vector<4x32xf32>
    %437 = arith.mulf %435, %436 : vector<4x32xf32>
    %438 = arith.addf %433, %437 : vector<4x32xf32>
    %c0_384 = arith.constant 0 : index
    %c961 = arith.constant 961 : index
    %439 = vector.load %arg14[%c0_384, %c961] : memref<4x1090xf32, #tpu.memory_space<vmem>>, vector<4x32xf32>
    tpu.vector_store %arg14[%c0_384, %c961], %438 {strides = array<i32>} : memref<4x1090xf32, #tpu.memory_space<vmem>>, vector<4x32xf32>,
    %c14_385 = arith.constant 14 : index
    %c0_386 = arith.constant 0 : index
    %c0_387 = arith.constant 0 : index
    %440 = vector.load %arg13[%c14_385, %c0_386, %c0_387] : memref<16x4x32xf32, #tpu.memory_space<vmem>>, vector<1x4x32xf32>
    %441 = vector.shape_cast %440 : vector<1x4x32xf32> to vector<4x32xf32>
    %cst_388 = arith.constant 0.483870953 : f32
    %442 = vector.broadcast %cst_388 : f32 to vector<4x32xf32>
    %443 = arith.mulf %441, %442 : vector<4x32xf32>
    %c15_389 = arith.constant 15 : index
    %c0_390 = arith.constant 0 : index
    %c0_391 = arith.constant 0 : index
    %444 = vector.load %arg13[%c15_389, %c0_390, %c0_391] : memref<16x4x32xf32, #tpu.memory_space<vmem>>, vector<1x4x32xf32>
    %445 = vector.shape_cast %444 : vector<1x4x32xf32> to vector<4x32xf32>
    %cst_392 = arith.constant 5.161290e-01 : f32
    %446 = vector.broadcast %cst_392 : f32 to vector<4x32xf32>
    %447 = arith.mulf %445, %446 : vector<4x32xf32>
    %448 = arith.addf %443, %447 : vector<4x32xf32>
    %c0_393 = arith.constant 0 : index
    %c993 = arith.constant 993 : index
    %449 = vector.load %arg14[%c0_393, %c993] : memref<4x1090xf32, #tpu.memory_space<vmem>>, vector<4x32xf32>
    tpu.vector_store %arg14[%c0_393, %c993], %448 {strides = array<i32>} : memref<4x1090xf32, #tpu.memory_space<vmem>>, vector<4x32xf32>,
    %c15_394 = arith.constant 15 : index
    %c0_395 = arith.constant 0 : index
    %c0_396 = arith.constant 0 : index
    %450 = vector.load %arg13[%c15_394, %c0_395, %c0_396] : memref<16x4x32xf32, #tpu.memory_space<vmem>>, vector<1x4x32xf32>
    %451 = vector.shape_cast %450 : vector<1x4x32xf32> to vector<4x32xf32>
    %cst_397 = arith.constant 1.000000e+00 : f32
    %452 = vector.broadcast %cst_397 : f32 to vector<4x32xf32>
    %453 = arith.mulf %451, %452 : vector<4x32xf32>
    %c0_398 = arith.constant 0 : index
    %c1025 = arith.constant 1025 : index
    %454 = vector.load %arg14[%c0_398, %c1025] : memref<4x1090xf32, #tpu.memory_space<vmem>>, vector<4x32xf32>
    tpu.vector_store %arg14[%c0_398, %c1025], %453 {strides = array<i32>} : memref<4x1090xf32, #tpu.memory_space<vmem>>, vector<4x32xf32>,
    %c0_399 = arith.constant 0 : index
    %c0_400 = arith.constant 0 : index
    %455 = vector.load %arg14[%c0_399, %c0_400] : memref<4x1090xf32, #tpu.memory_space<vmem>>, vector<4x1024xf32>
    %c0_401 = arith.constant 0 : index
    %c0_402 = arith.constant 0 : index
    %c0_403 = arith.constant 0 : index
    %456 = vector.load %arg6[%c0_401, %c0_402, %c0_403] : memref<9x32x4xf32, #tpu.memory_space<vmem>>, vector<1x32x4xf32>
    %457 = vector.shape_cast %456 : vector<1x32x4xf32> to vector<32x4xf32>
    %cst_404 = arith.constant dense<0.000000e+00> : vector<32x1024xf32>
    %458 = tpu.matmul %457, %455, %cst_404 {dimension_numbers = #tpu.dot_dimension_numbers<[1], [0], [0], [1], [0, 0, 1, 1], [], []>} : vector<32x4xf32>, vector<4x1024xf32>, vector<32x1024xf32> -> vector<32x1024xf32>
    %c0_405 = arith.constant 0 : index
    %c32_406 = arith.constant 32 : index
    %459 = vector.load %arg14[%c0_405, %c32_406] : memref<4x1090xf32, #tpu.memory_space<vmem>>, vector<4x1024xf32>
    %c3_407 = arith.constant 3 : index
    %c0_408 = arith.constant 0 : index
    %c0_409 = arith.constant 0 : index
    %460 = vector.load %arg6[%c3_407, %c0_408, %c0_409] : memref<9x32x4xf32, #tpu.memory_space<vmem>>, vector<1x32x4xf32>
    %461 = vector.shape_cast %460 : vector<1x32x4xf32> to vector<32x4xf32>
    %cst_410 = arith.constant dense<0.000000e+00> : vector<32x1024xf32>
    %462 = tpu.matmul %461, %459, %cst_410 {dimension_numbers = #tpu.dot_dimension_numbers<[1], [0], [0], [1], [0, 0, 1, 1], [], []>} : vector<32x4xf32>, vector<4x1024xf32>, vector<32x1024xf32> -> vector<32x1024xf32>
    %463 = arith.addf %458, %462 : vector<32x1024xf32>
    %c0_411 = arith.constant 0 : index
    %c64 = arith.constant 64 : index
    %464 = vector.load %arg14[%c0_411, %c64] : memref<4x1090xf32, #tpu.memory_space<vmem>>, vector<4x1024xf32>
    %c6_412 = arith.constant 6 : index
    %c0_413 = arith.constant 0 : index
    %c0_414 = arith.constant 0 : index
    %465 = vector.load %arg6[%c6_412, %c0_413, %c0_414] : memref<9x32x4xf32, #tpu.memory_space<vmem>>, vector<1x32x4xf32>
    %466 = vector.shape_cast %465 : vector<1x32x4xf32> to vector<32x4xf32>
    %cst_415 = arith.constant dense<0.000000e+00> : vector<32x1024xf32>
    %467 = tpu.matmul %466, %464, %cst_415 {dimension_numbers = #tpu.dot_dimension_numbers<[1], [0], [0], [1], [0, 0, 1, 1], [], []>} : vector<32x4xf32>, vector<4x1024xf32>, vector<32x1024xf32> -> vector<32x1024xf32>
    %468 = arith.addf %463, %467 : vector<32x1024xf32>
    %c0_416 = arith.constant 0 : index
    %c0_417 = arith.constant 0 : index
    %469 = vector.load %arg8[%c0_416, %c0_417] : memref<3x1024xf32, #tpu.memory_space<vmem>>, vector<1x1024xf32>
    %470 = vector.broadcast %469 : vector<1x1024xf32> to vector<32x1024xf32>
    %471 = arith.mulf %468, %470 : vector<32x1024xf32>
    %c0_418 = arith.constant 0 : index
    %c1_419 = arith.constant 1 : index
    %472 = vector.load %arg14[%c0_418, %c1_419] : memref<4x1090xf32, #tpu.memory_space<vmem>>, vector<4x1024xf32>
    %c1_420 = arith.constant 1 : index
    %c0_421 = arith.constant 0 : index
    %c0_422 = arith.constant 0 : index
    %473 = vector.load %arg6[%c1_420, %c0_421, %c0_422] : memref<9x32x4xf32, #tpu.memory_space<vmem>>, vector<1x32x4xf32>
    %474 = vector.shape_cast %473 : vector<1x32x4xf32> to vector<32x4xf32>
    %cst_423 = arith.constant dense<0.000000e+00> : vector<32x1024xf32>
    %475 = tpu.matmul %474, %472, %cst_423 {dimension_numbers = #tpu.dot_dimension_numbers<[1], [0], [0], [1], [0, 0, 1, 1], [], []>} : vector<32x4xf32>, vector<4x1024xf32>, vector<32x1024xf32> -> vector<32x1024xf32>
    %c0_424 = arith.constant 0 : index
    %c33_425 = arith.constant 33 : index
    %476 = vector.load %arg14[%c0_424, %c33_425] : memref<4x1090xf32, #tpu.memory_space<vmem>>, vector<4x1024xf32>
    %c4_426 = arith.constant 4 : index
    %c0_427 = arith.constant 0 : index
    %c0_428 = arith.constant 0 : index
    %477 = vector.load %arg6[%c4_426, %c0_427, %c0_428] : memref<9x32x4xf32, #tpu.memory_space<vmem>>, vector<1x32x4xf32>
    %478 = vector.shape_cast %477 : vector<1x32x4xf32> to vector<32x4xf32>
    %cst_429 = arith.constant dense<0.000000e+00> : vector<32x1024xf32>
    %479 = tpu.matmul %478, %476, %cst_429 {dimension_numbers = #tpu.dot_dimension_numbers<[1], [0], [0], [1], [0, 0, 1, 1], [], []>} : vector<32x4xf32>, vector<4x1024xf32>, vector<32x1024xf32> -> vector<32x1024xf32>
    %480 = arith.addf %475, %479 : vector<32x1024xf32>
    %c0_430 = arith.constant 0 : index
    %c65_431 = arith.constant 65 : index
    %481 = vector.load %arg14[%c0_430, %c65_431] : memref<4x1090xf32, #tpu.memory_space<vmem>>, vector<4x1024xf32>
    %c7_432 = arith.constant 7 : index
    %c0_433 = arith.constant 0 : index
    %c0_434 = arith.constant 0 : index
    %482 = vector.load %arg6[%c7_432, %c0_433, %c0_434] : memref<9x32x4xf32, #tpu.memory_space<vmem>>, vector<1x32x4xf32>
    %483 = vector.shape_cast %482 : vector<1x32x4xf32> to vector<32x4xf32>
    %cst_435 = arith.constant dense<0.000000e+00> : vector<32x1024xf32>
    %484 = tpu.matmul %483, %481, %cst_435 {dimension_numbers = #tpu.dot_dimension_numbers<[1], [0], [0], [1], [0, 0, 1, 1], [], []>} : vector<32x4xf32>, vector<4x1024xf32>, vector<32x1024xf32> -> vector<32x1024xf32>
    %485 = arith.addf %480, %484 : vector<32x1024xf32>
    %486 = arith.addf %471, %485 : vector<32x1024xf32>
    %c0_436 = arith.constant 0 : index
    %c2_437 = arith.constant 2 : index
    %487 = vector.load %arg14[%c0_436, %c2_437] : memref<4x1090xf32, #tpu.memory_space<vmem>>, vector<4x1024xf32>
    %c2_438 = arith.constant 2 : index
    %c0_439 = arith.constant 0 : index
    %c0_440 = arith.constant 0 : index
    %488 = vector.load %arg6[%c2_438, %c0_439, %c0_440] : memref<9x32x4xf32, #tpu.memory_space<vmem>>, vector<1x32x4xf32>
    %489 = vector.shape_cast %488 : vector<1x32x4xf32> to vector<32x4xf32>
    %cst_441 = arith.constant dense<0.000000e+00> : vector<32x1024xf32>
    %490 = tpu.matmul %489, %487, %cst_441 {dimension_numbers = #tpu.dot_dimension_numbers<[1], [0], [0], [1], [0, 0, 1, 1], [], []>} : vector<32x4xf32>, vector<4x1024xf32>, vector<32x1024xf32> -> vector<32x1024xf32>
    %c0_442 = arith.constant 0 : index
    %c34_443 = arith.constant 34 : index
    %491 = vector.load %arg14[%c0_442, %c34_443] : memref<4x1090xf32, #tpu.memory_space<vmem>>, vector<4x1024xf32>
    %c5_444 = arith.constant 5 : index
    %c0_445 = arith.constant 0 : index
    %c0_446 = arith.constant 0 : index
    %492 = vector.load %arg6[%c5_444, %c0_445, %c0_446] : memref<9x32x4xf32, #tpu.memory_space<vmem>>, vector<1x32x4xf32>
    %493 = vector.shape_cast %492 : vector<1x32x4xf32> to vector<32x4xf32>
    %cst_447 = arith.constant dense<0.000000e+00> : vector<32x1024xf32>
    %494 = tpu.matmul %493, %491, %cst_447 {dimension_numbers = #tpu.dot_dimension_numbers<[1], [0], [0], [1], [0, 0, 1, 1], [], []>} : vector<32x4xf32>, vector<4x1024xf32>, vector<32x1024xf32> -> vector<32x1024xf32>
    %495 = arith.addf %490, %494 : vector<32x1024xf32>
    %c0_448 = arith.constant 0 : index
    %c66 = arith.constant 66 : index
    %496 = vector.load %arg14[%c0_448, %c66] : memref<4x1090xf32, #tpu.memory_space<vmem>>, vector<4x1024xf32>
    %c8_449 = arith.constant 8 : index
    %c0_450 = arith.constant 0 : index
    %c0_451 = arith.constant 0 : index
    %497 = vector.load %arg6[%c8_449, %c0_450, %c0_451] : memref<9x32x4xf32, #tpu.memory_space<vmem>>, vector<1x32x4xf32>
    %498 = vector.shape_cast %497 : vector<1x32x4xf32> to vector<32x4xf32>
    %cst_452 = arith.constant dense<0.000000e+00> : vector<32x1024xf32>
    %499 = tpu.matmul %498, %496, %cst_452 {dimension_numbers = #tpu.dot_dimension_numbers<[1], [0], [0], [1], [0, 0, 1, 1], [], []>} : vector<32x4xf32>, vector<4x1024xf32>, vector<32x1024xf32> -> vector<32x1024xf32>
    %500 = arith.addf %495, %499 : vector<32x1024xf32>
    %c2_453 = arith.constant 2 : index
    %c0_454 = arith.constant 0 : index
    %501 = vector.load %arg8[%c2_453, %c0_454] : memref<3x1024xf32, #tpu.memory_space<vmem>>, vector<1x1024xf32>
    %502 = vector.broadcast %501 : vector<1x1024xf32> to vector<32x1024xf32>
    %503 = arith.mulf %500, %502 : vector<32x1024xf32>
    %504 = arith.addf %486, %503 : vector<32x1024xf32>
    %c0_455 = arith.constant 0 : index
    %c0_456 = arith.constant 0 : index
    %505 = vector.load %arg7[%c0_455, %c0_456] : memref<32x1xf32, #tpu.memory_space<vmem>>, vector<32x1xf32>
    %506 = vector.broadcast %505 : vector<32x1xf32> to vector<32x1024xf32>
    %507 = arith.addf %504, %506 : vector<32x1024xf32>
    %cst_457 = arith.constant 0.000000e+00 : f32
    %508 = vector.broadcast %cst_457 : f32 to vector<32x1024xf32>
    %509 = arith.maximumf %507, %508 : vector<32x1024xf32>
    %c0_458 = arith.constant 0 : index
    %c0_459 = arith.constant 0 : index
    %510 = vector.load %arg9[%c0_458, %c0_459] : memref<1x32xf32, #tpu.memory_space<vmem>>, vector<1x32xf32>
    %cst_460 = arith.constant dense<0.000000e+00> : vector<1x1024xf32>
    %511 = tpu.matmul %510, %509, %cst_460 {dimension_numbers = #tpu.dot_dimension_numbers<[1], [0], [0], [1], [0, 0, 1, 1], [], []>} : vector<1x32xf32>, vector<32x1024xf32>, vector<1x1024xf32> -> vector<1x1024xf32>
    %c0_461 = arith.constant 0 : index
    %512 = memref.load %arg10[%c0_461] : memref<1xf32, #tpu.memory_space<smem>>
    %513 = vector.broadcast %512 : f32 to vector<1x1024xf32>
    %514 = arith.addf %511, %513 : vector<1x1024xf32>
    %515 = arith.negf %514 : vector<1x1024xf32>
    %516 = math.exp %515 : vector<1x1024xf32>
    %cst_462 = arith.constant 1.000000e+00 : f32
    %517 = vector.broadcast %cst_462 : f32 to vector<1x1024xf32>
    %518 = arith.addf %517, %516 : vector<1x1024xf32>
    %519 = arith.divf %517, %518 : vector<1x1024xf32>
    %520 = vector.shape_cast %519 : vector<1x1024xf32> to vector<1x1x1024xf32>
    %c0_463 = arith.constant 0 : index
    %c0_464 = arith.constant 0 : index
    %c0_465 = arith.constant 0 : index
    %521 = vector.load %arg11[%c0_463, %c0_464, %c0_465] : memref<1x1x1024xf32, #tpu.memory_space<vmem>>, vector<1x1x1024xf32>
    tpu.vector_store %arg11[%c0_463, %c0_464, %c0_465], %520 {strides = array<i32>} : memref<1x1x1024xf32, #tpu.memory_space<vmem>>, vector<1x1x1024xf32>,
    return
  }
  func.func @transform_0(%arg0: i32) -> (i32, i32, i32) {
    %c0_i32 = arith.constant 0 : i32
    %c0_i32_0 = arith.constant 0 : i32
    %c0_i32_1 = arith.constant 0 : i32
    return %arg0, %c0_i32, %c0_i32_0 : i32, i32, i32
  }
  func.func @transform_1(%arg0: i32) -> (i32, i32, i32) {
    %c0_i32 = arith.constant 0 : i32
    %c0_i32_0 = arith.constant 0 : i32
    %c0_i32_1 = arith.constant 0 : i32
    %c0_i32_2 = arith.constant 0 : i32
    return %c0_i32, %c0_i32_0, %c0_i32_1 : i32, i32, i32
  }
  func.func @transform_2(%arg0: i32) -> (i32, i32) {
    %c0_i32 = arith.constant 0 : i32
    %c0_i32_0 = arith.constant 0 : i32
    %c0_i32_1 = arith.constant 0 : i32
    return %c0_i32, %c0_i32_0 : i32, i32
  }
  func.func @transform_3(%arg0: i32) -> (i32, i32) {
    %c0_i32 = arith.constant 0 : i32
    %c0_i32_0 = arith.constant 0 : i32
    %c0_i32_1 = arith.constant 0 : i32
    return %c0_i32, %c0_i32_0 : i32, i32
  }
  func.func @transform_4(%arg0: i32) -> (i32, i32) {
    %c0_i32 = arith.constant 0 : i32
    %c0_i32_0 = arith.constant 0 : i32
    %c0_i32_1 = arith.constant 0 : i32
    return %c0_i32, %c0_i32_0 : i32, i32
  }
  func.func @transform_5(%arg0: i32) -> (i32, i32, i32) {
    %c0_i32 = arith.constant 0 : i32
    %c0_i32_0 = arith.constant 0 : i32
    %c0_i32_1 = arith.constant 0 : i32
    %c0_i32_2 = arith.constant 0 : i32
    return %c0_i32, %c0_i32_0, %c0_i32_1 : i32, i32, i32
  }
  func.func @transform_6(%arg0: i32) -> (i32, i32) {
    %c0_i32 = arith.constant 0 : i32
    %c0_i32_0 = arith.constant 0 : i32
    %c0_i32_1 = arith.constant 0 : i32
    return %c0_i32, %c0_i32_0 : i32, i32
  }
  func.func @transform_7(%arg0: i32) -> (i32, i32) {
    %c0_i32 = arith.constant 0 : i32
    %c0_i32_0 = arith.constant 0 : i32
    %c0_i32_1 = arith.constant 0 : i32
    return %c0_i32, %c0_i32_0 : i32, i32
  }
  func.func @transform_8(%arg0: i32) -> (i32, i32) {
    %c0_i32 = arith.constant 0 : i32
    %c0_i32_0 = arith.constant 0 : i32
    %c0_i32_1 = arith.constant 0 : i32
    return %c0_i32, %c0_i32_0 : i32, i32
  }
  func.func @transform_9(%arg0: i32) -> i32 {
    %c0_i32 = arith.constant 0 : i32
    %c0_i32_0 = arith.constant 0 : i32
    return %c0_i32 : i32
  }
  func.func @transform_10(%arg0: i32) -> (i32, i32, i32) {
    %c0_i32 = arith.constant 0 : i32
    %c0_i32_0 = arith.constant 0 : i32
    %c0_i32_1 = arith.constant 0 : i32
    return %arg0, %c0_i32, %c0_i32_0 : i32, i32, i32
  }
}

</mosaic_0001>

<bundles_post_ra>
// kernel: tpu_custom_call.1
= control target key start
LH: loop header
LB: loop body
LE: loop exit
PB: predicated region body
PF: predicated region fallthrough
CT: control target
= control target key end

     0   :  { %s8604_s0 = inlined_call_operand.vmem [shape: f32[2,8,256], index: 0, kind: input, shape index: {}]   ;;  %s8605_s1 = inlined_call_operand.vmem [shape: f32[9,4,8], index: 1, kind: input, shape index: {}]   ;;  %s8606_s2 = inlined_call_operand.vmem [shape: f32[4,1], index: 2, kind: input, shape index: {}]   ;;  %s8607_s3 = inlined_call_operand.vmem [shape: f32[16,32], index: 3, kind: input, shape index: {}]   ;;  %s8608_s4 = inlined_call_operand.vmem [shape: f32[3,256], index: 4, kind: input, shape index: {}]   ;;  %s8609_s5 = inlined_call_operand.vmem [shape: f32[9,32,4], index: 5, kind: input, shape index: {}]   ;;  %s8610_s6 = inlined_call_operand.vmem [shape: f32[32,1], index: 6, kind: input, shape index: {}]   ;;  %s8611_s7 = inlined_call_operand.vmem [shape: f32[3,1024], index: 7, kind: input, shape index: {}]   ;;  %s8612_s8 = inlined_call_operand.vmem [shape: f32[1,32], index: 8, kind: input, shape index: {}]   ;;  %s8613_s9 = inlined_call_operand.<no memory space> [shape: f32[1], index: 9, kind: input, shape index: {}]   ;;  %s8614_s10 = inlined_call_operand.hbm [shape: f32[2,1,1024], index: 10, kind: output, shape index: {}]  }
   0x1   :  { %15 = sst [smem:[#allocation5]] %s8613_s9 }
   0x2   :  { %16 = vsyncpa [#allocation7], 0 }
   0x3   :  { %18 = vsyncpa [#allocation7 + $0x1], 0  ;;  %s5994_s15 = smov 0   ;;  %s5996_s16 = smov 0  }
   0x4   :  { %s5998_s17 = smov 0   ;;  %s6000_s18 = smov 0  }
   0x5 LB: > { %s6015_s9 = sadd.s32 4294967295, %s5912_s18   ;;  %s5250_s19 = sadd.s32 4294967294, %s5912_s18   ;;  %s5912_s18 = sphi %s6000_s18, %s8828_s18   ;;  %s5908_s17 = sphi %s5998_s17, %s8827_s17   ;;  %s5904_s16 = sphi %s5996_s16, %s8826_s16   ;;  %s5900_s15 = sphi %s5994_s15, %s8825_s15  }
   0x6   : > { %s6019_s20 = sadd.s32 1, %s5912_s18   ;;  %s246_s21 = sadd.s32 1, %s5908_s17 }
   0x7   : > { %s243_s22 = ssub.s32 %s5912_s18, %s6019_s20  ;;  %p256_p0 = scmp.ne.s32.totalorder %s5908_s17, %s5904_s16 }
   0x8   : > { %p244_p1 = scmp.eq.s32.totalorder %s243_s22, 0  ;;  %p257_p2 = scmp.eq.s32.totalorder %s6015_s9, 1 }
   0x9   : > { %p262_p3 = scmp.ne.s32.totalorder %s5904_s16, %s5900_s15  ;;  %p263_p4 = scmp.eq.s32.totalorder %s5250_s19, 1 }
   0xa   : > { %s6030_s23 = scalar_select %p244_p1, %s5908_s17, %s246_s21  }
   0xb   : > { %p6032_p5 = por %p257_p2, %p256_p0  ;;  %p6036_p6 = por %p263_p4, %p262_p3 }
   0xc   : > { %p5253_p7 = scmp.ge.s32.totalorder %s5912_s18, 1  ;;  %p316_p8 = scmp.lt.s32.totalorder %s5912_s18, 3 }
   0xe   : > { %p317_p9 = pnand %p5253_p7, %p316_p8 }
  0x10   : > { %320 = sbr.rel (%p317_p9) target bundleno = 1879 (0x757), region = 60 }
  0x15   : > { %p354_p10 = scmp.lt.s32.totalorder %s6015_s9, 1  ;;  %vm359_vm0 = vcmask 138240   ;;  %v5914_v0 = vmov 0.0   ;;  %s5915_s11 = smov 17   ;;  %vm361_vm1 = vcmask 277640   ;;  %vm375_vm2 = vcmask 1047688  }
  0x16   : > { %360 = vst.msk [vmem:[#allocation2] sm:$0xff] %vm359_vm0, %v5914_v0  ;;  %s5916_s12 = smov 95   ;;  %s5917_s13 = smov 111   ;;  %v381_v9 = vld [vmem:[%s8605_s1] sm:$0xf]  ;;  %vm399_vm3 = vcmask 64512  }
  0x17   : > { %s355_s26 = scalar_select %p354_p10, %s6015_s9, 1  ;;  %362 = vst.msk [vmem:[#allocation2 + $0x10] sm:$0xff] %vm361_vm1, %v5914_v0  ;;  %vm562_vm4 = vcmask 908288   ;;  %v5266_v13 = vld [vmem:[%s8605_s1 + $0x10] sm:$0xf]  ;;  %vm672_vm5 = vcmask 777216  }
  0x18   : > { %s5918_s14 = smov 112   ;;  %s5919_s19 = smov 126   ;;  %vm394_vm6 = vcmask 916480   ;;  %v5271_v25 = vld [vmem:[%s8605_s1 + $0x1c] sm:$0xf]  ;;  %vm788_vm7 = vcmask 1031168  }
  0x19   : > { %s5713_s27 = sshll.u32 %s355_s26, 4  ;;  %s5920_s21 = smov 127   ;;  %v5257_v27 = vld [vmem:[%s8605_s1 + $0xc] sm:$0xf]  ;;  %vm494_vm8 = vcmask 785408   ;;  %vm616_vm9 = vcmask 1039360  }
  0x1a   : > { %s358_s30 = scalar_lea.vmem %s8604_s0, %s5713_s27  ;;  %s5921_s22 = smov 96   ;;  %v5274_v39 = vld [vmem:[%s8605_s1 + $0x8] sm:$0xf]  ;;  %v5262_v43 = vld [vmem:[%s8605_s1 + $0x18] sm:$0xf]  ;;  %vm734_vm10 = vcmask 900096  }
  0x1b   : > { %v363_v1 = vld [vmem:[%s358_s30] sm:$0xff]  ;;  %v364_v2 = vld [vmem:[%s358_s30 + $0x8] sm:$0xff]  ;;  %s5922_s26 = smov 94   ;;  %s5923_s27 = smov 110   ;;  %vm844_vm11 = vcmask 769024   ;;  %v5924_v55 = vmov 0  }
  0x1c   : > { %367 = vrot.lane.b32.xlu0 %v363_v1, %s5915_s11  ;;  %v5265_v52 = vld [vmem:[%s8605_s1 + $0x4] sm:$0xf]  ;;  %v905_v54 = vld [vmem:[%s8606_s2] sm:$0xf]  ;;  %5816 = vset.pattern.permute.xlu1 %v5924_v55  ;;  %v5275_v58 = vld [vmem:[%s8605_s1 + $0x14] sm:$0xf] }
  0x1d   : > { %5815 = vset.pattern.permute.xlu0 %v5924_v55  ;;  %5817 = vset.pattern.permute.xlu2 %v5924_v55  ;;  %v5280_v62 = vld [vmem:[%s8605_s1 + $0x20] sm:$0xf]  ;;  %vm915_vm12 = vcmask 130048   ;;  %s5927_s28 = smov 48   ;;  %s5928_s29 = smov 16   ;;  %vm939_vm13 = vcmask 257024  }
  0x1e   : > { %s5929_s30 = smov 32   ;;  %vm1330_vm14 = vcmask 265216   ;;  %vm1339_vm15 = vcmask 527624   ;;  %vm1364_vm1 = vcmask 1044232  }
  0x1f   : > { %1331 = vst.msk [vmem:[#allocation4] sm:$0xf] %vm1330_vm14, %v5914_v0 }
  0x24   : > { %369 = vrot.lane.b32.xlu0 %v364_v2, %s5915_s11  ;;  %s5931_s11 = smov 97  }
  0x8e   : > { %v368_v3 = vpop.permute.xlu0 %367 }
  0x8f   : > { %376 = vst.msk [vmem:[#allocation2] sm:$0xff] %vm375_vm2, %v368_v3  ;;  %vm1365_vm2 = vcmask 7172  }
  0x96   : > { %v370_v4 = vpop.permute.xlu0 %369  ;;  %v379_v5 = vld [vmem:[#allocation2] sm:$0xff] }
  0x97   : > { %v371_v6 = vsel %vm359_vm0, %v368_v3, %v370_v4  ;;  %378 = vst.msk [vmem:[#allocation2 + $0x10] sm:$0xff] %vm359_vm0, %v370_v4  ;;  %461 = vmatpush.msra.mxu2 %v379_v5  ;;  %vm1350_vm0 = vcmask 790024  }
  0x98   : > { %481 = vmatpush.msra.mxu3 %v371_v6  ;;  %v5795_v7 = vpack.i.bf16 %v371_v6, %v379_v5  ;;  %5260 = vmatmul.msk.f32.vlgmr.msra.gmra.mxu2 %vm399_vm3, %v381_v9 }
  0x99   : > { %5261 = vmatmul.msk.f32.vlgmr.msra.gmra.mxu3 %vm399_vm3, %v381_v9 }
  0x9a   : > { %5796 = vrot.lane.b32.xlu0 %v5795_v7, %s5916_s12  ;;  %5786 = vrot.lane.b32.xlu2 %v5795_v7, %s5917_s13 }
  0x9b   : > { %5776 = vrot.lane.b32.xlu1 %v5795_v7, %s5918_s14 }
  0x9e   : > { %v382_v8 = vld [vmem:[#allocation2 + $0x10] sm:$0xff] }
  0xa2   : > { %5806 = vrot.lane.b32.xlu0 %v5795_v7, %s5919_s19  ;;  %5791 = vrot.lane.b32.xlu2 %v5795_v7, %s5920_s21 }
  0xa3   : > { %5781 = vrot.lane.b32.xlu1 %v5795_v7, %s5921_s22 }
  0xaa   : > { %5811 = vrot.lane.b32.xlu0 %v5795_v7, %s5922_s26  ;;  %5801 = vrot.lane.b32.xlu2 %v5795_v7, %s5923_s27  ;;  %v6145_v7 = vld [vmem:[%s8607_s3 + $0x8] sm:$0xff] }
  0xab   : > { %392 = vrot.lane.b32.xlu1 %v382_v8, %s5918_s14 }
  0xb2   : > { %732 = vrot.lane.b32.xlu0 %v382_v8, %s5923_s27  ;;  %560 = vrot.lane.b32.xlu2 %v382_v8, %s5917_s13  ;;  %s5925_s13 = smov 80   ;;  %s5926_s27 = smov 64  }
  0xb3   : > { %492 = vrot.lane.b32.xlu1 %v382_v8, %s5921_s22 }
  0xba   : > { %670 = vrot.lane.b32.xlu2 %v382_v8, %s5916_s12  ;;  %908 = vperm.xlu0 %5815, %v905_v54  }
  0xbb   : > { %614 = vrot.lane.b32.xlu1 %v382_v8, %s5920_s21 }
  0xc2   : > { %842 = vrot.lane.b32.xlu2 %v382_v8, %s5922_s26 }
  0xc3   : > { %786 = vrot.lane.b32.xlu1 %v382_v8, %s5919_s19  ;;  %v6151_v8 = vld [vmem:[%s8607_s3] sm:$0xff] }
  0xf4   : > { %v5787_v10 = vpop.permute.xlu2 %5786 }
  0xf5   : > { %v5789_v11 = vunpack.i.h.bf16 %v5787_v10  ;;  %v5788_v12 = vunpack.i.l.bf16 %v5787_v10 }
  0xf7   : > { %v563_v14 = vsel %vm562_vm4, %v5788_v12, %v5789_v11 }
  0xf8   : > { %585 = vmatpush.msrb.mxu2 %v563_v14 }
  0xf9   : > { %5267 = vmatmul.msk.f32.vlgmr.msrb.gmra.mxu2 %vm399_vm3, %v5266_v13 }
  0xfc   : > { %v6073_v15 = vpop.permute.xlu2 %5791 }
  0xfd   : > { %v5794_v35 = vunpack.i.h.bf16 %v6073_v15  ;;  %v5793_v36 = vunpack.i.l.bf16 %v6073_v15 }
  0xff   : > { %v617_v45 = vsel %vm616_vm9, %v5793_v36, %v5794_v35 }
 0x104   : > { %v6075_v16 = vpop.permute.xlu2 %5801 }
 0x105   : > { %v5804_v40 = vunpack.i.h.bf16 %v6075_v16  ;;  %v5803_v41 = vunpack.i.l.bf16 %v6075_v16 }
 0x107   : > { %v735_v46 = vsel %vm734_vm10, %v5803_v41, %v5804_v40 }
 0x10c   : > { %v5797_v17 = vpop.permute.xlu0 %5796  ;;  %v561_v18 = vpop.permute.xlu2 %560 }
 0x10d   : > { %v5799_v19 = vunpack.i.h.bf16 %v5797_v17  ;;  %v5798_v20 = vunpack.i.l.bf16 %v5797_v17  ;;  %v5777_v21 = vpop.permute.xlu1 %5776  ;;  %v564_v22 = vsel %vm562_vm4, %v5789_v11, %v561_v18  ;;  %v544_v18 = vld [vmem:[%s8608_s4] ss:$4 sm:$0x3]  ;;  %vm1361_vm4 = vcmask 793600  }
 0x10e   : > { %v5779_v23 = vunpack.i.h.bf16 %v5777_v21  ;;  %v5778_v24 = vunpack.i.l.bf16 %v5777_v21  ;;  %605 = vmatpush.msrb.mxu3 %v564_v22  ;;  %v5283_v22 = vld [vmem:[%s8608_s4 + $0x2] ss:$4 sm:$0x3] }
 0x10f   : > { %v673_v26 = vsel %vm672_vm5, %v5798_v20, %v5799_v19  ;;  %5268 = vmatmul.msk.f32.vlgmr.msrb.gmra.mxu3 %vm399_vm3, %v5266_v13 }
 0x110   : > { %v395_v28 = vsel %vm394_vm6, %v5778_v24, %v5779_v23  ;;  %695 = vmatpush.msra.mxu2 %v673_v26  ;;  %v546_v24 = vperm.slane %v544_v18, 0 }
 0x111   : > { %418 = vmatpush.msra.mxu0 %v395_v28  ;;  %5272 = vmatmul.msk.f32.vlgmr.msra.gmra.mxu2 %vm399_vm3, %v5271_v25  ;;  %v897_v28 = vperm.slane %v5283_v22, 0 }
 0x112   : > { %5258 = vmatmul.msk.f32.vlgmr.msra.gmra.mxu0 %vm399_vm3, %v5257_v27 }
 0x114   : > { %v6088_v29 = vpop.permute.xlu0 %5806  ;;  %v671_v30 = vpop.permute.xlu2 %670 }
 0x115   : > { %v5809_v31 = vunpack.i.h.bf16 %v6088_v29  ;;  %v5808_v32 = vunpack.i.l.bf16 %v6088_v29  ;;  %v674_v33 = vsel %vm672_vm5, %v5799_v19, %v671_v30  ;;  %v5782_v34 = vpop.permute.xlu1 %5781 }
 0x116   : > { %v5784_v37 = vunpack.i.h.bf16 %v5782_v34  ;;  %v5783_v38 = vunpack.i.l.bf16 %v5782_v34  ;;  %715 = vmatpush.msra.mxu3 %v674_v33 }
 0x117   : > { %v789_v42 = vsel %vm788_vm7, %v5808_v32, %v5809_v31  ;;  %5273 = vmatmul.msk.f32.vlgmr.msra.gmra.mxu3 %vm399_vm3, %v5271_v25 }
 0x118   : > { %v495_v44 = vsel %vm494_vm8, %v5783_v38, %v5784_v37  ;;  %811 = vmatpush.msrb.mxu2 %v789_v42  ;;  %v547_v38 = vperm.slane %v544_v18, 1 }
 0x119   : > { %517 = vmatpush.msrb.mxu0 %v495_v44  ;;  %5278 = vmatmul.msk.f32.vlgmr.msrb.gmra.mxu2 %vm399_vm3, %v5274_v39 }
 0x11a   : > { %5263 = vmatmul.msk.f32.vlgmr.msrb.gmra.mxu0 %vm399_vm3, %v5262_v43  ;;  %933 = vmatpush.msra.mxu2 %v6145_v7 }
 0x11b   : > { %639 = vmatpush.msra.mxu0 %v617_v45  ;;  %v463_v5 = vpop.f32.mrf.mxu2 }
 0x11c   : > { %v5812_v47 = vpop.permute.xlu0 %5811  ;;  %v843_v63 = vpop.permute.xlu2 %842  ;;  %934 = vmatpush.msra.mxu2 %v6151_v8 }
 0x11d   : > { %757 = vmatpush.msrb.mxu0 %v735_v46  ;;  %v5814_v48 = vunpack.i.h.bf16 %v5812_v47  ;;  %v5813_v49 = vunpack.i.l.bf16 %v5812_v47  ;;  %v393_v50 = vpop.permute.xlu1 %392  ;;  %v483_v12 = vpop.f32.mrf.mxu3  ;;  %v898_v47 = vperm.slane %v5283_v22, 1 }
 0x11e   : > { %v396_v51 = vsel %vm394_vm6, %v5779_v23, %v393_v50  ;;  %1037 = vmatpush.msrb.mxu2 %v6145_v7  ;;  %vm1377_vm6 = vcmask 265224  }
 0x11f   : > { %438 = vmatpush.msra.mxu1 %v396_v51  ;;  %v845_v53 = vsel %vm844_vm11, %v5813_v49, %v5814_v48  ;;  %v846_v2 = vsel %vm844_vm11, %v5814_v48, %v843_v63 }
 0x120   : > { %5259 = vmatmul.msk.f32.vlgmr.msra.gmra.mxu1 %vm399_vm3, %v5257_v27  ;;  %1038 = vmatpush.msrb.mxu2 %v6151_v8 }
 0x122   : > { %5269 = vmatmul.msk.f32.vlgmr.msra.gmra.mxu0 %vm399_vm3, %v5265_v52 }
 0x123   : > { %867 = vmatpush.msra.mxu0 %v845_v53 }
 0x124   : > { %v733_v59 = vpop.permute.xlu0 %732 }
 0x125   : > { %v493_v56 = vpop.permute.xlu1 %492  ;;  %v736_v1 = vsel %vm734_vm10, %v5804_v40, %v733_v59  ;;  %vm1332_vm10 = vcmask 535816  }
 0x126   : > { %v496_v57 = vsel %vm494_vm8, %v5784_v37, %v493_v56  ;;  %1333 = vst.msk [vmem:[#allocation4 + $0x20] sm:$0xf] %vm1332_vm10, %v5914_v0 }
 0x127   : > { %537 = vmatpush.msrb.mxu1 %v496_v57 }
 0x128   : > { %5264 = vmatmul.msk.f32.vlgmr.msrb.gmra.mxu1 %vm399_vm3, %v5262_v43 }
 0x12a   : > { %5276 = vmatmul.msk.f32.vlgmr.msrb.gmra.mxu0 %vm399_vm3, %v5275_v58 }
 0x12b   : > { %985 = vmatpush.msrb.mxu0 %v6145_v7 }
 0x12c   : > { %v909_v36 = vpop.permute.xlu0 %908 }
 0x12d   : > { %v615_v60 = vpop.permute.xlu1 %614  ;;  %986 = vmatpush.msrb.mxu0 %v6151_v8 }
 0x12e   : > { %v618_v61 = vsel %vm616_vm9, %v5794_v35, %v615_v60 }
 0x12f   : > { %659 = vmatpush.msra.mxu1 %v618_v61 }
 0x130   : > { %5270 = vmatmul.msk.f32.vlgmr.msra.gmra.mxu1 %vm399_vm3, %v5265_v52 }
 0x131   : > { %777 = vmatpush.msrb.mxu1 %v736_v1 }
 0x132   : > { %5281 = vmatmul.msk.f32.vlgmr.msra.gmra.mxu0 %vm399_vm3, %v5280_v62 }
 0x133   : > { %887 = vmatpush.msra.mxu1 %v846_v2  ;;  %1089 = vmatpush.msra.mxu0 %v6145_v7 }
 0x135   : > { %v787_v3 = vpop.permute.xlu1 %786  ;;  %1090 = vmatpush.msra.mxu0 %v6151_v8 }
 0x136   : > { %v790_v4 = vsel %vm788_vm7, %v5809_v31, %v787_v3 }
 0x137   : > { %831 = vmatpush.msrb.mxu3 %v790_v4 }
 0x138   : > { %5277 = vmatmul.msk.f32.vlgmr.msrb.gmra.mxu1 %vm399_vm3, %v5275_v58  ;;  %5279 = vmatmul.msk.f32.vlgmr.msrb.gmra.mxu3 %vm399_vm3, %v5274_v39 }
 0x139   : > { %959 = vmatpush.msra.mxu3 %v6145_v7  ;;  %1011 = vmatpush.msrb.mxu1 %v6145_v7 }
 0x13b   : > { %1012 = vmatpush.msrb.mxu1 %v6151_v8  ;;  %960 = vmatpush.msra.mxu3 %v6151_v8 }
 0x13d   : > { %1063 = vmatpush.msrb.mxu3 %v6145_v7 }
 0x13f   : > { %1064 = vmatpush.msrb.mxu3 %v6151_v8 }
 0x140   : > { %5282 = vmatmul.msk.f32.vlgmr.msra.gmra.mxu1 %vm399_vm3, %v5280_v62  ;;  %vm6263_vm3 = vmor %vm1365_vm2, %vm1364_vm1 }
 0x141   : > { %1115 = vmatpush.msra.mxu1 %v6145_v7 }
 0x143   : > { %1116 = vmatpush.msra.mxu1 %v6151_v8 }
 0x17c   : > { %v587_v10 = vpop.f32.mrf.mxu2 }
 0x18f   : > { %v420_v6 = vpop.f32.mrf.mxu0 }
 0x190   : > { %v464_v19 = vadd.f32 %v463_v5, %v420_v6 }
 0x192   : > { %v607_v17 = vpop.f32.mrf.mxu3 }
 0x194   : > { %v697_v14 = vpop.f32.mrf.mxu2 }
 0x197   : > { %v519_v9 = vpop.f32.mrf.mxu0 }
 0x198   : > { %v542_v23 = vadd.f32 %v519_v9, %v464_v19 }
 0x19a   : > { %v550_v30 = vmul.f32 %v546_v24, %v542_v23  ;;  %v717_v32 = vpop.f32.mrf.mxu3 }
 0x19c   : > { %v813_v21 = vpop.f32.mrf.mxu2 }
 0x19d   : > { %v440_v11 = vpop.f32.mrf.mxu1 }
 0x19e   : > { %v484_v34 = vadd.f32 %v483_v12, %v440_v11 }
 0x19f   : > { %v641_v13 = vpop.f32.mrf.mxu0 }
 0x1a0   : > { %v642_v20 = vadd.f32 %v641_v13, %v587_v10 }
 0x1a2   : > { %v720_v26 = vadd.f32 %v697_v14, %v642_v20 }
 0x1a4   : > { %v722_v33 = vadd.f32 %v720_v26, %v550_v30 }
 0x1a5   : > { %v539_v15 = vpop.f32.mrf.mxu1 }
 0x1a6   : > { %v543_v40 = vadd.f32 %v539_v15, %v484_v34 }
 0x1a7   : > { %v759_v16 = vpop.f32.mrf.mxu0 }
 0x1a8   : > { %v814_v27 = vadd.f32 %v813_v21, %v759_v16  ;;  %v551_v43 = vmul.f32 %v547_v38, %v543_v40 }
 0x1ad   : > { %v661_v25 = vpop.f32.mrf.mxu1 }
 0x1ae   : > { %v662_v41 = vadd.f32 %v661_v25, %v607_v17 }
 0x1af   : > { %v869_v29 = vpop.f32.mrf.mxu0 }
 0x1b0   : > { %v892_v31 = vadd.f32 %v869_v29, %v814_v27  ;;  %v721_v44 = vadd.f32 %v717_v32, %v662_v41 }
 0x1b2   : > { %v901_v35 = vmul.f32 %v897_v28, %v892_v31  ;;  %v723_v49 = vadd.f32 %v721_v44, %v551_v43 }
 0x1b4   : > { %v903_v37 = vadd.f32 %v901_v35, %v722_v33 }
 0x1b5   : > { %v779_v39 = vpop.f32.mrf.mxu1 }
 0x1b6   : > { %v911_v42 = vadd.f32 %v909_v36, %v903_v37 }
 0x1b8   : > { %993 = vrot.lane.b32.xlu0 %v911_v42, %s5925_s13  ;;  %1019 = vrot.lane.b32.xlu2 %v911_v42, %s5926_s27 }
 0x1b9   : > { %941 = vrot.lane.b32.xlu1 %v911_v42, %s5918_s14  ;;  %5284 = vmatmul.msk.f32.vlgmr.msra.gmra.mxu2 %vm915_vm12, %v911_v42 }
 0x1ba   : > { %1140 = vmatpush.msra.mxu2 %v6145_v7 }
 0x1bb   : > { %v833_v45 = vpop.f32.mrf.mxu3 }
 0x1bc   : > { %v834_v46 = vadd.f32 %v833_v45, %v779_v39  ;;  %1141 = vmatpush.msra.mxu2 %v6151_v8 }
 0x1bd   : > { %v889_v48 = vpop.f32.mrf.mxu1 }
 0x1be   : > { %v893_v50 = vadd.f32 %v889_v48, %v834_v46 }
 0x1c0   : > { %v902_v51 = vmul.f32 %v898_v47, %v893_v50  ;;  %967 = vrot.lane.b32.xlu2 %v911_v42, %s5921_s22 }
 0x1c1   : > { %1045 = vrot.lane.b32.xlu1 %v911_v42, %s5927_s28 }
 0x1c2   : > { %v904_v52 = vadd.f32 %v902_v51, %v723_v49 }
 0x1c4   : > { %v912_v53 = vadd.f32 %v909_v36, %v904_v52 }
 0x1c6   : > { %1148 = vrot.lane.b32.xlu0 %v912_v53, %s5918_s14  ;;  %s5930_s14 = smov 33  }
 0x1c8   : > { %1097 = vrot.lane.b32.xlu2 %v911_v42, %s5928_s29 }
 0x1c9   : > { %1071 = vrot.lane.b32.xlu1 %v911_v42, %s5929_s30 }
 0x1ce   : > { %1226 = vrot.lane.b32.xlu0 %v912_v53, %s5926_s27 }
 0x1d0   : > { %1200 = vrot.lane.b32.xlu2 %v912_v53, %s5925_s13  ;;  %s5932_s13 = smov 65  }
 0x1d1   : > { %1174 = vrot.lane.b32.xlu1 %v912_v53, %s5921_s22 }
 0x1d6   : > { %1304 = vrot.lane.b32.xlu0 %v912_v53, %s5928_s29 }
 0x1d8   : > { %1278 = vrot.lane.b32.xlu2 %v912_v53, %s5929_s30 }
 0x1d9   : > { %1252 = vrot.lane.b32.xlu1 %v912_v53, %s5927_s28  ;;  %s5933_s28 = smov 1  }
 0x212   : > { %v1020_v54 = vpop.permute.xlu2 %1019 }
 0x213   : > { %5288 = vmatmul.msk.f32.vlgmr.msrb.gmra.mxu2 %vm915_vm12, %v1020_v54 }
 0x214   : > { %1244 = vmatpush.msrb.mxu2 %v6145_v7 }
 0x216   : > { %1245 = vmatpush.msrb.mxu2 %v6151_v8 }
 0x21a   : > { %v968_v55 = vpop.permute.xlu2 %967 }
 0x21b   : > { %5286 = vmatmul.msk.f32.vlgmr.msrb.gmra.mxu0 %vm915_vm12, %v968_v55  ;;  %5292 = vmatmul.msk.f32.vlgmr.msra.gmra.mxu2 %vm915_vm12, %v912_v53 }
 0x21c   : > { %1192 = vmatpush.msrb.mxu0 %v6145_v7 }
 0x21e   : > { %1193 = vmatpush.msrb.mxu0 %v6151_v8 }
 0x222   : > { %v1098_v58 = vpop.permute.xlu2 %1097 }
 0x22a   : > { %v994_v56 = vpop.permute.xlu0 %993  ;;  %v1201_v61 = vpop.permute.xlu2 %1200 }
 0x22b   : > { %v942_v57 = vpop.permute.xlu1 %941  ;;  %5287 = vmatmul.msk.f32.vlgmr.msrb.gmra.mxu1 %vm915_vm12, %v994_v56 }
 0x22c   : > { %5285 = vmatmul.msk.f32.vlgmr.msra.gmra.mxu3 %vm915_vm12, %v942_v57  ;;  %1218 = vmatpush.msrb.mxu1 %v6145_v7 }
 0x22d   : > { %1166 = vmatpush.msra.mxu3 %v6145_v7 }
 0x22e   : > { %1219 = vmatpush.msrb.mxu1 %v6151_v8 }
 0x22f   : > { %1167 = vmatpush.msra.mxu3 %v6151_v8 }
 0x232   : > { %v1279_v5 = vpop.permute.xlu2 %1278 }
 0x233   : > { %v1046_v59 = vpop.permute.xlu1 %1045  ;;  %5291 = vmatmul.msk.f32.vlgmr.msra.gmra.mxu1 %vm915_vm12, %v1098_v58 }
 0x234   : > { %5289 = vmatmul.msk.f32.vlgmr.msrb.gmra.mxu3 %vm915_vm12, %v1046_v59  ;;  %1322 = vmatpush.msra.mxu1 %v6145_v7 }
 0x235   : > { %1270 = vmatpush.msrb.mxu3 %v6145_v7 }
 0x236   : > { %1323 = vmatpush.msra.mxu1 %v6151_v8 }
 0x237   : > { %1271 = vmatpush.msrb.mxu3 %v6151_v8 }
 0x238   : > { %v1149_v60 = vpop.permute.xlu0 %1148 }
 0x23b   : > { %v1072_v62 = vpop.permute.xlu1 %1071  ;;  %5295 = vmatmul.msk.f32.vlgmr.msrb.gmra.mxu1 %vm915_vm12, %v1201_v61 }
 0x23c   : > { %v936_v63 = vpop.f32.mrf.mxu2  ;;  %5290 = vmatmul.msk.f32.vlgmr.msra.gmra.mxu0 %vm915_vm12, %v1072_v62  ;;  %5293 = vmatmul.msk.f32.vlgmr.msra.gmra.mxu3 %vm915_vm12, %v1149_v60 }
 0x23d   : > { %940 = vst.msk [vmem:[#allocation3] sm:$0xf] %vm939_vm13, %v936_v63  ;;  %1296 = vmatpush.msra.mxu0 %v6145_v7 }
 0x23f   : > { %1297 = vmatpush.msra.mxu0 %v6151_v8 }
 0x240   : > { %v1227_v1 = vpop.permute.xlu0 %1226 }
 0x241   : > { %5296 = vmatmul.msk.f32.vlgmr.msrb.gmra.mxu2 %vm915_vm12, %v1227_v1 }
 0x243   : > { %v1175_v2 = vpop.permute.xlu1 %1174 }
 0x244   : > { %5294 = vmatmul.msk.f32.vlgmr.msrb.gmra.mxu0 %vm915_vm12, %v1175_v2  ;;  %v1334_v3 = vld [vmem:[#allocation3] sm:$0xf] }
 0x245   : > { %1336 = vrot.lane.b32.xlu2 %v1334_v3, %s5930_s14  ;;  %v1341_v24 = vld [vmem:[#allocation3] sm:$0xf] }
 0x246   : > { %v1342_v26 = vmul.f32 0.516129, %v1341_v24  ;;  %v1352_v28 = vld [vmem:[#allocation3] sm:$0xf] }
 0x247   : > { %v1353_v38 = vmul.f32 0.032258064, %v1352_v28 }
 0x248   : > { %v1305_v4 = vpop.permute.xlu0 %1304 }
 0x249   : > { %5299 = vmatmul.msk.f32.vlgmr.msra.gmra.mxu1 %vm915_vm12, %v1305_v4 }
 0x24b   : > { %v1253_v6 = vpop.permute.xlu1 %1252 }
 0x24c   : > { %5297 = vmatmul.msk.f32.vlgmr.msrb.gmra.mxu3 %vm915_vm12, %v1253_v6  ;;  %5298 = vmatmul.msk.f32.vlgmr.msra.gmra.mxu0 %vm915_vm12, %v1279_v5  ;;  %vm1744_vm12 = vcmask 1043456  }
 0x296   : > { %v1040_v7 = vpop.f32.mrf.mxu2 }
 0x297   : > { %1044 = vst.msk [vmem:[#allocation3 + $0x10] sm:$0xf] %vm939_vm13, %v1040_v7 }
 0x298   : > { %v988_v8 = vpop.f32.mrf.mxu0 }
 0x299   : > { %992 = vst.msk [vmem:[#allocation3 + $0x8] sm:$0xf] %vm939_vm13, %v988_v8 }
 0x29e   : > { %v1143_v9 = vpop.f32.mrf.mxu2  ;;  %v1413_v27 = vld [vmem:[#allocation3 + $0x10] sm:$0xf] }
 0x29f   : > { %v1337_v10 = vpop.permute.xlu2 %1336  ;;  %1147 = vst.msk [vmem:[#allocation3 + $0x20] sm:$0xf] %vm939_vm13, %v1143_v9  ;;  %v1414_v37 = vmul.f32 0.38709676, %v1413_v27  ;;  %v1431_v46 = vld [vmem:[#allocation3 + $0x10] sm:$0xf] }
 0x2a0   : > { %1340 = vst.msk [vmem:[#allocation4] sm:$0xf] %vm1339_vm15, %v1337_v10  ;;  %v1399_v12 = vld [vmem:[#allocation3 + $0x8] sm:$0xf]  ;;  %v1432_v54 = vmul.f32 0.6451613, %v1431_v46 }
 0x2a1   : > { %v1389_v13 = vld [vmem:[#allocation3 + $0x8] sm:$0xf]  ;;  %v1400_v15 = vmul.f32 0.09677419, %v1399_v12  ;;  %v1423_v4 = vld [vmem:[#allocation3 + $0x10] sm:$0xf] }
 0x2a2   : > { %v1390_v16 = vmul.f32 0.58064514, %v1389_v13  ;;  %v1381_v44 = vld [vmem:[#allocation3 + $0x8] sm:$0xf]  ;;  %v1424_v10 = vmul.f32 0.87096775, %v1423_v4 }
 0x2a3   : > { %v1370_v47 = vld [vmem:[#allocation3 + $0x8] sm:$0xf]  ;;  %v1382_v51 = vmul.f32 0.9354839, %v1381_v44 }
 0x2a4   : > { %v1371_v55 = vmul.f32 0.4516129, %v1370_v47 }
 0x2a8   : > { %v1014_v11 = vpop.f32.mrf.mxu1 }
 0x2a9   : > { %1018 = vst.msk [vmem:[#allocation3 + $0xc] sm:$0xf] %vm939_vm13, %v1014_v11 }
 0x2af   : > { %v962_v14 = vpop.f32.mrf.mxu3 }
 0x2b0   : > { %966 = vst.msk [vmem:[#allocation3 + $0x4] sm:$0xf] %vm939_vm13, %v962_v14  ;;  %v1118_v17 = vpop.f32.mrf.mxu1  ;;  %v1401_v18 = vld [vmem:[#allocation3 + $0xc] sm:$0xf] }
 0x2b1   : > { %v1391_v19 = vld [vmem:[#allocation3 + $0xc] sm:$0xf]  ;;  %1122 = vst.msk [vmem:[#allocation3 + $0x1c] sm:$0xf] %vm939_vm13, %v1118_v17  ;;  %v1402_v20 = vmul.f32 0.9032258, %v1401_v18 }
 0x2b2   : > { %v1392_v21 = vmul.f32 0.41935483, %v1391_v19  ;;  %v1411_v25 = vld [vmem:[#allocation3 + $0xc] sm:$0xf]  ;;  %v1441_v17 = vld [vmem:[#allocation3 + $0x10] sm:$0xf] }
 0x2b3   : > { %v1403_v22 = vadd.f32 %v1402_v20, %v1400_v15  ;;  %v1412_v31 = vmul.f32 0.61290324, %v1411_v25  ;;  %v1421_v62 = vld [vmem:[#allocation3 + $0xc] sm:$0xf]  ;;  %v1525_v20 = vld [vmem:[#allocation3 + $0x20] sm:$0xf] }
 0x2b4   : > { %v1393_v23 = vadd.f32 %v1392_v21, %v1390_v16  ;;  %v1422_v6 = vmul.f32 0.12903225, %v1421_v62  ;;  %v1442_v24 = vmul.f32 0.16129032, %v1441_v17 }
 0x2b5   : > { %1405 = vrot.lane.b32.xlu2 %v1403_v22, %s5931_s11  ;;  %v1415_v40 = vadd.f32 %v1414_v37, %v1412_v31 }
 0x2b6   : > { %1395 = vrot.lane.b32.xlu1 %v1393_v23, %s5932_s13  ;;  %v1425_v13 = vadd.f32 %v1424_v10, %v1422_v6 }
 0x2b7   : > { %v1066_v29 = vpop.f32.mrf.mxu3  ;;  %v1343_v30 = vld [vmem:[#allocation3 + $0x4] sm:$0xf] }
 0x2b8   : > { %v1354_v32 = vld [vmem:[#allocation3 + $0x4] sm:$0xf]  ;;  %1070 = vst.msk [vmem:[#allocation3 + $0x14] sm:$0xf] %vm939_vm13, %v1066_v29  ;;  %v1221_v33 = vpop.f32.mrf.mxu1  ;;  %v1344_v34 = vmul.f32 0.48387095, %v1343_v30 }
 0x2b9   : > { %v1355_v35 = vmul.f32 0.9677419, %v1354_v32  ;;  %v1092_v36 = vpop.f32.mrf.mxu0  ;;  %1225 = vst.msk [vmem:[#allocation3 + $0x2c] sm:$0xf] %vm939_vm13, %v1221_v33  ;;  %v1379_v42 = vld [vmem:[#allocation3 + $0x4] sm:$0xf] }
 0x2ba   : > { %1096 = vst.msk [vmem:[#allocation3 + $0x18] sm:$0xf] %vm939_vm13, %v1092_v36  ;;  %v1345_v39 = vadd.f32 %v1344_v34, %v1342_v26  ;;  %v1368_v43 = vld [vmem:[#allocation3 + $0x4] sm:$0xf]  ;;  %v1380_v45 = vmul.f32 0.06451613, %v1379_v42 }
 0x2bb   : > { %v1356_v41 = vadd.f32 %v1355_v35, %v1353_v38  ;;  %v1369_v50 = vmul.f32 0.5483871, %v1368_v43  ;;  %v1475_v63 = vld [vmem:[#allocation3 + $0x1c] sm:$0xf]  ;;  %v1526_v26 = vmul.f32 0.29032257, %v1525_v20 }
 0x2bc   : > { %1347 = vrot.lane.b32.xlu0 %v1345_v39, %s5932_s13  ;;  %v1383_v56 = vadd.f32 %v1382_v51, %v1380_v45  ;;  %v1476_v7 = vmul.f32 0.29032257, %v1475_v63  ;;  %v1485_v19 = vld [vmem:[#allocation3 + $0x1c] sm:$0xf]  ;;  %v1497_v36 = vld [vmem:[#allocation3 + $0x20] sm:$0xf] }
 0x2bd   : > { %1417 = vrot.lane.b32.xlu2 %v1415_v40, %s5933_s28  ;;  %v1372_v58 = vadd.f32 %v1371_v55, %v1369_v50  ;;  %v1486_v25 = vmul.f32 0.7741935, %v1485_v19  ;;  %v1495_v32 = vld [vmem:[#allocation3 + $0x1c] sm:$0xf]  ;;  %v1515_v51 = vld [vmem:[#allocation3 + $0x20] sm:$0xf] }
 0x2be   : > { %1358 = vrot.lane.b32.xlu1 %v1356_v41, %s5931_s11  ;;  %v1496_v38 = vmul.f32 0.7419355, %v1495_v32  ;;  %v1498_v41 = vmul.f32 0.2580645, %v1497_v36  ;;  %v1505_v45 = vld [vmem:[#allocation3 + $0x1c] sm:$0xf] }
 0x2bf   : > { %v1169_v48 = vpop.f32.mrf.mxu3  ;;  %v1433_v49 = vld [vmem:[#allocation3 + $0x14] sm:$0xf] }
 0x2c0   : > { %1173 = vst.msk [vmem:[#allocation3 + $0x24] sm:$0xf] %vm939_vm13, %v1169_v48  ;;  %v1434_v52 = vmul.f32 0.3548387, %v1433_v49  ;;  %v1463_v3 = vld [vmem:[#allocation3 + $0x14] sm:$0xf]  ;;  %v1499_v44 = vadd.f32 %v1498_v41, %v1496_v38 }
 0x2c1   : > { %v1195_v53 = vpop.f32.mrf.mxu0  ;;  %v1473_v59 = vld [vmem:[#allocation3 + $0x18] sm:$0xf]  ;;  %v1464_v9 = vmul.f32 0.19354838, %v1463_v3  ;;  %v1443_v14 = vld [vmem:[#allocation3 + $0x14] sm:$0xf] }
 0x2c2   : > { %1199 = vst.msk [vmem:[#allocation3 + $0x28] sm:$0xf] %vm939_vm13, %v1195_v53  ;;  %v1435_v57 = vadd.f32 %v1434_v52, %v1432_v54  ;;  %v1465_v61 = vld [vmem:[#allocation3 + $0x18] sm:$0xf]  ;;  %v1474_v2 = vmul.f32 0.7096774, %v1473_v59 }
 0x2c3   : > { %v1466_v5 = vmul.f32 0.8064516, %v1465_v61  ;;  %v1483_v15 = vld [vmem:[#allocation3 + $0x18] sm:$0xf]  ;;  %v1444_v18 = vmul.f32 0.83870965, %v1443_v14 }
 0x2c4   : > { %1385 = vrot.lane.b32.xlu0 %v1383_v56, %s5930_s14  ;;  %v1247_v60 = vpop.f32.mrf.mxu2  ;;  %v1477_v11 = vadd.f32 %v1476_v7, %v1474_v2  ;;  %v1484_v22 = vmul.f32 0.22580644, %v1483_v15  ;;  %v1455_v30 = vld [vmem:[#allocation3 + $0x18] sm:$0xf]  ;;  %v1453_v33 = vld [vmem:[#allocation3 + $0x14] sm:$0xf] }
 0x2c5   : > { %1251 = vst.msk [vmem:[#allocation3 + $0x30] sm:$0xf] %vm939_vm13, %v1247_v60  ;;  %1437 = vrot.lane.b32.xlu2 %v1435_v57, %s5932_s13  ;;  %v1467_v12 = vadd.f32 %v1466_v5, %v1464_v9  ;;  %v1445_v27 = vadd.f32 %v1444_v18, %v1442_v24  ;;  %v1456_v34 = vmul.f32 0.32258064, %v1455_v30  ;;  %v1454_v39 = vmul.f32 0.67741936, %v1453_v33 }
 0x2c6   : > { %1374 = vrot.lane.b32.xlu1 %v1372_v58, %s5933_s28  ;;  %v1325_v1 = vpop.f32.mrf.mxu1  ;;  %v1487_v28 = vadd.f32 %v1486_v25, %v1484_v22  ;;  %v1507_v48 = vld [vmem:[#allocation3 + $0x20] sm:$0xf]  ;;  %v1506_v49 = vmul.f32 0.2580645, %v1505_v45  ;;  %v1559_v50 = vld [vmem:[#allocation3 + $0x2c] sm:$0xf] }
 0x2c7   : > { %1329 = vst.msk [vmem:[#allocation3 + $0x3c] sm:$0xf] %vm939_vm13, %v1325_v1  ;;  %v1527_v16 = vld [vmem:[#allocation3 + $0x24] sm:$0xf]  ;;  %v1457_v42 = vadd.f32 %v1456_v34, %v1454_v39  ;;  %v1508_v54 = vmul.f32 0.7419355, %v1507_v48 }
 0x2c8   : > { %v1528_v23 = vmul.f32 0.7096774, %v1527_v16  ;;  %v1537_v35 = vld [vmem:[#allocation3 + $0x24] sm:$0xf]  ;;  %v1560_v55 = vmul.f32 0.16129032, %v1559_v50 }
 0x2c9   : > { %v1299_v8 = vpop.f32.mrf.mxu0  ;;  %v1539_v31 = vld [vmem:[#allocation3 + $0x28] sm:$0xf]  ;;  %v1538_v40 = vmul.f32 0.8064516, %v1537_v35  ;;  %v1517_v47 = vld [vmem:[#allocation3 + $0x24] sm:$0xf]  ;;  %v1509_v57 = vadd.f32 %v1508_v54, %v1506_v49 }
 0x2ca   : > { %1303 = vst.msk [vmem:[#allocation3 + $0x38] sm:$0xf] %vm939_vm13, %v1299_v8  ;;  %v1529_v29 = vadd.f32 %v1528_v23, %v1526_v26  ;;  %v1540_v37 = vmul.f32 0.19354838, %v1539_v31  ;;  %v1557_v46 = vld [vmem:[#allocation3 + $0x28] sm:$0xf] }
 0x2cb   : > { %v1558_v52 = vmul.f32 0.83870965, %v1557_v46  ;;  %v1518_v53 = vmul.f32 0.22580644, %v1517_v47  ;;  %v1516_v56 = vmul.f32 0.7741935, %v1515_v51 }
 0x2cc   : > { %1479 = vrot.lane.b32.xlu0 %v1477_v11, %s5932_s13  ;;  %v1541_v43 = vadd.f32 %v1540_v37, %v1538_v40  ;;  %v1567_v60 = vld [vmem:[#allocation3 + $0x28] sm:$0xf]  ;;  %v1591_v61 = vld [vmem:[#allocation3 + $0x30] sm:$0xf]  ;;  %v1569_v63 = vld [vmem:[#allocation3 + $0x2c] sm:$0xf] }
 0x2cd   : > { %1469 = vrot.lane.b32.xlu2 %v1467_v12, %s5930_s14  ;;  %v1561_v58 = vadd.f32 %v1560_v55, %v1558_v52  ;;  %v1519_v59 = vadd.f32 %v1518_v53, %v1516_v56  ;;  %v1549_v62 = vld [vmem:[#allocation3 + $0x28] sm:$0xf]  ;;  %v1568_v1 = vmul.f32 0.3548387, %v1567_v60  ;;  %v1589_v2 = vld [vmem:[#allocation3 + $0x2c] sm:$0xf] }
 0x2ce   : > { %1427 = vrot.lane.b32.xlu1 %v1425_v13, %s5930_s14  ;;  %v1547_v3 = vld [vmem:[#allocation3 + $0x24] sm:$0xf]  ;;  %v1592_v4 = vmul.f32 0.61290324, %v1591_v61  ;;  %v1550_v5 = vmul.f32 0.67741936, %v1549_v62 }
 0x2cf   : > { %v1273_v21 = vpop.f32.mrf.mxu3  ;;  %v1570_v6 = vmul.f32 0.6451613, %v1569_v63  ;;  %v1590_v7 = vmul.f32 0.38709676, %v1589_v2  ;;  %v1548_v8 = vmul.f32 0.32258064, %v1547_v3 }
 0x2d0   : > { %1277 = vst.msk [vmem:[#allocation3 + $0x34] sm:$0xf] %vm939_vm13, %v1273_v21  ;;  %v1581_v12 = vld [vmem:[#allocation3 + $0x30] sm:$0xf]  ;;  %v1579_v15 = vld [vmem:[#allocation3 + $0x2c] sm:$0xf] }
 0x2d1   : > { %v1571_v9 = vadd.f32 %v1570_v6, %v1568_v1  ;;  %v1593_v10 = vadd.f32 %v1592_v4, %v1590_v7  ;;  %v1551_v11 = vadd.f32 %v1550_v5, %v1548_v8  ;;  %v1651_v13 = vld [vmem:[#allocation3 + $0x38] sm:$0xf]  ;;  %v1582_v16 = vmul.f32 0.12903225, %v1581_v12  ;;  %v1653_v17 = vld [vmem:[#allocation3 + $0x3c] sm:$0xf] }
 0x2d2   : > { %v1609_v18 = vld [vmem:[#allocation3 + $0x30] sm:$0xf]  ;;  %v1652_v19 = vmul.f32 0.48387095, %v1651_v13  ;;  %v1580_v21 = vmul.f32 0.87096775, %v1579_v15 }
 0x2d3   : > { %v1654_v22 = vmul.f32 0.516129, %v1653_v17  ;;  %v1610_v23 = vmul.f32 0.41935483, %v1609_v18  ;;  %v1623_v31 = vld [vmem:[#allocation3 + $0x38] sm:$0xf] }
 0x2d4   : > { %1447 = vrot.lane.b32.xlu0 %v1445_v27, %s5931_s11  ;;  %v1583_v24 = vadd.f32 %v1582_v16, %v1580_v21  ;;  %v1624_v34 = vmul.f32 0.06451613, %v1623_v31  ;;  %v1663_v38 = vld [vmem:[#allocation3 + $0x3c] sm:$0xf]  ;;  %v1641_v39 = vld [vmem:[#allocation3 + $0x38] sm:$0xf] }
 0x2d5   : > { %1531 = vrot.lane.b32.xlu2 %v1529_v29, %s5931_s11  ;;  %v1655_v25 = vadd.f32 %v1654_v22, %v1652_v19  ;;  %v1599_v29 = vld [vmem:[#allocation3 + $0x30] sm:$0xf]  ;;  %v1633_v40 = vld [vmem:[#allocation3 + $0x38] sm:$0xf]  ;;  %vm1731_vm13 = vcmask 31744  }
 0x2d6   : > { %1489 = vrot.lane.b32.xlu1 %v1487_v28, %s5931_s11  ;;  %v1600_v33 = vmul.f32 0.9032258, %v1599_v29 }
 0x2d7   : > { %v1611_v14 = vld [vmem:[#allocation3 + $0x34] sm:$0xf] }
 0x2d8   : > { %v1612_v20 = vmul.f32 0.58064514, %v1611_v14  ;;  %v1601_v27 = vld [vmem:[#allocation3 + $0x34] sm:$0xf] }
 0x2d9   : > { %v1621_v28 = vld [vmem:[#allocation3 + $0x34] sm:$0xf]  ;;  %v1602_v30 = vmul.f32 0.09677419, %v1601_v27 }
 0x2da   : > { %v1613_v26 = vadd.f32 %v1612_v20, %v1610_v23  ;;  %v1622_v32 = vmul.f32 0.9354839, %v1621_v28  ;;  %v1631_v37 = vld [vmem:[#allocation3 + $0x34] sm:$0xf] }
 0x2db   : > { %v1603_v35 = vadd.f32 %v1602_v30, %v1600_v33  ;;  %v1632_v41 = vmul.f32 0.4516129, %v1631_v37 }
 0x2dc   : > { %1459 = vrot.lane.b32.xlu0 %v1457_v42, %s5933_s28  ;;  %v1625_v36 = vadd.f32 %v1624_v34, %v1622_v32  ;;  %v1643_v42 = vld [vmem:[#allocation3 + $0x3c] sm:$0xf] }
 0x2dd   : > { %1543 = vrot.lane.b32.xlu2 %v1541_v43, %s5933_s28  ;;  %v1642_v43 = vmul.f32 0.9677419, %v1641_v39  ;;  %v1644_v45 = vmul.f32 0.032258064, %v1643_v42 }
 0x2de   : > { %1501 = vrot.lane.b32.xlu1 %v1499_v44, %s5933_s28  ;;  %v1634_v44 = vmul.f32 0.5483871, %v1633_v40 }
 0x2df   : > { %v1645_v47 = vadd.f32 %v1644_v45, %v1642_v43 }
 0x2e0   : > { %v1635_v46 = vadd.f32 %v1634_v44, %v1632_v41 }
 0x2e4   : > { %1511 = vrot.lane.b32.xlu0 %v1509_v57, %s5930_s14 }
 0x2e5   : > { %1563 = vrot.lane.b32.xlu2 %v1561_v58, %s5932_s13 }
 0x2e6   : > { %1521 = vrot.lane.b32.xlu1 %v1519_v59, %s5932_s13 }
 0x2ec   : > { %1573 = vrot.lane.b32.xlu0 %v1571_v9, %s5931_s11 }
 0x2ed   : > { %1595 = vrot.lane.b32.xlu2 %v1593_v10, %s5930_s14 }
 0x2ee   : > { %1553 = vrot.lane.b32.xlu1 %v1551_v11, %s5930_s14 }
 0x2f4   : > { %1585 = vrot.lane.b32.xlu0 %v1583_v24, %s5933_s28 }
 0x2f5   : > { %1657 = vrot.lane.b32.xlu2 %v1655_v25, %s5931_s11 }
 0x2f6   : > { %1615 = vrot.lane.b32.xlu1 %v1613_v26, %s5931_s11  ;;  %s5935_s11 = smov 62  }
 0x2fc   : > { %1605 = vrot.lane.b32.xlu0 %v1603_v35, %s5932_s13 }
 0x2fd   : > { %1665 = vrot.lane.b32.xlu2 %v1663_v38, %s5933_s28 }
 0x2fe   : > { %1627 = vrot.lane.b32.xlu1 %v1625_v36, %s5933_s28  ;;  %s5934_s28 = smov 63  }
 0x304   : > { %1637 = vrot.lane.b32.xlu0 %v1635_v46, %s5930_s14  ;;  %s4827_s14 = sld [smem:[#allocation5]] }
 0x306   : > { %1647 = vrot.lane.b32.xlu1 %v1645_v47, %s5932_s13  ;;  %s5710_s13 = sshll.u32 %s6015_s9, 3 }
 0x30f   : > { %v1406_v48 = vpop.permute.xlu2 %1405 }
 0x310   : > { %v1407_v57 = vrot.slane %v1406_v48, 4 }
 0x312   : > { %v1408_v60 = vsel %vm1361_vm4, %v1407_v57, %v1406_v48 }
 0x317   : > { %v1418_v50 = vpop.permute.xlu2 %1417 }
 0x31f   : > { %v1438_v56 = vpop.permute.xlu2 %1437 }
 0x327   : > { %v1470_v62 = vpop.permute.xlu2 %1469 }
 0x328   : > { %v1396_v49 = vpop.permute.xlu1 %1395 }
 0x32e   : > { %v1348_v51 = vpop.permute.xlu0 %1347 }
 0x32f   : > { %1351 = vst.msk [vmem:[#allocation4] sm:$0xf] %vm1350_vm0, %v1348_v51  ;;  %v1532_v5 = vpop.permute.xlu2 %1531 }
 0x330   : > { %v1359_v52 = vpop.permute.xlu1 %1358  ;;  %v1533_v14 = vrot.slane %v1532_v5, 4 }
 0x331   : > { %v1360_v54 = vrot.slane %v1359_v52, 4 }
 0x332   : > { %v1534_v17 = vsel %vm1361_vm4, %v1533_v14, %v1532_v5 }
 0x333   : > { %v1362_v55 = vsel %vm1361_vm4, %v1360_v54, %v1359_v52 }
 0x334   : > { %1367 = vst.msk [vmem:[#allocation4] sm:$0xff] %vm6263_vm3, %v1362_v55 }
 0x336   : > { %v1386_v58 = vpop.permute.xlu0 %1385 }
 0x337   : > { %v1544_v13 = vpop.permute.xlu2 %1543 }
 0x338   : > { %v1375_v59 = vpop.permute.xlu1 %1374 }
 0x339   : > { %1378 = vst.msk [vmem:[#allocation4 + $0x4] sm:$0xf] %vm1377_vm6, %v1375_v59 }
 0x33a   : > { %1388 = vst.msk [vmem:[#allocation4 + $0x4] sm:$0xf] %vm1339_vm15, %v1386_v58 }
 0x33b   : > { %1398 = vst.msk [vmem:[#allocation4 + $0x4] sm:$0xf] %vm1350_vm0, %v1396_v49 }
 0x33c   : > { %1410 = vst.msk [vmem:[#allocation4 + $0x4] sm:$0xff] %vm6263_vm3, %v1408_v60 }
 0x33d   : > { %1420 = vst.msk [vmem:[#allocation4 + $0x8] sm:$0xf] %vm1377_vm6, %v1418_v50 }
 0x33e   : > { %v1480_v61 = vpop.permute.xlu0 %1479 }
 0x33f   : > { %v1564_v19 = vpop.permute.xlu2 %1563 }
 0x340   : > { %v1428_v63 = vpop.permute.xlu1 %1427 }
 0x341   : > { %1430 = vst.msk [vmem:[#allocation4 + $0x8] sm:$0xf] %vm1339_vm15, %v1428_v63 }
 0x342   : > { %1440 = vst.msk [vmem:[#allocation4 + $0x8] sm:$0xf] %vm1350_vm0, %v1438_v56 }
 0x343   : > { %v6279_v1 = vld [vmem:[#allocation4] sm:$0xff] }
 0x344   : > { %1688 = vst [vmem:[#allocation1] ss:$2 sm:$0xff] %v6279_v1 }
 0x346   : > { %v1448_v2 = vpop.permute.xlu0 %1447 }
 0x347   : > { %v1449_v3 = vrot.slane %v1448_v2, 4  ;;  %v1596_v26 = vpop.permute.xlu2 %1595 }
 0x348   : > { %v1490_v4 = vpop.permute.xlu1 %1489 }
 0x349   : > { %v1450_v6 = vsel %vm1361_vm4, %v1449_v3, %v1448_v2  ;;  %v1491_v9 = vrot.slane %v1490_v4, 4 }
 0x34a   : > { %1452 = vst.msk [vmem:[#allocation4 + $0x8] sm:$0xff] %vm6263_vm3, %v1450_v6 }
 0x34b   : > { %v1695_v7 = vld.sshfl [vmem:[#allocation1] sm:$0xff pattern:$0x75316420]  ;;  %v1696_v8 = vld.sshfl [vmem:[#allocation1 + $0x8] sm:$0xff pattern:$0x75316420]  ;;  %v1492_v12 = vsel %vm1361_vm4, %v1491_v9, %v1490_v4 }
 0x34c   : > { %1705 = vrot.lane.b32.xlu0 %v1695_v7, %s5921_s22  ;;  %1707 = vrot.lane.b32.xlu1 %v1696_v8, %s5921_s22 }
 0x34e   : > { %v1460_v10 = vpop.permute.xlu0 %1459 }
 0x34f   : > { %1462 = vst.msk [vmem:[#allocation4 + $0xc] sm:$0xf] %vm1377_vm6, %v1460_v10  ;;  %v1658_v35 = vpop.permute.xlu2 %1657 }
 0x350   : > { %v1502_v11 = vpop.permute.xlu1 %1501  ;;  %1472 = vst.msk [vmem:[#allocation4 + $0xc] sm:$0xf] %vm1339_vm15, %v1470_v62  ;;  %v1659_v39 = vrot.slane %v1658_v35, 4 }
 0x351   : > { %1482 = vst.msk [vmem:[#allocation4 + $0xc] sm:$0xf] %vm1350_vm0, %v1480_v61 }
 0x352   : > { %1494 = vst.msk [vmem:[#allocation4 + $0xc] sm:$0xff] %vm6263_vm3, %v1492_v12  ;;  %v1660_v43 = vsel %vm1361_vm4, %v1659_v39, %v1658_v35 }
 0x353   : > { %1504 = vst.msk [vmem:[#allocation4 + $0x10] sm:$0xf] %vm1377_vm6, %v1502_v11 }
 0x356   : > { %v1512_v15 = vpop.permute.xlu0 %1511 }
 0x357   : > { %1514 = vst.msk [vmem:[#allocation4 + $0x10] sm:$0xf] %vm1339_vm15, %v1512_v15  ;;  %v1666_v46 = vpop.permute.xlu2 %1665 }
 0x358   : > { %v1522_v16 = vpop.permute.xlu1 %1521 }
 0x359   : > { %1524 = vst.msk [vmem:[#allocation4 + $0x10] sm:$0xf] %vm1350_vm0, %v1522_v16  ;;  %v6297_v18 = vld [vmem:[#allocation4 + $0x8] sm:$0xff] }
 0x35a   : > { %1536 = vst.msk [vmem:[#allocation4 + $0x10] sm:$0xff] %vm6263_vm3, %v1534_v17 }
 0x35b   : > { %1690 = vst [vmem:[#allocation1 + $0x10] ss:$2 sm:$0xff] %v6297_v18 }
 0x35c   : > { %1546 = vst.msk [vmem:[#allocation4 + $0x14] sm:$0xf] %vm1377_vm6, %v1544_v13 }
 0x35e   : > { %v1574_v20 = vpop.permute.xlu0 %1573 }
 0x35f   : > { %v1575_v21 = vrot.slane %v1574_v20, 4 }
 0x360   : > { %v1554_v22 = vpop.permute.xlu1 %1553 }
 0x361   : > { %1556 = vst.msk [vmem:[#allocation4 + $0x14] sm:$0xf] %vm1339_vm15, %v1554_v22  ;;  %v1576_v23 = vsel %vm1361_vm4, %v1575_v21, %v1574_v20 }
 0x362   : > { %1566 = vst.msk [vmem:[#allocation4 + $0x14] sm:$0xf] %vm1350_vm0, %v1564_v19  ;;  %v1697_v24 = vld.sshfl [vmem:[#allocation1 + $0x10] sm:$0xff pattern:$0x75316420] }
 0x363   : > { %1578 = vst.msk [vmem:[#allocation4 + $0x14] sm:$0xff] %vm6263_vm3, %v1576_v23  ;;  %1709 = vrot.lane.b32.xlu2 %v1697_v24, %s5921_s22  ;;  %v1698_v25 = vld.sshfl [vmem:[#allocation1 + $0x18] sm:$0xff pattern:$0x75316420] }
 0x364   : > { %1995 = vst [vmem:[#allocation1 + $0x10] ss:$2 sm:$0xff] %v6297_v18  ;;  %1711 = vrot.lane.b32.xlu0 %v1698_v25, %s5921_s22 }
 0x366   : > { %v1586_v0 = vpop.permute.xlu0 %1585 }
 0x367   : > { %1588 = vst.msk [vmem:[#allocation4 + $0x18] sm:$0xf] %vm1377_vm6, %v1586_v0 }
 0x368   : > { %v1616_v27 = vpop.permute.xlu1 %1615  ;;  %1598 = vst.msk [vmem:[#allocation4 + $0x18] sm:$0xf] %vm1339_vm15, %v1596_v26 }
 0x369   : > { %v1617_v31 = vrot.slane %v1616_v27, 4 }
 0x36a   : > { %v6314_v28 = vld [vmem:[#allocation4 + $0x10] sm:$0xff] }
 0x36b   : > { %1692 = vst [vmem:[#allocation1 + $0x20] ss:$2 sm:$0xff] %v6314_v28  ;;  %v6317_v29 = vld.sshfl [vmem:[#allocation1 + $0x10] sm:$0xff pattern:$0x75316420]  ;;  %v1618_v33 = vsel %vm1361_vm4, %v1617_v31, %v1616_v27 }
 0x36c   : > { %v6319_v30 = vld.sshfl [vmem:[#allocation1 + $0x18] sm:$0xff pattern:$0x75316420] }
 0x36d   : > { %2285 = vst [vmem:[#allocation1 + $0x10] ss:$2 sm:$0xff] %v6297_v18 }
 0x36e   : > { %v1606_v32 = vpop.permute.xlu0 %1605 }
 0x36f   : > { %1608 = vst.msk [vmem:[#allocation4 + $0x18] sm:$0xf] %vm1350_vm0, %v1606_v32 }
 0x370   : > { %v1628_v34 = vpop.permute.xlu1 %1627  ;;  %1620 = vst.msk [vmem:[#allocation4 + $0x18] sm:$0xff] %vm6263_vm3, %v1618_v33 }
 0x371   : > { %1630 = vst.msk [vmem:[#allocation4 + $0x1c] sm:$0xf] %vm1377_vm6, %v1628_v34 }
 0x372   : > { %v1700_v36 = vld.sshfl [vmem:[#allocation1 + $0x28] sm:$0xff pattern:$0x75316420]  ;;  %v1699_v37 = vld.sshfl [vmem:[#allocation1 + $0x20] sm:$0xff pattern:$0x75316420] }
 0x373   : > { %1715 = vrot.lane.b32.xlu2 %v1700_v36, %s5921_s22  ;;  %1713 = vrot.lane.b32.xlu1 %v1699_v37, %s5921_s22  ;;  %1997 = vst [vmem:[#allocation1 + $0x20] ss:$2 sm:$0xff] %v6314_v28 }
 0x374   : > { %v2292_v38 = vld.sshfl [vmem:[#allocation1 + $0x10] sm:$0xff pattern:$0x75316420]  ;;  %v6330_v40 = vld.sshfl [vmem:[#allocation1 + $0x18] sm:$0xff pattern:$0x75316420] }
 0x375   : > { %2691 = vst [vmem:[#allocation1 + $0x10] ss:$2 sm:$0xff] %v6297_v18 }
 0x376   : > { %v1638_v41 = vpop.permute.xlu0 %1637 }
 0x377   : > { %1640 = vst.msk [vmem:[#allocation4 + $0x1c] sm:$0xf] %vm1339_vm15, %v1638_v41 }
 0x378   : > { %v1648_v42 = vpop.permute.xlu1 %1647 }
 0x379   : > { %1650 = vst.msk [vmem:[#allocation4 + $0x1c] sm:$0xf] %vm1350_vm0, %v1648_v42 }
 0x37a   : > { %1662 = vst.msk [vmem:[#allocation4 + $0x1c] sm:$0xff] %vm6263_vm3, %v1660_v43  ;;  %v6338_v44 = vld.sshfl [vmem:[#allocation1 + $0x20] sm:$0xff pattern:$0x75316420] }
 0x37b   : > { %v6340_v45 = vld.sshfl [vmem:[#allocation1 + $0x28] sm:$0xff pattern:$0x75316420]  ;;  %1668 = vst.msk [vmem:[#allocation4 + $0x20] sm:$0xf] %vm1377_vm6, %v1666_v46 }
 0x37c   : > { %2287 = vst [vmem:[#allocation1 + $0x20] ss:$2 sm:$0xff] %v6314_v28  ;;  %v6344_v47 = vld.sshfl [vmem:[#allocation1 + $0x10] sm:$0xff pattern:$0x75316420] }
 0x37d   : > { %v6346_v48 = vld.sshfl [vmem:[#allocation1 + $0x18] sm:$0xff pattern:$0x75316420] }
 0x37e   : > { %2994 = vst [vmem:[#allocation1 + $0x10] ss:$2 sm:$0xff] %v6297_v18 }
 0x381   : > { %v6349_v49 = vld [vmem:[#allocation4 + $0x18] sm:$0xff] }
 0x382   : > { %1694 = vst [vmem:[#allocation1 + $0x30] ss:$2 sm:$0xff] %v6349_v49  ;;  %v1677_v52 = vld [vmem:[#allocation4 + $0x20] sm:$0xf] }
 0x383   : > { %v2295_v50 = vld.sshfl [vmem:[#allocation1 + $0x28] sm:$0xff pattern:$0x75316420]  ;;  %v2294_v51 = vld.sshfl [vmem:[#allocation1 + $0x20] sm:$0xff pattern:$0x75316420] }
 0x384   : > { %1703 = vst [vmem:[#allocation1] ss:$2 sm:$0xff] %v1677_v52  ;;  %v2272_v8 = vld [vmem:[#allocation4 + $0x20] sm:$0xf]  ;;  %v6489_v52 = vld [vmem:[%s8609_s5 + $0x70] sm:$0xff] }
 0x385   : > { %2693 = vst [vmem:[#allocation1 + $0x20] ss:$2 sm:$0xff] %v6314_v28  ;;  %v6353_v53 = vld.sshfl [vmem:[#allocation1 + $0x10] sm:$0xff pattern:$0x75316420] }
 0x386   : > { %v6355_v54 = vld.sshfl [vmem:[#allocation1 + $0x18] sm:$0xff pattern:$0x75316420]  ;;  %v2673_v25 = vld [vmem:[#allocation4 + $0x20] sm:$0xf] }
 0x387   : > { %3312 = vst [vmem:[#allocation1 + $0x10] ss:$2 sm:$0xff] %v6297_v18 }
 0x389   : > { %v1702_v55 = vld.sshfl [vmem:[#allocation1 + $0x38] sm:$0xff pattern:$0x75316420]  ;;  %v1701_v56 = vld.sshfl [vmem:[#allocation1 + $0x30] sm:$0xff pattern:$0x75316420] }
 0x38a   : > { %1719 = vrot.lane.b32.xlu1 %v1702_v55, %s5921_s22  ;;  %1717 = vrot.lane.b32.xlu0 %v1701_v56, %s5921_s22  ;;  %1999 = vst [vmem:[#allocation1 + $0x30] ss:$2 sm:$0xff] %v6349_v49 }
 0x38b   : > { %v1704_v57 = vld.sshfl [vmem:[#allocation1] sm:$0xff pattern:$0x75316420] }
 0x38c   : > { %1993 = vst [vmem:[#allocation1] ss:$2 sm:$0xff] %v6279_v1  ;;  %1721 = vrot.lane.b32.xlu2 %v1704_v57, %s5921_s22  ;;  %v2701_v58 = vld.sshfl [vmem:[#allocation1 + $0x28] sm:$0xff pattern:$0x75316420]  ;;  %v6505_v57 = vld [vmem:[%s8609_s5 + $0x78] sm:$0xff] }
 0x38d   : > { %v6363_v59 = vld.sshfl [vmem:[#allocation1 + $0x20] sm:$0xff pattern:$0x75316420] }
 0x38e   : > { %2996 = vst [vmem:[#allocation1 + $0x20] ss:$2 sm:$0xff] %v6314_v28  ;;  %v6366_v60 = vld.sshfl [vmem:[#allocation1 + $0x10] sm:$0xff pattern:$0x75316420] }
 0x38f   : > { %v6368_v61 = vld.sshfl [vmem:[#allocation1 + $0x18] sm:$0xff pattern:$0x75316420] }
 0x390   : > { %3700 = vst [vmem:[#allocation1 + $0x10] ss:$2 sm:$0xff] %v6297_v18 }
 0x391   : > { %v6370_v62 = vld.sshfl [vmem:[#allocation1 + $0x30] sm:$0xff pattern:$0x75316420]  ;;  %v6372_v63 = vld.sshfl [vmem:[#allocation1 + $0x38] sm:$0xff pattern:$0x75316420] }
 0x392   : > { %2289 = vst [vmem:[#allocation1 + $0x30] ss:$2 sm:$0xff] %v6349_v49 }
 0x393   : > { %v6376_v2 = vld.sshfl [vmem:[#allocation1] sm:$0xff pattern:$0x75316420]  ;;  %v6378_v3 = vld.sshfl [vmem:[#allocation1 + $0x8] sm:$0xff pattern:$0x75316420] }
 0x394   : > { %2283 = vst [vmem:[#allocation1] ss:$2 sm:$0xff] %v6279_v1  ;;  %2304 = vrot.lane.b32.xlu2 %v2292_v38, %s5926_s27 }
 0x395   : > { %v6382_v4 = vld.sshfl [vmem:[#allocation1 + $0x28] sm:$0xff pattern:$0x75316420]  ;;  %v6384_v5 = vld.sshfl [vmem:[#allocation1 + $0x20] sm:$0xff pattern:$0x75316420] }
 0x396   : > { %3314 = vst [vmem:[#allocation1 + $0x20] ss:$2 sm:$0xff] %v6314_v28 }
 0x397   : > { %v6388_v9 = vld.sshfl [vmem:[#allocation1 + $0x10] sm:$0xff pattern:$0x75316420]  ;;  %v6392_v12 = vld.sshfl [vmem:[#allocation1 + $0x18] sm:$0xff pattern:$0x75316420] }
 0x398   : > { %4003 = vst [vmem:[#allocation1 + $0x10] ss:$2 sm:$0xff] %v6297_v18 }
 0x399   : > { %v2297_v6 = vld.sshfl [vmem:[#allocation1 + $0x38] sm:$0xff pattern:$0x75316420]  ;;  %v2296_v7 = vld.sshfl [vmem:[#allocation1 + $0x30] sm:$0xff pattern:$0x75316420] }
 0x39a   : > { %2695 = vst [vmem:[#allocation1 + $0x30] ss:$2 sm:$0xff] %v6349_v49 }
 0x39b   : > { %v2291_v10 = vld.sshfl [vmem:[#allocation1 + $0x8] sm:$0xff pattern:$0x75316420]  ;;  %v2290_v11 = vld.sshfl [vmem:[#allocation1] sm:$0xff pattern:$0x75316420] }
 0x39c   : > { %2310 = vrot.lane.b32.xlu2 %v2295_v50, %s5926_s27  ;;  %2302 = vrot.lane.b32.xlu1 %v2291_v10, %s5926_s27  ;;  %2298 = vst [vmem:[#allocation1] ss:$2 sm:$0xff] %v2272_v8 }
 0x39d   : > { %2300 = vrot.lane.b32.xlu0 %v2290_v11, %s5926_s27  ;;  %v6395_v13 = vld.sshfl [vmem:[#allocation1 + $0x28] sm:$0xff pattern:$0x75316420]  ;;  %v6397_v14 = vld.sshfl [vmem:[#allocation1 + $0x20] sm:$0xff pattern:$0x75316420] }
 0x39e   : > { %3702 = vst [vmem:[#allocation1 + $0x20] ss:$2 sm:$0xff] %v6314_v28 }
 0x39f   : > { %v6411_v21 = vld.sshfl [vmem:[#allocation1 + $0x10] sm:$0xff pattern:$0x75316420]  ;;  %v6414_v22 = vld.sshfl [vmem:[#allocation1 + $0x18] sm:$0xff pattern:$0x75316420] }
 0x3a0   : > { %4321 = vst [vmem:[#allocation1 + $0x10] ss:$2 sm:$0xff] %v6297_v18 }
 0x3a1   : > { %v2703_v15 = vld.sshfl [vmem:[#allocation1 + $0x38] sm:$0xff pattern:$0x75316420]  ;;  %v2702_v16 = vld.sshfl [vmem:[#allocation1 + $0x30] sm:$0xff pattern:$0x75316420] }
 0x3a2   : > { %2998 = vst [vmem:[#allocation1 + $0x30] ss:$2 sm:$0xff] %v6349_v49 }
 0x3a3   : > { %v2299_v17 = vld.sshfl [vmem:[#allocation1] sm:$0xff pattern:$0x75316420] }
 0x3a4   : > { %2308 = vrot.lane.b32.xlu1 %v2294_v51, %s5926_s27  ;;  %2316 = vrot.lane.b32.xlu2 %v2299_v17, %s5926_s27  ;;  %2689 = vst [vmem:[#allocation1] ss:$2 sm:$0xff] %v6279_v1 }
 0x3a5   : > { %2306 = vrot.lane.b32.xlu0 %v6330_v40, %s5926_s27  ;;  %v6407_v19 = vld.sshfl [vmem:[#allocation1 + $0x28] sm:$0xff pattern:$0x75316420]  ;;  %v6409_v20 = vld.sshfl [vmem:[#allocation1 + $0x20] sm:$0xff pattern:$0x75316420] }
 0x3a6   : > { %4005 = vst [vmem:[#allocation1 + $0x20] ss:$2 sm:$0xff] %v6314_v28  ;;  %v6453_v40 = vld [vmem:[%s8609_s5 + $0x60] sm:$0xff] }
 0x3a9   : > { %v6416_v23 = vld.sshfl [vmem:[#allocation1 + $0x38] sm:$0xff pattern:$0x75316420]  ;;  %v6418_v24 = vld.sshfl [vmem:[#allocation1 + $0x30] sm:$0xff pattern:$0x75316420] }
 0x3aa   : > { %3316 = vst [vmem:[#allocation1 + $0x30] ss:$2 sm:$0xff] %v6349_v49 }
 0x3ab   : > { %v2697_v0 = vld.sshfl [vmem:[#allocation1 + $0x8] sm:$0xff pattern:$0x75316420]  ;;  %v2696_v26 = vld.sshfl [vmem:[#allocation1] sm:$0xff pattern:$0x75316420] }
 0x3ac   : > { %2314 = vrot.lane.b32.xlu1 %v2297_v6, %s5926_s27  ;;  %2710 = vrot.lane.b32.xlu2 %v6344_v47, %s5916_s12  ;;  %2704 = vst [vmem:[#allocation1] ss:$2 sm:$0xff] %v2673_v25 }
 0x3ad   : > { %2312 = vrot.lane.b32.xlu0 %v2296_v7, %s5926_s27  ;;  %v6426_v27 = vld.sshfl [vmem:[#allocation1 + $0x28] sm:$0xff pattern:$0x75316420]  ;;  %v6428_v31 = vld.sshfl [vmem:[#allocation1 + $0x20] sm:$0xff pattern:$0x75316420] }
 0x3ae   : > { %4323 = vst [vmem:[#allocation1 + $0x20] ss:$2 sm:$0xff] %v6314_v28 }
 0x3b1   : > { %v6431_v32 = vld.sshfl [vmem:[#allocation1 + $0x38] sm:$0xff pattern:$0x75316420]  ;;  %v6433_v33 = vld.sshfl [vmem:[#allocation1 + $0x30] sm:$0xff pattern:$0x75316420] }
 0x3b2   : > { %3704 = vst [vmem:[#allocation1 + $0x30] ss:$2 sm:$0xff] %v6349_v49 }
 0x3b3   : > { %v2705_v18 = vld.sshfl [vmem:[#allocation1] sm:$0xff pattern:$0x75316420] }
 0x3b4   : > { %2716 = vrot.lane.b32.xlu2 %v2701_v58, %s5916_s12  ;;  %2708 = vrot.lane.b32.xlu1 %v2697_v0, %s5916_s12  ;;  %2992 = vst [vmem:[#allocation1] ss:$2 sm:$0xff] %v6279_v1 }
 0x3b5   : > { %2706 = vrot.lane.b32.xlu0 %v2696_v26, %s5916_s12  ;;  %v4331_v26 = vld.sshfl [vmem:[#allocation1 + $0x28] sm:$0xff pattern:$0x75316420] }
 0x3b9   : > { %v6440_v34 = vld.sshfl [vmem:[#allocation1 + $0x38] sm:$0xff pattern:$0x75316420]  ;;  %v6442_v35 = vld.sshfl [vmem:[#allocation1 + $0x30] sm:$0xff pattern:$0x75316420] }
 0x3ba   : > { %4007 = vst [vmem:[#allocation1 + $0x30] ss:$2 sm:$0xff] %v6349_v49 }
 0x3bb   : > { %v3000_v28 = vld.sshfl [vmem:[#allocation1 + $0x8] sm:$0xff pattern:$0x75316420]  ;;  %v2999_v36 = vld.sshfl [vmem:[#allocation1] sm:$0xff pattern:$0x75316420] }
 0x3bc   : > { %2714 = vrot.lane.b32.xlu1 %v6363_v59, %s5916_s12  ;;  %2722 = vrot.lane.b32.xlu2 %v2705_v18, %s5916_s12  ;;  %3007 = vst [vmem:[#allocation1] ss:$2 sm:$0xff] %v2673_v25 }
 0x3bd   : > { %2712 = vrot.lane.b32.xlu0 %v6346_v48, %s5916_s12  ;;  %v1710_v38 = vpop.permute.xlu2 %1709  ;;  %v6476_v48 = vld [vmem:[%s8609_s5 + $0x68] sm:$0xff] }
 0x3be   : > { %v1706_v37 = vpop.permute.xlu0 %1705  ;;  %v1708_v39 = vpop.permute.xlu1 %1707 }
 0x3bf   : > { %v1723_v41 = vsel %vm494_vm8, %v1706_v37, %v1708_v39  ;;  %v1724_v42 = vsel %vm494_vm8, %v1708_v39, %v1710_v38  ;;  %v4741_v37 = vld [vmem:[%s8610_s6 + $0x18] sm:$0xff] }
 0x3c0   : > { %5304 = vmatpush.msk.msra.mxu2 %vm1744_vm12, %v1723_v41  ;;  %5309 = vmatpush.msk.msra.mxu3 %vm1744_vm12, %v1724_v42  ;;  %v6751_v41 = vld [vmem:[%s8609_s5 + $0xc0] sm:$0xff] }
 0x3c1   : > { %v6459_v43 = vld.sshfl [vmem:[#allocation1 + $0x38] sm:$0xff pattern:$0x75316420]  ;;  %v6461_v46 = vld.sshfl [vmem:[#allocation1 + $0x30] sm:$0xff pattern:$0x75316420]  ;;  %5305 = vmatmul.msk.f32.vlgmr.msra.gmra.mxu2 %vm1731_vm13, %v6453_v40  ;;  %5310 = vmatmul.msk.f32.vlgmr.msra.gmra.mxu3 %vm1731_vm13, %v6453_v40 }
 0x3c2   : > { %4325 = vst [vmem:[#allocation1 + $0x30] ss:$2 sm:$0xff] %v6349_v49  ;;  %v3299_v49 = vld [vmem:[#allocation4 + $0x20] sm:$0xf] }
 0x3c3   : > { %v3008_v47 = vld.sshfl [vmem:[#allocation1] sm:$0xff pattern:$0x75316420] }
 0x3c4   : > { %2720 = vrot.lane.b32.xlu1 %v2703_v15, %s5916_s12  ;;  %3013 = vrot.lane.b32.xlu2 %v6353_v53, %s5920_s21  ;;  %3310 = vst [vmem:[#allocation1] ss:$2 sm:$0xff] %v6279_v1 }
 0x3c5   : > { %2718 = vrot.lane.b32.xlu0 %v2702_v16, %s5916_s12 }
 0x3c9   : > { %5306 = vmatmul.msk.f32.gmra.mxu2 %vm1731_vm13, %v6476_v48  ;;  %5311 = vmatmul.msk.f32.gmra.mxu3 %vm1731_vm13, %v6476_v48 }
 0x3cb   : > { %v3318_v50 = vld.sshfl [vmem:[#allocation1 + $0x8] sm:$0xff pattern:$0x75316420]  ;;  %v3317_v51 = vld.sshfl [vmem:[#allocation1] sm:$0xff pattern:$0x75316420] }
 0x3cc   : > { %3019 = vrot.lane.b32.xlu2 %v6382_v4, %s5920_s21  ;;  %3011 = vrot.lane.b32.xlu1 %v3000_v28, %s5920_s21  ;;  %3325 = vst [vmem:[#allocation1] ss:$2 sm:$0xff] %v3299_v49  ;;  %v6773_v49 = vld [vmem:[%s8609_s5 + $0xc8] sm:$0xff] }
 0x3cd   : > { %3009 = vrot.lane.b32.xlu0 %v2999_v36, %s5920_s21 }
 0x3d1   : > { %5307 = vmatmul.msk.f32.gmra.mxu2 %vm1731_vm13, %v6489_v52  ;;  %5312 = vmatmul.msk.f32.gmra.mxu3 %vm1731_vm13, %v6489_v52 }
 0x3d3   : > { %v3326_v53 = vld.sshfl [vmem:[#allocation1] sm:$0xff pattern:$0x75316420] }
 0x3d4   : > { %3017 = vrot.lane.b32.xlu1 %v6384_v5, %s5920_s21  ;;  %3025 = vrot.lane.b32.xlu2 %v3008_v47, %s5920_s21  ;;  %3698 = vst [vmem:[#allocation1] ss:$2 sm:$0xff] %v6279_v1  ;;  %v1716_v5 = vpop.permute.xlu2 %1715  ;;  %v4738_v47 = vld [vmem:[%s8610_s6] sm:$0xff] }
 0x3d5   : > { %3015 = vrot.lane.b32.xlu0 %v6355_v54, %s5920_s21  ;;  %v3682_v54 = vld [vmem:[#allocation4 + $0x20] sm:$0xf] }
 0x3d6   : > { %v1712_v55 = vpop.permute.xlu0 %1711 }
 0x3d7   : > { %v1725_v56 = vsel %vm494_vm8, %v1710_v38, %v1712_v55 }
 0x3d8   : > { %5314 = vmatpush.msk.msrb.mxu0 %vm1744_vm12, %v1725_v56 }
 0x3d9   : > { %5315 = vmatmul.msk.f32.vlgmr.msrb.gmra.mxu0 %vm1731_vm13, %v6453_v40  ;;  %5308 = vmatmul.msk.f32.gmra.mxu2 %vm1731_vm13, %v6505_v57 }
 0x3da   : > { %5313 = vmatmul.msk.f32.gmra.mxu3 %vm1731_vm13, %v6505_v57 }
 0x3db   : > { %v3706_v58 = vld.sshfl [vmem:[#allocation1 + $0x8] sm:$0xff pattern:$0x75316420]  ;;  %v3705_v59 = vld.sshfl [vmem:[#allocation1] sm:$0xff pattern:$0x75316420] }
 0x3dc   : > { %3023 = vrot.lane.b32.xlu1 %v6416_v23, %s5920_s21  ;;  %3331 = vrot.lane.b32.xlu2 %v6366_v60, %s5934_s28  ;;  %3713 = vst [vmem:[#allocation1] ss:$2 sm:$0xff] %v3682_v54 }
 0x3dd   : > { %3021 = vrot.lane.b32.xlu0 %v6418_v24, %s5920_s21  ;;  %s5186_s21 = scalar_lea.hbm %s8614_s10, %s5710_s13  ;;  %s5870_s13 = scalar_lea.hbm %s8614_s10, 16 }
 0x3de   : > { %s5190_s29 = sshll.u32 %s5186_s21, 4  ;;  %s5191_s29 = int_to_ptr.hbm [resolvable:$true] %s5190_s29 }
 0x3df   : > { %s5864_s30 = sshra.s32 %s5191_s29, 4  ;;  %s5865_s30 = int_to_ptr.hbm [resolvable:$true] %s5864_s30 }
 0x3e0   : > { %s5866_s12 = scalar_lea.hbm %s5865_s30, 8  ;;  %p5871_p0 = scmp.lt.s32.totalorder %s5865_s30, %s8614_s10 }
 0x3e1   : > { %5316 = vmatmul.msk.f32.gmra.mxu0 %vm1731_vm13, %v6476_v48  ;;  %p5867_p11 = scmp.ne.s32.totalorder %s5865_s30, %s5866_s12  ;;  %p5872_p1 = scmp.lt.s32.totalorder %s5870_s13, %s5866_s12 }
 0x3e3   : > { %v3714_v4 = vld.sshfl [vmem:[#allocation1] sm:$0xff pattern:$0x75316420]  ;;  %p5868_p12 = pnand %p5867_p11, %p6032_p5  ;;  %p5873_p2 = por %p5872_p1, %p5871_p0 }
 0x3e4   : > { %3337 = vrot.lane.b32.xlu2 %v6395_v13, %s5934_s28  ;;  %3329 = vrot.lane.b32.xlu1 %v3318_v50, %s5934_s28  ;;  %4001 = vst [vmem:[#allocation1] ss:$2 sm:$0xff] %v6279_v1 }
 0x3e5   : > { %3327 = vrot.lane.b32.xlu0 %v3317_v51, %s5934_s28  ;;  %v1714_v6 = vpop.permute.xlu1 %1713  ;;  %v6788_v51 = vld [vmem:[%s8609_s5 + $0xd0] sm:$0xff]  ;;  %p5869_p13 = pneg %p5868_p12 }
 0x3e6   : > { %v1726_v60 = vsel %vm494_vm8, %v1712_v55, %v1714_v6  ;;  %v1727_v7 = vsel %vm494_vm8, %v1714_v6, %v1716_v5 }
 0x3e7   : > { %5319 = vmatpush.msk.msrb.mxu1 %vm1744_vm12, %v1726_v60  ;;  %5324 = vmatpush.msk.msrb.mxu2 %vm1744_vm12, %v1727_v7  ;;  %p5874_p3 = pnand %p5873_p2, %p5869_p13 }
 0x3e8   : > { %5320 = vmatmul.msk.f32.vlgmr.msrb.gmra.mxu1 %vm1731_vm13, %v6453_v40  ;;  %5325 = vmatmul.msk.f32.vlgmr.msrb.gmra.mxu2 %vm1731_vm13, %v6453_v40 }
 0x3e9   : > { %5344 = vmatpush.msk.msra.mxu2 %vm1744_vm12, %v6376_v2  ;;  %5317 = vmatmul.msk.f32.gmra.mxu0 %vm1731_vm13, %v6489_v52  ;;  %v1722_v2 = vpop.permute.xlu2 %1721 }
 0x3eb   : > { %5364 = vmatpush.msk.msrb.mxu2 %vm1744_vm12, %v6338_v44  ;;  %v6541_v8 = vld.sshfl [vmem:[#allocation1 + $0x8] sm:$0xff pattern:$0x75316420]  ;;  %v6543_v10 = vld.sshfl [vmem:[#allocation1] sm:$0xff pattern:$0x75316420] }
 0x3ec   : > { %3335 = vrot.lane.b32.xlu1 %v6397_v14, %s5934_s28  ;;  %3343 = vrot.lane.b32.xlu2 %v3326_v53, %s5934_s28  ;;  %4016 = vst [vmem:[#allocation1] ss:$2 sm:$0xff] %v3682_v54 }
 0x3ed   : > { %3333 = vrot.lane.b32.xlu0 %v6368_v61, %s5934_s28  ;;  %v4308_v61 = vld [vmem:[#allocation4 + $0x20] sm:$0xf] }
 0x3f0   : > { %5321 = vmatmul.msk.f32.gmra.mxu1 %vm1731_vm13, %v6476_v48  ;;  %5326 = vmatmul.msk.f32.gmra.mxu2 %vm1731_vm13, %v6476_v48 }
 0x3f1   : > { %5318 = vmatmul.msk.f32.gmra.mxu0 %vm1731_vm13, %v6505_v57  ;;  %v2305_v17 = vpop.permute.xlu2 %2304 }
 0x3f3   : > { %v6556_v44 = vld.sshfl [vmem:[#allocation1] sm:$0xff pattern:$0x75316420] }
 0x3f4   : > { %3341 = vrot.lane.b32.xlu1 %v6431_v32, %s5934_s28  ;;  %3719 = vrot.lane.b32.xlu2 %v6388_v9, %s5922_s26  ;;  %4319 = vst [vmem:[#allocation1] ss:$2 sm:$0xff] %v6279_v1  ;;  %v4329_v32 = vld.sshfl [vmem:[#allocation1 + $0x18] sm:$0xff pattern:$0x75316420] }
 0x3f5   : > { %3339 = vrot.lane.b32.xlu0 %v6433_v33, %s5934_s28  ;;  %v4333_v33 = vld.sshfl [vmem:[#allocation1 + $0x38] sm:$0xff pattern:$0x75316420] }
 0x3f8   : > { %5322 = vmatmul.msk.f32.gmra.mxu1 %vm1731_vm13, %v6489_v52  ;;  %5327 = vmatmul.msk.f32.gmra.mxu2 %vm1731_vm13, %v6489_v52 }
 0x3f9   : > { %v2311_v24 = vpop.permute.xlu2 %2310 }
 0x3fb   : > { %v6569_v14 = vld.sshfl [vmem:[#allocation1 + $0x8] sm:$0xff pattern:$0x75316420]  ;;  %v6571_v15 = vld.sshfl [vmem:[#allocation1] sm:$0xff pattern:$0x75316420] }
 0x3fc   : > { %v1718_v11 = vpop.permute.xlu0 %1717  ;;  %v1720_v13 = vpop.permute.xlu1 %1719  ;;  %3725 = vrot.lane.b32.xlu2 %v6407_v19, %s5922_s26  ;;  %3717 = vrot.lane.b32.xlu1 %v3706_v58, %s5922_s26  ;;  %4334 = vst [vmem:[#allocation1] ss:$2 sm:$0xff] %v4308_v61 }
 0x3fd   : > { %v1728_v1 = vsel %vm494_vm8, %v1716_v5, %v1718_v11  ;;  %v1729_v9 = vsel %vm494_vm8, %v1718_v11, %v1720_v13  ;;  %v1730_v16 = vsel %vm494_vm8, %v1720_v13, %v1722_v2  ;;  %3715 = vrot.lane.b32.xlu0 %v3705_v59, %s5922_s26  ;;  %vm2318_vm8 = vcmask 523264   ;;  %v6809_v59 = vld [vmem:[%s8609_s5 + $0xd8] sm:$0xff] }
 0x3fe   : > { %5329 = vmatpush.msk.msrb.mxu3 %vm1744_vm12, %v1728_v1  ;;  %5334 = vmatpush.msk.msra.mxu0 %vm1744_vm12, %v1729_v9 }
 0x3ff   : > { %5339 = vmatpush.msk.msra.mxu1 %vm1744_vm12, %v1730_v16  ;;  %5330 = vmatmul.msk.f32.vlgmr.msrb.gmra.mxu3 %vm1731_vm13, %v6453_v40 }
 0x400   : > { %5335 = vmatmul.msk.f32.vlgmr.msra.gmra.mxu0 %vm1731_vm13, %v6453_v40  ;;  %5349 = vmatpush.msk.msra.mxu3 %vm1744_vm12, %v6378_v3  ;;  %v6655_v3 = vld [vmem:[%s8609_s5 + $0x10] sm:$0xff] }
 0x401   : > { %5354 = vmatpush.msk.msrb.mxu0 %vm1744_vm12, %v6317_v29  ;;  %5359 = vmatpush.msk.msrb.mxu1 %vm1744_vm12, %v6319_v30  ;;  %v6609_v29 = vld [vmem:[%s8609_s5] sm:$0xff]  ;;  %v2317_v42 = vpop.permute.xlu2 %2316 }
 0x402   : > { %5328 = vmatmul.msk.f32.gmra.mxu2 %vm1731_vm13, %v6505_v57  ;;  %5323 = vmatmul.msk.f32.gmra.mxu1 %vm1731_vm13, %v6505_v57 }
 0x403   : > { %5369 = vmatpush.msk.msrb.mxu3 %vm1744_vm12, %v6340_v45  ;;  %5374 = vmatpush.msk.msra.mxu0 %vm1744_vm12, %v6370_v62  ;;  %v6634_v62 = vld [vmem:[%s8609_s5 + $0x8] sm:$0xff] }
 0x404   : > { %3723 = vrot.lane.b32.xlu1 %v6409_v20, %s5922_s26  ;;  %3731 = vrot.lane.b32.xlu2 %v3714_v4, %s5922_s26 }
 0x405   : > { %3721 = vrot.lane.b32.xlu0 %v6392_v12, %s5922_s26 }
 0x407   : > { %5331 = vmatmul.msk.f32.gmra.mxu3 %vm1731_vm13, %v6476_v48 }
 0x408   : > { %5336 = vmatmul.msk.f32.gmra.mxu0 %vm1731_vm13, %v6476_v48 }
 0x409   : > { %v2711_v56 = vpop.permute.xlu2 %2710 }
 0x40a   : > { %5345 = vmatmul.msk.f32.vlgmr.msra.gmra.mxu2 %vm1731_vm13, %v6609_v29  ;;  %5340 = vmatmul.msk.f32.vlgmr.msra.gmra.mxu1 %vm1731_vm13, %v6453_v40 }
 0x40b   : > { %5379 = vmatpush.msk.msra.mxu1 %vm1744_vm12, %v6372_v63 }
 0x40c   : > { %3729 = vrot.lane.b32.xlu1 %v6440_v34, %s5922_s26  ;;  %4022 = vrot.lane.b32.xlu2 %v6411_v21, %s5919_s19  ;;  %v6676_v21 = vld [vmem:[%s8609_s5 + $0x18] sm:$0xff] }
 0x40d   : > { %3727 = vrot.lane.b32.xlu0 %v6442_v35, %s5922_s26  ;;  %v4332_v35 = vld.sshfl [vmem:[#allocation1 + $0x30] sm:$0xff pattern:$0x75316420] }
 0x40e   : > { %v2303_v30 = vpop.permute.xlu1 %2302 }
 0x40f   : > { %v2301_v45 = vpop.permute.xlu0 %2300  ;;  %5332 = vmatmul.msk.f32.gmra.mxu3 %vm1731_vm13, %v6489_v52  ;;  %v2320_v19 = vsel %vm2318_vm8, %v2303_v30, %v2305_v17 }
 0x410   : > { %5337 = vmatmul.msk.f32.gmra.mxu0 %vm1731_vm13, %v6489_v52  ;;  %v2319_v63 = vsel %vm2318_vm8, %v2301_v45, %v2303_v30 }
 0x411   : > { %5388 = vmatpush.msk.msra.mxu2 %vm1744_vm12, %v2319_v63 }
 0x412   : > { %5341 = vmatmul.msk.f32.gmra.mxu1 %vm1731_vm13, %v6476_v48  ;;  %5346 = vmatmul.msk.f32.gmra.mxu2 %vm1731_vm13, %v6634_v62 }
 0x414   : > { %4028 = vrot.lane.b32.xlu2 %v6426_v27, %s5919_s19  ;;  %4020 = vrot.lane.b32.xlu1 %v6541_v8, %s5919_s19  ;;  %v4330_v27 = vld.sshfl [vmem:[#allocation1 + $0x20] sm:$0xff pattern:$0x75316420]  ;;  %v2717_v8 = vpop.permute.xlu2 %2716 }
 0x415   : > { %4018 = vrot.lane.b32.xlu0 %v6543_v10, %s5919_s19 }
 0x416   : > { %v2309_v23 = vpop.permute.xlu1 %2308 }
 0x417   : > { %5333 = vmatmul.msk.f32.gmra.mxu3 %vm1731_vm13, %v6505_v57  ;;  %v2307_v12 = vpop.permute.xlu0 %2306  ;;  %v2323_v0 = vsel %vm2318_vm8, %v2309_v23, %v2311_v24 }
 0x418   : > { %5338 = vmatmul.msk.f32.gmra.mxu0 %vm1731_vm13, %v6505_v57  ;;  %v2321_v20 = vsel %vm2318_vm8, %v2305_v17, %v2307_v12  ;;  %v2322_v25 = vsel %vm2318_vm8, %v2307_v12, %v2309_v23 }
 0x41a   : > { %5342 = vmatmul.msk.f32.gmra.mxu1 %vm1731_vm13, %v6489_v52  ;;  %5347 = vmatmul.msk.f32.gmra.mxu2 %vm1731_vm13, %v6655_v3 }
 0x41c   : > { %4026 = vrot.lane.b32.xlu1 %v6428_v31, %s5919_s19  ;;  %4034 = vrot.lane.b32.xlu2 %v6556_v44, %s5919_s19  ;;  %v4335_v31 = vld.sshfl [vmem:[#allocation1] sm:$0xff pattern:$0x75316420]  ;;  %v2723_v23 = vpop.permute.xlu2 %2722 }
 0x41d   : > { %4024 = vrot.lane.b32.xlu0 %v6414_v22, %s5919_s19  ;;  %v4328_v22 = vld.sshfl [vmem:[#allocation1 + $0x10] sm:$0xff pattern:$0x75316420] }
 0x41e   : > { %v2315_v34 = vpop.permute.xlu1 %2314 }
 0x41f   : > { %5350 = vmatmul.msk.f32.vlgmr.msra.gmra.mxu3 %vm1731_vm13, %v6609_v29  ;;  %v2313_v18 = vpop.permute.xlu0 %2312 }
 0x420   : > { %5355 = vmatmul.msk.f32.vlgmr.msrb.gmra.mxu0 %vm1731_vm13, %v6609_v29  ;;  %5393 = vmatpush.msk.msra.mxu3 %vm1744_vm12, %v2320_v19  ;;  %v2324_v28 = vsel %vm2318_vm8, %v2311_v24, %v2313_v18  ;;  %v2325_v36 = vsel %vm2318_vm8, %v2313_v18, %v2315_v34 }
 0x421   : > { %5398 = vmatpush.msk.msrb.mxu0 %vm1744_vm12, %v2321_v20 }
 0x422   : > { %5343 = vmatmul.msk.f32.gmra.mxu1 %vm1731_vm13, %v6505_v57  ;;  %5348 = vmatmul.msk.f32.gmra.mxu2 %vm1731_vm13, %v6676_v21 }
 0x424   : > { %4032 = vrot.lane.b32.xlu1 %v6459_v43, %s5919_s19  ;;  %4340 = vrot.lane.b32.xlu2 %v4328_v22, %s5935_s11  ;;  %v2326_v43 = vsel %vm2318_vm8, %v2315_v34, %v2317_v42  ;;  %v6900_v22 = vld [vmem:[%s8609_s5 + $0x80] sm:$0xff] }
 0x425   : > { %4030 = vrot.lane.b32.xlu0 %v6461_v46, %s5919_s19 }
 0x426   : > { %v2709_v40 = vpop.permute.xlu1 %2708 }
 0x427   : > { %5351 = vmatmul.msk.f32.gmra.mxu3 %vm1731_vm13, %v6634_v62  ;;  %v2707_v39 = vpop.permute.xlu0 %2706  ;;  %v2725_v54 = vsel %vm672_vm5, %v2709_v40, %v2711_v56 }
 0x428   : > { %5356 = vmatmul.msk.f32.gmra.mxu0 %vm1731_vm13, %v6634_v62  ;;  %v2724_v46 = vsel %vm672_vm5, %v2707_v39, %v2709_v40 }
 0x42a   : > { %5360 = vmatmul.msk.f32.vlgmr.msrb.gmra.mxu1 %vm1731_vm13, %v6609_v29  ;;  %5365 = vmatmul.msk.f32.vlgmr.msrb.gmra.mxu2 %vm1731_vm13, %v6609_v29 }
 0x42b   : > { %5403 = vmatpush.msk.msrb.mxu1 %vm1744_vm12, %v2322_v25  ;;  %5408 = vmatpush.msk.msrb.mxu2 %vm1744_vm12, %v2323_v0 }
 0x42c   : > { %4346 = vrot.lane.b32.xlu2 %v4331_v26, %s5935_s11  ;;  %4338 = vrot.lane.b32.xlu1 %v6569_v14, %s5935_s11 }
 0x42d   : > { %4336 = vrot.lane.b32.xlu0 %v6571_v15, %s5935_s11 }
 0x42e   : > { %v2715_v60 = vpop.permute.xlu1 %2714 }
 0x42f   : > { %5352 = vmatmul.msk.f32.gmra.mxu3 %vm1731_vm13, %v6655_v3  ;;  %v2713_v55 = vpop.permute.xlu0 %2712  ;;  %v2728_v44 = vsel %vm672_vm5, %v2715_v60, %v2717_v8 }
 0x430   : > { %5357 = vmatmul.msk.f32.gmra.mxu0 %vm1731_vm13, %v6655_v3  ;;  %v2726_v58 = vsel %vm672_vm5, %v2711_v56, %v2713_v55  ;;  %v2727_v10 = vsel %vm672_vm5, %v2713_v55, %v2715_v60 }
 0x432   : > { %5361 = vmatmul.msk.f32.gmra.mxu1 %vm1731_vm13, %v6634_v62  ;;  %5366 = vmatmul.msk.f32.gmra.mxu2 %vm1731_vm13, %v6634_v62 }
 0x434   : > { %4344 = vrot.lane.b32.xlu1 %v4330_v27, %s5935_s11  ;;  %4352 = vrot.lane.b32.xlu2 %v4335_v31, %s5935_s11 }
 0x435   : > { %4342 = vrot.lane.b32.xlu0 %v4329_v32, %s5935_s11  ;;  %v6925_v32 = vld [vmem:[%s8609_s5 + $0x88] sm:$0xff] }
 0x436   : > { %v2721_v9 = vpop.permute.xlu1 %2720 }
 0x437   : > { %5353 = vmatmul.msk.f32.gmra.mxu3 %vm1731_vm13, %v6676_v21  ;;  %v2731_v24 = vsel %vm672_vm5, %v2721_v9, %v2723_v23 }
 0x438   : > { %5358 = vmatmul.msk.f32.gmra.mxu0 %vm1731_vm13, %v6676_v21 }
 0x43a   : > { %5362 = vmatmul.msk.f32.gmra.mxu1 %vm1731_vm13, %v6655_v3  ;;  %5367 = vmatmul.msk.f32.gmra.mxu2 %vm1731_vm13, %v6655_v3 }
 0x43c   : > { %4350 = vrot.lane.b32.xlu1 %v4333_v33, %s5935_s11 }
 0x43d   : > { %4348 = vrot.lane.b32.xlu0 %v4332_v35, %s5935_s11  ;;  %s351_s11 = sand.u32 1, %s5904_s16  }
 0x43e   : > { %v3012_v19 = vpop.permute.xlu1 %3011  ;;  %s8554_s19 = sshll.u32 %s351_s11, 3  ;;  %s5176_s26 = scalar_lea.sflag [#allocation7], %s351_s11 }
 0x43f   : > { %5370 = vmatmul.msk.f32.vlgmr.msrb.gmra.mxu3 %vm1731_vm13, %v6609_v29  ;;  %s353_s22 = scalar_lea.vmem [#allocation6], %s8554_s19 }
 0x440   : > { %5375 = vmatmul.msk.f32.vlgmr.msra.gmra.mxu0 %vm1731_vm13, %v6609_v29  ;;  %5413 = vmatpush.msk.msrb.mxu3 %vm1744_vm12, %v2324_v28  ;;  %v6946_v28 = vld [vmem:[%s8609_s5 + $0x90] sm:$0xff]  ;;  %s5188_s27 = sshll.u32 %s353_s22, 4  ;;  %s5189_s27 = int_to_ptr.vmem [resolvable:$true] %s5188_s27 }
 0x441   : > { %5418 = vmatpush.msk.msra.mxu0 %vm1744_vm12, %v2325_v36 }
 0x442   : > { %5363 = vmatmul.msk.f32.gmra.mxu1 %vm1731_vm13, %v6676_v21  ;;  %5368 = vmatmul.msk.f32.gmra.mxu2 %vm1731_vm13, %v6676_v21 }
 0x444   : > { %v6742_v38 = vpop.f32.mrf.mxu2  ;;  %v6796_v53 = vpop.f32.mrf.mxu3 }
 0x445   : > { %4759 = vperm.xlu0 %5815, %v4741_v37  }
 0x447   : > { %5371 = vmatmul.msk.f32.gmra.mxu3 %vm1731_vm13, %v6634_v62 }
 0x448   : > { %5376 = vmatmul.msk.f32.gmra.mxu0 %vm1731_vm13, %v6634_v62 }
 0x44a   : > { %5380 = vmatmul.msk.f32.vlgmr.msra.gmra.mxu1 %vm1731_vm13, %v6609_v29  ;;  %5389 = vmatmul.msk.f32.vlgmr.msra.gmra.mxu2 %vm1731_vm13, %v6751_v41  ;;  %v2719_v29 = vpop.permute.xlu0 %2718 }
 0x44b   : > { %5423 = vmatpush.msk.msra.mxu1 %vm1744_vm12, %v2326_v43  ;;  %5436 = vmatpush.msk.msra.mxu2 %vm1744_vm12, %v2724_v46  ;;  %v2729_v45 = vsel %vm672_vm5, %v2717_v8, %v2719_v29 }
 0x44c   : > { %v6764_v48 = vpop.f32.mrf.mxu2  ;;  %v6819_v5 = vpop.f32.mrf.mxu3 }
 0x44d   : > { %4744 = vperm.xlu0 %5815, %v4738_v47   ;;  %v6969_v47 = vld [vmem:[%s8609_s5 + $0x98] sm:$0xff] }
 0x44f   : > { %5372 = vmatmul.msk.f32.gmra.mxu3 %vm1731_vm13, %v6655_v3 }
 0x450   : > { %5377 = vmatmul.msk.f32.gmra.mxu0 %vm1731_vm13, %v6655_v3 }
 0x452   : > { %5381 = vmatmul.msk.f32.gmra.mxu1 %vm1731_vm13, %v6634_v62  ;;  %5390 = vmatmul.msk.f32.gmra.mxu2 %vm1731_vm13, %v6773_v49  ;;  %v2730_v62 = vsel %vm672_vm5, %v2719_v29, %v2721_v9  ;;  %v3010_v20 = vpop.permute.xlu0 %3009  ;;  %vm3345_vm5 = vcmask 515072  }
 0x453   : > { %v3027_v25 = vsel %vm616_vm9, %v3010_v20, %v3012_v19 }
 0x454   : > { %v6790_v52 = vpop.f32.mrf.mxu2  ;;  %v6841_v11 = vpop.f32.mrf.mxu3 }
 0x456   : > { %v6779_v50 = vpop.f32.mrf.mxu0 }
 0x457   : > { %8619 = vst [vmem:[#allocation9_spill] sm:$0xff] %v6779_v50  ;;  %5373 = vmatmul.msk.f32.gmra.mxu3 %vm1731_vm13, %v6676_v21 }
 0x458   : > { %5378 = vmatmul.msk.f32.gmra.mxu0 %vm1731_vm13, %v6676_v21 }
 0x45a   : > { %5382 = vmatmul.msk.f32.gmra.mxu1 %vm1731_vm13, %v6655_v3  ;;  %5391 = vmatmul.msk.f32.gmra.mxu2 %vm1731_vm13, %v6788_v51  ;;  %v3016_v37 = vpop.permute.xlu0 %3015 }
 0x45c   : > { %v6813_v4 = vpop.f32.mrf.mxu2 }
 0x45d   : > { %v6861_v1 = vpop.f32.mrf.mxu3 }
 0x45e   : > { %v6798_v57 = vpop.f32.mrf.mxu0 }
 0x45f   : > { %5394 = vmatmul.msk.f32.vlgmr.msra.gmra.mxu3 %vm1731_vm13, %v6751_v41 }
 0x460   : > { %5399 = vmatmul.msk.f32.vlgmr.msrb.gmra.mxu0 %vm1731_vm13, %v6751_v41  ;;  %5441 = vmatpush.msk.msra.mxu3 %vm1744_vm12, %v2725_v54  ;;  %v3018_v54 = vpop.permute.xlu1 %3017 }
 0x461   : > { %5446 = vmatpush.msk.msrb.mxu0 %vm1744_vm12, %v2726_v58  ;;  %v3030_v60 = vsel %vm616_vm9, %v3016_v37, %v3018_v54 }
 0x462   : > { %5383 = vmatmul.msk.f32.gmra.mxu1 %vm1731_vm13, %v6676_v21  ;;  %5392 = vmatmul.msk.f32.gmra.mxu2 %vm1731_vm13, %v6809_v59 }
 0x465   : > { %v6821_v6 = vpop.f32.mrf.mxu1 }
 0x466   : > { %v6827_v7 = vpop.f32.mrf.mxu0 }
 0x467   : > { %5395 = vmatmul.msk.f32.gmra.mxu3 %vm1731_vm13, %v6773_v49 }
 0x468   : > { %5400 = vmatmul.msk.f32.gmra.mxu0 %vm1731_vm13, %v6773_v49 }
 0x46a   : > { %5404 = vmatmul.msk.f32.vlgmr.msrb.gmra.mxu1 %vm1731_vm13, %v6751_v41  ;;  %5409 = vmatmul.msk.f32.vlgmr.msrb.gmra.mxu2 %vm1731_vm13, %v6751_v41 }
 0x46b   : > { %5451 = vmatpush.msk.msrb.mxu1 %vm1744_vm12, %v2727_v10  ;;  %5456 = vmatpush.msk.msrb.mxu2 %vm1744_vm12, %v2728_v44  ;;  %v6837_v61 = vpop.f32.mrf.mxu2 }
 0x46d   : > { %v6839_v2 = vpop.f32.mrf.mxu1 }
 0x46e   : > { %v6851_v13 = vpop.f32.mrf.mxu0 }
 0x46f   : > { %5396 = vmatmul.msk.f32.gmra.mxu3 %vm1731_vm13, %v6788_v51 }
 0x470   : > { %5401 = vmatmul.msk.f32.gmra.mxu0 %vm1731_vm13, %v6788_v51 }
 0x472   : > { %5405 = vmatmul.msk.f32.gmra.mxu1 %vm1731_vm13, %v6773_v49  ;;  %5410 = vmatmul.msk.f32.gmra.mxu2 %vm1731_vm13, %v6773_v49 }
 0x473   : > { %v6853_v14 = vpop.f32.mrf.mxu2 }
 0x475   : > { %v6855_v15 = vpop.f32.mrf.mxu1 }
 0x477   : > { %5397 = vmatmul.msk.f32.gmra.mxu3 %vm1731_vm13, %v6809_v59 }
 0x478   : > { %5402 = vmatmul.msk.f32.gmra.mxu0 %vm1731_vm13, %v6809_v59 }
 0x47a   : > { %5406 = vmatmul.msk.f32.gmra.mxu1 %vm1731_vm13, %v6788_v51  ;;  %5411 = vmatmul.msk.f32.gmra.mxu2 %vm1731_vm13, %v6788_v51 }
 0x47b   : > { %v6867_v16 = vpop.f32.mrf.mxu2 }
 0x47d   : > { %v6869_v30 = vpop.f32.mrf.mxu0 }
 0x47e   : > { %8620 = vst [vmem:[#allocation10_spill] sm:$0xff] %v6869_v30 }
 0x47f   : > { %v6873_v63 = vpop.f32.mrf.mxu1  ;;  %5414 = vmatmul.msk.f32.vlgmr.msrb.gmra.mxu3 %vm1731_vm13, %v6751_v41 }
 0x480   : > { %8621 = vst [vmem:[#allocation11_spill] sm:$0xff] %v6873_v63  ;;  %5419 = vmatmul.msk.f32.vlgmr.msra.gmra.mxu0 %vm1731_vm13, %v6751_v41  ;;  %5461 = vmatpush.msk.msrb.mxu3 %vm1744_vm12, %v2729_v45 }
 0x481   : > { %5466 = vmatpush.msk.msra.mxu0 %vm1744_vm12, %v2730_v62 }
 0x482   : > { %5407 = vmatmul.msk.f32.gmra.mxu1 %vm1731_vm13, %v6809_v59  ;;  %5412 = vmatmul.msk.f32.gmra.mxu2 %vm1731_vm13, %v6809_v59  ;;  %v6885_v3 = vpop.f32.mrf.mxu3 }
 0x485   : > { %v6887_v12 = vpop.f32.mrf.mxu2  ;;  %v6889_v17 = vpop.f32.mrf.mxu0 }
 0x486   : > { %8622 = vst [vmem:[#allocation12_spill] sm:$0xff] %v6889_v17 }
 0x487   : > { %v6891_v21 = vpop.f32.mrf.mxu1  ;;  %5415 = vmatmul.msk.f32.gmra.mxu3 %vm1731_vm13, %v6773_v49 }
 0x488   : > { %8623 = vst [vmem:[#allocation13_spill] sm:$0xff] %v6891_v21  ;;  %5420 = vmatmul.msk.f32.gmra.mxu0 %vm1731_vm13, %v6773_v49 }
 0x48a   : > { %5424 = vmatmul.msk.f32.vlgmr.msra.gmra.mxu1 %vm1731_vm13, %v6751_v41  ;;  %5437 = vmatmul.msk.f32.vlgmr.msra.gmra.mxu2 %vm1731_vm13, %v6900_v22  ;;  %v6908_v0 = vpop.f32.mrf.mxu3  ;;  %v3014_v41 = vpop.permute.xlu2 %3013 }
 0x48b   : > { %5471 = vmatpush.msk.msra.mxu1 %vm1744_vm12, %v2731_v24  ;;  %5476 = vmatpush.msk.msra.mxu2 %vm1744_vm12, %v3027_v25  ;;  %v3028_v42 = vsel %vm616_vm9, %v3012_v19, %v3014_v41  ;;  %v3029_v43 = vsel %vm616_vm9, %v3014_v41, %v3016_v37  ;;  %v3024_v24 = vpop.permute.xlu1 %3023 }
 0x48d   : > { %v6912_v26 = vpop.f32.mrf.mxu2  ;;  %v6914_v27 = vpop.f32.mrf.mxu0 }
 0x48e   : > { %8624 = vst [vmem:[#allocation14_spill] sm:$0xff] %v6914_v27 }
 0x48f   : > { %v6916_v31 = vpop.f32.mrf.mxu1  ;;  %5416 = vmatmul.msk.f32.gmra.mxu3 %vm1731_vm13, %v6788_v51 }
 0x490   : > { %8625 = vst [vmem:[#allocation15_spill] sm:$0xff] %v6916_v31  ;;  %5421 = vmatmul.msk.f32.gmra.mxu0 %vm1731_vm13, %v6788_v51 }
 0x492   : > { %5425 = vmatmul.msk.f32.gmra.mxu1 %vm1731_vm13, %v6773_v49  ;;  %5438 = vmatmul.msk.f32.gmra.mxu2 %vm1731_vm13, %v6925_v32  ;;  %v6931_v33 = vpop.f32.mrf.mxu3 }
 0x495   : > { %v6933_v18 = vpop.f32.mrf.mxu0  ;;  %v6935_v34 = vpop.f32.mrf.mxu2 }
 0x496   : > { %8626 = vst [vmem:[#allocation16_spill] sm:$0xff] %v6933_v18 }
 0x497   : > { %v6937_v35 = vpop.f32.mrf.mxu1  ;;  %5417 = vmatmul.msk.f32.gmra.mxu3 %vm1731_vm13, %v6809_v59 }
 0x498   : > { %8627 = vst [vmem:[#allocation17_spill] sm:$0xff] %v6937_v35  ;;  %5422 = vmatmul.msk.f32.gmra.mxu0 %vm1731_vm13, %v6809_v59 }
 0x49a   : > { %5426 = vmatmul.msk.f32.gmra.mxu1 %vm1731_vm13, %v6788_v51  ;;  %5439 = vmatmul.msk.f32.gmra.mxu2 %vm1731_vm13, %v6946_v28  ;;  %v6952_v36 = vpop.f32.mrf.mxu3 }
 0x49d   : > { %v6954_v39 = vpop.f32.mrf.mxu0  ;;  %v6956_v40 = vpop.f32.mrf.mxu2 }
 0x49e   : > { %8628 = vst [vmem:[#allocation18_spill] sm:$0xff] %v6954_v39 }
 0x49f   : > { %v6960_v46 = vpop.f32.mrf.mxu1  ;;  %5442 = vmatmul.msk.f32.vlgmr.msra.gmra.mxu3 %vm1731_vm13, %v6900_v22 }
 0x4a0   : > { %8629 = vst [vmem:[#allocation19_spill] sm:$0xff] %v6960_v46  ;;  %5447 = vmatmul.msk.f32.vlgmr.msrb.gmra.mxu0 %vm1731_vm13, %v6900_v22  ;;  %5481 = vmatpush.msk.msra.mxu3 %vm1744_vm12, %v3028_v42 }
 0x4a1   : > { %5486 = vmatpush.msk.msrb.mxu0 %vm1744_vm12, %v3029_v43 }
 0x4a2   : > { %5427 = vmatmul.msk.f32.gmra.mxu1 %vm1731_vm13, %v6809_v59  ;;  %5440 = vmatmul.msk.f32.gmra.mxu2 %vm1731_vm13, %v6969_v47  ;;  %v6977_v49 = vpop.f32.mrf.mxu3  ;;  %v3020_v59 = vpop.permute.xlu2 %3019 }
 0x4a3   : > { %v3031_v8 = vsel %vm616_vm9, %v3018_v54, %v3020_v59 }
 0x4a5   : > { %v6979_v51 = vpop.f32.mrf.mxu0  ;;  %v2062_v55 = vpop.f32.mrf.mxu2 }
 0x4a6   : > { %v6982_v56 = vadd.f32 %v2062_v55, %v6813_v4 }
 0x4a7   : > { %v6984_v58 = vpop.f32.mrf.mxu1  ;;  %5443 = vmatmul.msk.f32.gmra.mxu3 %vm1731_vm13, %v6925_v32 }
 0x4a8   : > { %5448 = vmatmul.msk.f32.gmra.mxu0 %vm1731_vm13, %v6925_v32 }
 0x4aa   : > { %5452 = vmatmul.msk.f32.vlgmr.msrb.gmra.mxu1 %vm1731_vm13, %v6900_v22  ;;  %5457 = vmatmul.msk.f32.vlgmr.msrb.gmra.mxu2 %vm1731_vm13, %v6900_v22  ;;  %v6996_v4 = vpop.f32.mrf.mxu3 }
 0x4ab   : > { %5491 = vmatpush.msk.msrb.mxu1 %vm1744_vm12, %v3030_v60  ;;  %5496 = vmatpush.msk.msrb.mxu2 %vm1744_vm12, %v3031_v8  ;;  %v3330_v8 = vpop.permute.xlu1 %3329 }
 0x4ad   : > { %v7000_v10 = vpop.f32.mrf.mxu0  ;;  %v2169_v44 = vpop.f32.mrf.mxu2 }
 0x4ae   : > { %v7003_v9 = vadd.f32 %v2169_v44, %v6837_v61 }
 0x4af   : > { %v7005_v29 = vpop.f32.mrf.mxu1  ;;  %5444 = vmatmul.msk.f32.gmra.mxu3 %vm1731_vm13, %v6946_v28 }
 0x4b0   : > { %5449 = vmatmul.msk.f32.gmra.mxu0 %vm1731_vm13, %v6946_v28 }
 0x4b2   : > { %5453 = vmatmul.msk.f32.gmra.mxu1 %vm1731_vm13, %v6925_v32  ;;  %5458 = vmatmul.msk.f32.gmra.mxu2 %vm1731_vm13, %v6925_v32  ;;  %v7015_v45 = vpop.f32.mrf.mxu3 }
 0x4b5   : > { %v7017_v62 = vpop.f32.mrf.mxu0  ;;  %v2172_v61 = vpop.f32.mrf.mxu2 }
 0x4b6   : > { %v7020_v19 = vadd.f32 %v2172_v61, %v6853_v14  ;;  %v3022_v14 = vpop.permute.xlu0 %3021 }
 0x4b7   : > { %v7022_v20 = vpop.f32.mrf.mxu1  ;;  %5445 = vmatmul.msk.f32.gmra.mxu3 %vm1731_vm13, %v6969_v47  ;;  %v3032_v43 = vsel %vm616_vm9, %v3020_v59, %v3022_v14  ;;  %v3033_v55 = vsel %vm616_vm9, %v3022_v14, %v3024_v24  ;;  %v3026_v14 = vpop.permute.xlu2 %3025 }
 0x4b8   : > { %5450 = vmatmul.msk.f32.gmra.mxu0 %vm1731_vm13, %v6969_v47 }
 0x4ba   : > { %5454 = vmatmul.msk.f32.gmra.mxu1 %vm1731_vm13, %v6946_v28  ;;  %5459 = vmatmul.msk.f32.gmra.mxu2 %vm1731_vm13, %v6946_v28  ;;  %v2091_v23 = vpop.f32.mrf.mxu3 }
 0x4bb   : > { %v7033_v25 = vadd.f32 %v2091_v23, %v6861_v1 }
 0x4bd   : > { %v7035_v37 = vpop.f32.mrf.mxu0  ;;  %v2175_v41 = vpop.f32.mrf.mxu2 }
 0x4be   : > { %8630 = vst [vmem:[#allocation20_spill] sm:$0xff] %v7035_v37  ;;  %v7038_v42 = vadd.f32 %v2175_v41, %v6867_v16  ;;  %v3328_v61 = vpop.permute.xlu0 %3327  ;;  %v3034_v41 = vsel %vm616_vm9, %v3024_v24, %v3026_v14  ;;  %v2057_v14 = vadd.f32 %v6935_v34, %v6764_v48  ;;  %vm4354_vm9 = vcmask 506880  }
 0x4bf   : > { %v7042_v54 = vpop.f32.mrf.mxu1  ;;  %5462 = vmatmul.msk.f32.vlgmr.msrb.gmra.mxu3 %vm1731_vm13, %v6900_v22 }
 0x4c0   : > { %8631 = vst [vmem:[#allocation21_spill] sm:$0xff] %v7042_v54  ;;  %5467 = vmatmul.msk.f32.vlgmr.msra.gmra.mxu0 %vm1731_vm13, %v6900_v22  ;;  %5501 = vmatpush.msk.msrb.mxu3 %vm1744_vm12, %v3032_v43 }
 0x4c1   : > { %5506 = vmatpush.msk.msra.mxu0 %vm1744_vm12, %v3033_v55 }
 0x4c2   : > { %5455 = vmatmul.msk.f32.gmra.mxu1 %vm1731_vm13, %v6969_v47  ;;  %5460 = vmatmul.msk.f32.gmra.mxu2 %vm1731_vm13, %v6969_v47  ;;  %v2198_v1 = vpop.f32.mrf.mxu3 }
 0x4c3   : > { %v7055_v16 = vadd.f32 %v2198_v1, %v6885_v3  ;;  %v7071_v3 = vld [vmem:[%s8609_s5 + $0x20] sm:$0xff]  ;;  %v2054_v1 = vadd.f32 %v6912_v26, %v6742_v38 }
 0x4c5   : > { %v7057_v59 = vpop.f32.mrf.mxu0  ;;  %v2178_v60 = vpop.f32.mrf.mxu2 }
 0x4c6   : > { %8632 = vst [vmem:[#allocation22_spill] sm:$0xff] %v7057_v59  ;;  %v7060_v44 = vadd.f32 %v2178_v60, %v6887_v12  ;;  %v3346_v12 = vsel %vm3345_vm5, %v3328_v61, %v3330_v8  ;;  %v3334_v34 = vpop.permute.xlu0 %3333 }
 0x4c7   : > { %v7062_v23 = vpop.f32.mrf.mxu1  ;;  %5463 = vmatmul.msk.f32.gmra.mxu3 %vm1731_vm13, %v6925_v32 }
 0x4c8   : > { %8633 = vst [vmem:[#allocation23_spill] sm:$0xff] %v7062_v23  ;;  %5468 = vmatmul.msk.f32.gmra.mxu0 %vm1731_vm13, %v6925_v32 }
 0x4ca   : > { %5472 = vmatmul.msk.f32.vlgmr.msra.gmra.mxu1 %vm1731_vm13, %v6900_v22  ;;  %5477 = vmatmul.msk.f32.vlgmr.msra.gmra.mxu2 %vm1731_vm13, %v7071_v3  ;;  %v2201_v43 = vpop.f32.mrf.mxu3 }
 0x4cb   : > { %5511 = vmatpush.msk.msra.mxu1 %vm1744_vm12, %v3034_v41  ;;  %5520 = vmatpush.msk.msra.mxu2 %vm1744_vm12, %v3346_v12  ;;  %v7082_v55 = vadd.f32 %v2201_v43, %v6908_v0  ;;  %v7099_v0 = vld [vmem:[%s8609_s5 + $0x28] sm:$0xff] }
 0x4cd   : > { %v7086_v24 = vpop.f32.mrf.mxu0  ;;  %v2372_v60 = vpop.f32.mrf.mxu2 }
 0x4ce   : > { %8634 = vst [vmem:[#allocation24_spill] sm:$0xff] %v7086_v24  ;;  %v7088_v61 = vadd.f32 %v2372_v60, %v2054_v1  ;;  %v2060_v60 = vadd.f32 %v6956_v40, %v6790_v52  ;;  %v7149_v52 = vld [vmem:[%s8609_s5 + $0x38] sm:$0xff] }
 0x4cf   : > { %v7090_v22 = vpop.f32.mrf.mxu1  ;;  %5464 = vmatmul.msk.f32.gmra.mxu3 %vm1731_vm13, %v6946_v28 }
 0x4d0   : > { %8635 = vst [vmem:[#allocation25_spill] sm:$0xff] %v7090_v22  ;;  %5469 = vmatmul.msk.f32.gmra.mxu0 %vm1731_vm13, %v6946_v28 }
 0x4d2   : > { %5473 = vmatmul.msk.f32.gmra.mxu1 %vm1731_vm13, %v6925_v32  ;;  %5478 = vmatmul.msk.f32.gmra.mxu2 %vm1731_vm13, %v7099_v0  ;;  %v2204_v38 = vpop.f32.mrf.mxu3  ;;  %v7123_v32 = vld [vmem:[%s8609_s5 + $0x30] sm:$0xff] }
 0x4d3   : > { %v7106_v26 = vadd.f32 %v2204_v38, %v6931_v33 }
 0x4d5   : > { %v7110_v41 = vpop.f32.mrf.mxu0  ;;  %v2375_v12 = vpop.f32.mrf.mxu2 }
 0x4d6   : > { %8636 = vst [vmem:[#allocation26_spill] sm:$0xff] %v7110_v41  ;;  %v7112_v43 = vadd.f32 %v2375_v12, %v2057_v14  ;;  %v3332_v12 = vpop.permute.xlu2 %3331 }
 0x4d7   : > { %v7114_v1 = vpop.f32.mrf.mxu1  ;;  %5465 = vmatmul.msk.f32.gmra.mxu3 %vm1731_vm13, %v6969_v47  ;;  %v3347_v50 = vsel %vm3345_vm5, %v3330_v8, %v3332_v12 }
 0x4d8   : > { %8637 = vst [vmem:[#allocation27_spill] sm:$0xff] %v7114_v1  ;;  %5470 = vmatmul.msk.f32.gmra.mxu0 %vm1731_vm13, %v6969_v47 }
 0x4da   : > { %5474 = vmatmul.msk.f32.gmra.mxu1 %vm1731_vm13, %v6946_v28  ;;  %5479 = vmatmul.msk.f32.gmra.mxu2 %vm1731_vm13, %v7123_v32  ;;  %v2207_v48 = vpop.f32.mrf.mxu3  ;;  %v3348_v28 = vsel %vm3345_vm5, %v3332_v12, %v3334_v34 }
 0x4db   : > { %v7130_v33 = vadd.f32 %v2207_v48, %v6952_v36  ;;  %v2083_v36 = vadd.f32 %v6977_v49, %v6796_v53 }
 0x4dd   : > { %v7134_v38 = vpop.f32.mrf.mxu0  ;;  %v2378_v14 = vpop.f32.mrf.mxu2 }
 0x4de   : > { %8638 = vst [vmem:[#allocation28_spill] sm:$0xff] %v7134_v38  ;;  %v7136_v39 = vadd.f32 %v2378_v14, %v2060_v60  ;;  %v3338_v53 = vpop.permute.xlu2 %3337 }
 0x4df   : > { %v7140_v46 = vpop.f32.mrf.mxu1  ;;  %5482 = vmatmul.msk.f32.vlgmr.msra.gmra.mxu3 %vm1731_vm13, %v7071_v3 }
 0x4e0   : > { %8639 = vst [vmem:[#allocation29_spill] sm:$0xff] %v7140_v46  ;;  %5487 = vmatmul.msk.f32.vlgmr.msrb.gmra.mxu0 %vm1731_vm13, %v7071_v3  ;;  %5525 = vmatpush.msk.msra.mxu3 %vm1744_vm12, %v3347_v50  ;;  %v3336_v50 = vpop.permute.xlu1 %3335 }
 0x4e1   : > { %5530 = vmatpush.msk.msrb.mxu0 %vm1744_vm12, %v3348_v28  ;;  %v3349_v49 = vsel %vm3345_vm5, %v3334_v34, %v3336_v50  ;;  %v3350_v28 = vsel %vm3345_vm5, %v3336_v50, %v3338_v53 }
 0x4e2   : > { %5475 = vmatmul.msk.f32.gmra.mxu1 %vm1731_vm13, %v6969_v47  ;;  %5480 = vmatmul.msk.f32.gmra.mxu2 %vm1731_vm13, %v7149_v52  ;;  %v2401_v40 = vpop.f32.mrf.mxu3  ;;  %v2086_v47 = vadd.f32 %v6996_v4, %v6819_v5 }
 0x4e3   : > { %v7159_v8 = vadd.f32 %v2401_v40, %v2083_v36 }
 0x4e5   : > { %v7161_v48 = vpop.f32.mrf.mxu0  ;;  %v2381_v60 = vpop.f32.mrf.mxu2 }
 0x4e6   : > { %v7164_v14 = vadd.f32 %v2381_v60, %v6982_v56  ;;  %v2089_v60 = vadd.f32 %v7015_v45, %v6841_v11 }
 0x4e7   : > { %v7166_v12 = vpop.f32.mrf.mxu1  ;;  %5483 = vmatmul.msk.f32.gmra.mxu3 %vm1731_vm13, %v7099_v0 }
 0x4e8   : > { %5488 = vmatmul.msk.f32.gmra.mxu0 %vm1731_vm13, %v7099_v0  ;;  %v3342_v45 = vpop.permute.xlu1 %3341 }
 0x4ea   : > { %5492 = vmatmul.msk.f32.vlgmr.msrb.gmra.mxu1 %vm1731_vm13, %v7071_v3  ;;  %5497 = vmatmul.msk.f32.vlgmr.msrb.gmra.mxu2 %vm1731_vm13, %v7071_v3  ;;  %v2404_v56 = vpop.f32.mrf.mxu3 }
 0x4eb   : > { %5535 = vmatpush.msk.msrb.mxu1 %vm1744_vm12, %v3349_v49  ;;  %5540 = vmatpush.msk.msrb.mxu2 %vm1744_vm12, %v3350_v28  ;;  %v7182_v36 = vadd.f32 %v2404_v56, %v2086_v47 }
 0x4ed   : > { %v7184_v40 = vpop.f32.mrf.mxu0  ;;  %v2488_v5 = vpop.f32.mrf.mxu2 }
 0x4ee   : > { %v7187_v4 = vadd.f32 %v2488_v5, %v7003_v9 }
 0x4ef   : > { %v7189_v34 = vpop.f32.mrf.mxu1  ;;  %5484 = vmatmul.msk.f32.gmra.mxu3 %vm1731_vm13, %v7123_v32 }
 0x4f0   : > { %5489 = vmatmul.msk.f32.gmra.mxu0 %vm1731_vm13, %v7123_v32 }
 0x4f2   : > { %5493 = vmatmul.msk.f32.gmra.mxu1 %vm1731_vm13, %v7099_v0  ;;  %5498 = vmatmul.msk.f32.gmra.mxu2 %vm1731_vm13, %v7099_v0  ;;  %v2407_v50 = vpop.f32.mrf.mxu3 }
 0x4f3   : > { %v7201_v9 = vadd.f32 %v2407_v50, %v2089_v60 }
 0x4f5   : > { %v7203_v47 = vpop.f32.mrf.mxu0  ;;  %v2491_v49 = vpop.f32.mrf.mxu2 }
 0x4f6   : > { %v7206_v28 = vadd.f32 %v2491_v49, %v7020_v19  ;;  %v3340_v19 = vpop.permute.xlu0 %3339 }
 0x4f7   : > { %v7208_v56 = vpop.f32.mrf.mxu1  ;;  %5485 = vmatmul.msk.f32.gmra.mxu3 %vm1731_vm13, %v7149_v52  ;;  %v3351_v38 = vsel %vm3345_vm5, %v3338_v53, %v3340_v19  ;;  %v3352_v46 = vsel %vm3345_vm5, %v3340_v19, %v3342_v45  ;;  %v3718_v19 = vpop.permute.xlu1 %3717 }
 0x4f8   : > { %8640 = vst [vmem:[#allocation30_spill] sm:$0xff] %v7206_v28  ;;  %5490 = vmatmul.msk.f32.gmra.mxu0 %vm1731_vm13, %v7149_v52 }
 0x4f9   : > { %8641 = vst [vmem:[#allocation31_spill] sm:$0xff] %v7208_v56 }
 0x4fa   : > { %5494 = vmatmul.msk.f32.gmra.mxu1 %vm1731_vm13, %v7123_v32  ;;  %5499 = vmatmul.msk.f32.gmra.mxu2 %vm1731_vm13, %v7123_v32  ;;  %v2410_v11 = vpop.f32.mrf.mxu3 }
 0x4fb   : > { %v7219_v5 = vadd.f32 %v2410_v11, %v7033_v25 }
 0x4fd   : > { %8642 = vst [vmem:[#allocation32_spill] sm:$0xff] %v7219_v5  ;;  %v7221_v60 = vpop.f32.mrf.mxu0  ;;  %v2494_v50 = vpop.f32.mrf.mxu2 }
 0x4fe   : > { %8643 = vst [vmem:[#allocation33_spill] sm:$0xff] %v7221_v60  ;;  %v7224_v49 = vadd.f32 %v2494_v50, %v7038_v42 }
 0x4ff   : > { %v7228_v1 = vpop.f32.mrf.mxu1  ;;  %5502 = vmatmul.msk.f32.vlgmr.msrb.gmra.mxu3 %vm1731_vm13, %v7071_v3 }
 0x500   : > { %8644 = vst [vmem:[#allocation34_spill] sm:$0xff] %v7224_v49  ;;  %5507 = vmatmul.msk.f32.vlgmr.msra.gmra.mxu0 %vm1731_vm13, %v7071_v3  ;;  %5545 = vmatpush.msk.msrb.mxu3 %vm1744_vm12, %v3351_v38  ;;  %v3716_v38 = vpop.permute.xlu0 %3715 }
 0x501   : > { %8645 = vst [vmem:[#allocation35_spill] sm:$0xff] %v7228_v1  ;;  %5550 = vmatpush.msk.msra.mxu0 %vm1744_vm12, %v3352_v46  ;;  %v7257_v46 = vld [vmem:[%s8609_s5 + $0xe0] sm:$0xff] }
 0x502   : > { %5495 = vmatmul.msk.f32.gmra.mxu1 %vm1731_vm13, %v7149_v52  ;;  %5500 = vmatmul.msk.f32.gmra.mxu2 %vm1731_vm13, %v7149_v52  ;;  %v2517_v25 = vpop.f32.mrf.mxu3 }
 0x503   : > { %v7241_v42 = vadd.f32 %v2517_v25, %v7055_v16  ;;  %v3344_v16 = vpop.permute.xlu2 %3343 }
 0x504   : > { %v3353_v25 = vsel %vm3345_vm5, %v3342_v45, %v3344_v16 }
 0x505   : > { %8646 = vst [vmem:[#allocation36_spill] sm:$0xff] %v7241_v42  ;;  %v7243_v53 = vpop.f32.mrf.mxu0  ;;  %v2497_v11 = vpop.f32.mrf.mxu2 }
 0x506   : > { %8647 = vst [vmem:[#allocation37_spill] sm:$0xff] %v7243_v53  ;;  %v7246_v50 = vadd.f32 %v2497_v11, %v7060_v44  ;;  %v3733_v44 = vsel %vm844_vm11, %v3716_v38, %v3718_v19 }
 0x507   : > { %v7248_v35 = vpop.f32.mrf.mxu1  ;;  %5503 = vmatmul.msk.f32.gmra.mxu3 %vm1731_vm13, %v7099_v0 }
 0x508   : > { %8648 = vst [vmem:[#allocation38_spill] sm:$0xff] %v7246_v50  ;;  %5508 = vmatmul.msk.f32.gmra.mxu0 %vm1731_vm13, %v7099_v0 }
 0x509   : > { %8649 = vst [vmem:[#allocation39_spill] sm:$0xff] %v7248_v35 }
 0x50a   : > { %5512 = vmatmul.msk.f32.vlgmr.msra.gmra.mxu1 %vm1731_vm13, %v7071_v3  ;;  %5521 = vmatmul.msk.f32.vlgmr.msra.gmra.mxu2 %vm1731_vm13, %v7257_v46  ;;  %v2520_v11 = vpop.f32.mrf.mxu3  ;;  %v7283_v3 = vld [vmem:[%s8609_s5 + $0xe8] sm:$0xff] }
 0x50b   : > { %5555 = vmatpush.msk.msra.mxu1 %vm1744_vm12, %v3353_v25  ;;  %5568 = vmatpush.msk.msra.mxu2 %vm1744_vm12, %v3733_v44  ;;  %v7268_v41 = vadd.f32 %v2520_v11, %v7082_v55 }
 0x50d   : > { %8650 = vst [vmem:[#allocation40_spill] sm:$0xff] %v7268_v41  ;;  %v7270_v18 = vpop.f32.mrf.mxu0  ;;  %v7272_v22 = vpop.f32.mrf.mxu2 }
 0x50e   : > { %8651 = vst [vmem:[#allocation41_spill] sm:$0xff] %v7270_v18 }
 0x50f   : > { %v7274_v45 = vpop.f32.mrf.mxu1  ;;  %5504 = vmatmul.msk.f32.gmra.mxu3 %vm1731_vm13, %v7123_v32 }
 0x510   : > { %8652 = vst [vmem:[#allocation42_spill] sm:$0xff] %v7274_v45  ;;  %5509 = vmatmul.msk.f32.gmra.mxu0 %vm1731_vm13, %v7123_v32 }
 0x512   : > { %5513 = vmatmul.msk.f32.gmra.mxu1 %vm1731_vm13, %v7099_v0  ;;  %5522 = vmatmul.msk.f32.gmra.mxu2 %vm1731_vm13, %v7283_v3  ;;  %v2523_v55 = vpop.f32.mrf.mxu3  ;;  %v7305_v0 = vld [vmem:[%s8609_s5 + $0xf0] sm:$0xff] }
 0x513   : > { %v7290_v38 = vadd.f32 %v2523_v55, %v7106_v26  ;;  %v3722_v55 = vpop.permute.xlu0 %3721 }
 0x515   : > { %8653 = vst [vmem:[#allocation43_spill] sm:$0xff] %v7290_v38  ;;  %v7292_v16 = vpop.f32.mrf.mxu0  ;;  %v7294_v25 = vpop.f32.mrf.mxu2 }
 0x516   : > { %8654 = vst [vmem:[#allocation44_spill] sm:$0xff] %v7292_v16  ;;  %v3720_v16 = vpop.permute.xlu2 %3719 }
 0x517   : > { %v7296_v44 = vpop.f32.mrf.mxu1  ;;  %5505 = vmatmul.msk.f32.gmra.mxu3 %vm1731_vm13, %v7149_v52  ;;  %v3734_v45 = vsel %vm844_vm11, %v3718_v19, %v3720_v16  ;;  %v3735_v41 = vsel %vm844_vm11, %v3720_v16, %v3722_v55 }
 0x518   : > { %8655 = vst [vmem:[#allocation45_spill] sm:$0xff] %v7296_v44  ;;  %5510 = vmatmul.msk.f32.gmra.mxu0 %vm1731_vm13, %v7149_v52 }
 0x51a   : > { %5514 = vmatmul.msk.f32.gmra.mxu1 %vm1731_vm13, %v7123_v32  ;;  %5523 = vmatmul.msk.f32.gmra.mxu2 %vm1731_vm13, %v7305_v0  ;;  %v2526_v26 = vpop.f32.mrf.mxu3  ;;  %v7329_v32 = vld [vmem:[%s8609_s5 + $0xf8] sm:$0xff] }
 0x51b   : > { %v7312_v11 = vadd.f32 %v2526_v26, %v7130_v33  ;;  %v3724_v26 = vpop.permute.xlu1 %3723  ;;  %v3728_v35 = vpop.permute.xlu0 %3727 }
 0x51d   : > { %8656 = vst [vmem:[#allocation46_spill] sm:$0xff] %v7312_v11  ;;  %v7314_v44 = vpop.f32.mrf.mxu0  ;;  %v7316_v38 = vpop.f32.mrf.mxu2 }
 0x51e   : > { %8657 = vst [vmem:[#allocation47_spill] sm:$0xff] %v7314_v44 }
 0x51f   : > { %v7320_v31 = vpop.f32.mrf.mxu1  ;;  %5526 = vmatmul.msk.f32.vlgmr.msra.gmra.mxu3 %vm1731_vm13, %v7257_v46 }
 0x520   : > { %8658 = vst [vmem:[#allocation48_spill] sm:$0xff] %v7320_v31  ;;  %5531 = vmatmul.msk.f32.vlgmr.msrb.gmra.mxu0 %vm1731_vm13, %v7257_v46  ;;  %5573 = vmatpush.msk.msra.mxu3 %vm1744_vm12, %v3734_v45 }
 0x521   : > { %5578 = vmatpush.msk.msrb.mxu0 %vm1744_vm12, %v3735_v41  ;;  %v3726_v41 = vpop.permute.xlu2 %3725 }
 0x522   : > { %5515 = vmatmul.msk.f32.gmra.mxu1 %vm1731_vm13, %v7149_v52  ;;  %5524 = vmatmul.msk.f32.gmra.mxu2 %vm1731_vm13, %v7329_v32  ;;  %v7337_v33 = vpop.f32.mrf.mxu3  ;;  %v3736_v52 = vsel %vm844_vm11, %v3722_v55, %v3724_v26  ;;  %v3737_v45 = vsel %vm844_vm11, %v3724_v26, %v3726_v41  ;;  %v3738_v21 = vsel %vm844_vm11, %v3726_v41, %v3728_v35 }
 0x523   : > { %v3730_v50 = vpop.permute.xlu1 %3729  ;;  %v4019_v49 = vpop.permute.xlu0 %4018 }
 0x524   : > { %v3739_v53 = vsel %vm844_vm11, %v3728_v35, %v3730_v50 }
 0x525   : > { %v7339_v19 = vpop.f32.mrf.mxu0  ;;  %v7341_v16 = vpop.f32.mrf.mxu2 }
 0x527   : > { %v7343_v44 = vpop.f32.mrf.mxu1  ;;  %5527 = vmatmul.msk.f32.gmra.mxu3 %vm1731_vm13, %v7283_v3 }
 0x528   : > { %5532 = vmatmul.msk.f32.gmra.mxu0 %vm1731_vm13, %v7283_v3 }
 0x52a   : > { %5536 = vmatmul.msk.f32.vlgmr.msrb.gmra.mxu1 %vm1731_vm13, %v7257_v46  ;;  %5541 = vmatmul.msk.f32.vlgmr.msrb.gmra.mxu2 %vm1731_vm13, %v7257_v46  ;;  %v7355_v31 = vpop.f32.mrf.mxu3 }
 0x52b   : > { %5583 = vmatpush.msk.msrb.mxu1 %vm1744_vm12, %v3736_v52  ;;  %5588 = vmatpush.msk.msrb.mxu2 %vm1744_vm12, %v3737_v45 }
 0x52d   : > { %v7359_v11 = vpop.f32.mrf.mxu0  ;;  %v7361_v18 = vpop.f32.mrf.mxu2 }
 0x52f   : > { %v7363_v24 = vpop.f32.mrf.mxu1  ;;  %5528 = vmatmul.msk.f32.gmra.mxu3 %vm1731_vm13, %v7305_v0 }
 0x530   : > { %5533 = vmatmul.msk.f32.gmra.mxu0 %vm1731_vm13, %v7305_v0 }
 0x532   : > { %5537 = vmatmul.msk.f32.gmra.mxu1 %vm1731_vm13, %v7283_v3  ;;  %5542 = vmatmul.msk.f32.gmra.mxu2 %vm1731_vm13, %v7283_v3  ;;  %v7373_v55 = vpop.f32.mrf.mxu3 }
 0x535   : > { %v7375_v26 = vpop.f32.mrf.mxu0  ;;  %v7377_v52 = vpop.f32.mrf.mxu2 }
 0x537   : > { %v7379_v45 = vpop.f32.mrf.mxu1  ;;  %5529 = vmatmul.msk.f32.gmra.mxu3 %vm1731_vm13, %v7329_v32 }
 0x538   : > { %8659 = vst [vmem:[#allocation49_spill] sm:$0xff] %v7379_v45  ;;  %5534 = vmatmul.msk.f32.gmra.mxu0 %vm1731_vm13, %v7329_v32 }
 0x53a   : > { %5538 = vmatmul.msk.f32.gmra.mxu1 %vm1731_vm13, %v7305_v0  ;;  %5543 = vmatmul.msk.f32.gmra.mxu2 %vm1731_vm13, %v7305_v0  ;;  %v7389_v27 = vpop.f32.mrf.mxu3 }
 0x53d   : > { %v7391_v42 = vpop.f32.mrf.mxu0  ;;  %v7393_v23 = vpop.f32.mrf.mxu2 }
 0x53e   : > { %8660 = vst [vmem:[#allocation50_spill] sm:$0xff] %v7391_v42 }
 0x53f   : > { %v7397_v59 = vpop.f32.mrf.mxu1  ;;  %5546 = vmatmul.msk.f32.vlgmr.msrb.gmra.mxu3 %vm1731_vm13, %v7257_v46 }
 0x540   : > { %8661 = vst [vmem:[#allocation51_spill] sm:$0xff] %v7397_v59  ;;  %5551 = vmatmul.msk.f32.vlgmr.msra.gmra.mxu0 %vm1731_vm13, %v7257_v46  ;;  %5593 = vmatpush.msk.msrb.mxu3 %vm1744_vm12, %v3738_v21  ;;  %v4021_v59 = vpop.permute.xlu1 %4020  ;;  %v7424_v21 = vld [vmem:[%s8609_s5 + $0xa0] sm:$0xff] }
 0x541   : > { %5598 = vmatpush.msk.msra.mxu0 %vm1744_vm12, %v3739_v53  ;;  %v3732_v53 = vpop.permute.xlu2 %3731  ;;  %v4036_v42 = vsel %vm788_vm7, %v4019_v49, %v4021_v59  ;;  %v7450_v49 = vld [vmem:[%s8609_s5 + $0xa8] sm:$0xff] }
 0x542   : > { %5539 = vmatmul.msk.f32.gmra.mxu1 %vm1731_vm13, %v7329_v32  ;;  %5544 = vmatmul.msk.f32.gmra.mxu2 %vm1731_vm13, %v7329_v32  ;;  %v7409_v41 = vpop.f32.mrf.mxu3 }
 0x545   : > { %v7411_v35 = vpop.f32.mrf.mxu0  ;;  %v7413_v17 = vpop.f32.mrf.mxu2 }
 0x546   : > { %8662 = vst [vmem:[#allocation52_spill] sm:$0xff] %v7411_v35  ;;  %v3740_v35 = vsel %vm844_vm11, %v3730_v50, %v3732_v53  ;;  %v4025_v53 = vpop.permute.xlu0 %4024 }
 0x547   : > { %v7415_v1 = vpop.f32.mrf.mxu1  ;;  %5547 = vmatmul.msk.f32.gmra.mxu3 %vm1731_vm13, %v7283_v3 }
 0x548   : > { %8663 = vst [vmem:[#allocation53_spill] sm:$0xff] %v7415_v1  ;;  %5552 = vmatmul.msk.f32.gmra.mxu0 %vm1731_vm13, %v7283_v3 }
 0x54a   : > { %5556 = vmatmul.msk.f32.vlgmr.msra.gmra.mxu1 %vm1731_vm13, %v7257_v46  ;;  %5569 = vmatmul.msk.f32.vlgmr.msra.gmra.mxu2 %vm1731_vm13, %v7424_v21  ;;  %v7432_v1 = vpop.f32.mrf.mxu3 }
 0x54b   : > { %5603 = vmatpush.msk.msra.mxu1 %vm1744_vm12, %v3740_v35  ;;  %5608 = vmatpush.msk.msra.mxu2 %vm1744_vm12, %v4036_v42 }
 0x54d   : > { %v7436_v5 = vpop.f32.mrf.mxu0  ;;  %v3080_v54 = vpop.f32.mrf.mxu2 }
 0x54e   : > { %8664 = vst [vmem:[#allocation54_spill] sm:$0xff] %v7436_v5  ;;  %v7439_v63 = vadd.f32 %v3080_v54, %v7272_v22 }
 0x54f   : > { %v7441_v50 = vpop.f32.mrf.mxu1  ;;  %5548 = vmatmul.msk.f32.gmra.mxu3 %vm1731_vm13, %v7305_v0 }
 0x550   : > { %8665 = vst [vmem:[#allocation55_spill] sm:$0xff] %v7441_v50  ;;  %5553 = vmatmul.msk.f32.gmra.mxu0 %vm1731_vm13, %v7305_v0 }
 0x552   : > { %5557 = vmatmul.msk.f32.gmra.mxu1 %vm1731_vm13, %v7283_v3  ;;  %5570 = vmatmul.msk.f32.gmra.mxu2 %vm1731_vm13, %v7450_v49  ;;  %v7456_v54 = vpop.f32.mrf.mxu3  ;;  %v7472_v3 = vld [vmem:[%s8609_s5 + $0xb0] sm:$0xff] }
 0x555   : > { %v7458_v22 = vpop.f32.mrf.mxu0  ;;  %v3083_v42 = vpop.f32.mrf.mxu2 }
 0x556   : > { %8666 = vst [vmem:[#allocation56_spill] sm:$0xff] %v7458_v22  ;;  %v7461_v46 = vadd.f32 %v3083_v42, %v7294_v25  ;;  %v4023_v22 = vpop.permute.xlu2 %4022 }
 0x557   : > { %v7463_v35 = vpop.f32.mrf.mxu1  ;;  %5549 = vmatmul.msk.f32.gmra.mxu3 %vm1731_vm13, %v7329_v32  ;;  %v4037_v5 = vsel %vm788_vm7, %v4021_v59, %v4023_v22  ;;  %v4038_v60 = vsel %vm788_vm7, %v4023_v22, %v4025_v53 }
 0x558   : > { %8667 = vst [vmem:[#allocation57_spill] sm:$0xff] %v7463_v35  ;;  %5554 = vmatmul.msk.f32.gmra.mxu0 %vm1731_vm13, %v7329_v32 }
 0x55a   : > { %5558 = vmatmul.msk.f32.gmra.mxu1 %vm1731_vm13, %v7305_v0  ;;  %5571 = vmatmul.msk.f32.gmra.mxu2 %vm1731_vm13, %v7472_v3  ;;  %v7478_v25 = vpop.f32.mrf.mxu3  ;;  %v7496_v0 = vld [vmem:[%s8609_s5 + $0xb8] sm:$0xff] }
 0x55d   : > { %v7480_v42 = vpop.f32.mrf.mxu0  ;;  %v3086_v35 = vpop.f32.mrf.mxu2 }
 0x55e   : > { %8668 = vst [vmem:[#allocation58_spill] sm:$0xff] %v7480_v42  ;;  %v7483_v50 = vadd.f32 %v3086_v35, %v7316_v38 }
 0x55f   : > { %v7487_v37 = vpop.f32.mrf.mxu1  ;;  %5574 = vmatmul.msk.f32.vlgmr.msra.gmra.mxu3 %vm1731_vm13, %v7424_v21 }
 0x560   : > { %8669 = vst [vmem:[#allocation59_spill] sm:$0xff] %v7487_v37  ;;  %5579 = vmatmul.msk.f32.vlgmr.msrb.gmra.mxu0 %vm1731_vm13, %v7424_v21  ;;  %5613 = vmatpush.msk.msra.mxu3 %vm1744_vm12, %v4037_v5  ;;  %v4027_v37 = vpop.permute.xlu1 %4026 }
 0x561   : > { %5618 = vmatpush.msk.msrb.mxu0 %vm1744_vm12, %v4038_v60  ;;  %v4029_v60 = vpop.permute.xlu2 %4028 }
 0x562   : > { %5559 = vmatmul.msk.f32.gmra.mxu1 %vm1731_vm13, %v7329_v32  ;;  %5572 = vmatmul.msk.f32.gmra.mxu2 %vm1731_vm13, %v7496_v0  ;;  %v3109_v59 = vpop.f32.mrf.mxu3  ;;  %v4039_v32 = vsel %vm788_vm7, %v4025_v53, %v4027_v37 }
 0x563   : > { %v7505_v38 = vadd.f32 %v3109_v59, %v7337_v33  ;;  %v4040_v33 = vsel %vm788_vm7, %v4027_v37, %v4029_v60 }
 0x565   : > { %v7507_v22 = vpop.f32.mrf.mxu0  ;;  %v3089_v35 = vpop.f32.mrf.mxu2 }
 0x566   : > { %v7510_v42 = vadd.f32 %v3089_v35, %v7341_v16 }
 0x567   : > { %v7512_v5 = vpop.f32.mrf.mxu1  ;;  %5575 = vmatmul.msk.f32.gmra.mxu3 %vm1731_vm13, %v7450_v49 }
 0x568   : > { %5580 = vmatmul.msk.f32.gmra.mxu0 %vm1731_vm13, %v7450_v49 }
 0x56a   : > { %5584 = vmatmul.msk.f32.vlgmr.msrb.gmra.mxu1 %vm1731_vm13, %v7424_v21  ;;  %5589 = vmatmul.msk.f32.vlgmr.msrb.gmra.mxu2 %vm1731_vm13, %v7424_v21  ;;  %v3112_v16 = vpop.f32.mrf.mxu3 }
 0x56b   : > { %5623 = vmatpush.msk.msrb.mxu1 %vm1744_vm12, %v4039_v32  ;;  %5628 = vmatpush.msk.msrb.mxu2 %vm1744_vm12, %v4040_v33  ;;  %v7527_v59 = vadd.f32 %v3112_v16, %v7355_v31 }
 0x56d   : > { %v7529_v35 = vpop.f32.mrf.mxu0  ;;  %v3196_v30 = vpop.f32.mrf.mxu2 }
 0x56e   : > { %v7532_v53 = vadd.f32 %v3196_v30, %v7361_v18 }
 0x56f   : > { %v7534_v37 = vpop.f32.mrf.mxu1  ;;  %5576 = vmatmul.msk.f32.gmra.mxu3 %vm1731_vm13, %v7472_v3 }
 0x570   : > { %5581 = vmatmul.msk.f32.gmra.mxu0 %vm1731_vm13, %v7472_v3 }
 0x572   : > { %5585 = vmatmul.msk.f32.gmra.mxu1 %vm1731_vm13, %v7450_v49  ;;  %5590 = vmatmul.msk.f32.gmra.mxu2 %vm1731_vm13, %v7450_v49  ;;  %v3115_v31 = vpop.f32.mrf.mxu3 }
 0x573   : > { %v7545_v32 = vadd.f32 %v3115_v31, %v7373_v55  ;;  %v4033_v31 = vpop.permute.xlu1 %4032 }
 0x575   : > { %8670 = vst [vmem:[#allocation60_spill] sm:$0xff] %v7545_v32  ;;  %v7547_v30 = vpop.f32.mrf.mxu0  ;;  %v3199_v18 = vpop.f32.mrf.mxu2 }
 0x576   : > { %v7550_v33 = vadd.f32 %v3199_v18, %v7377_v52  ;;  %v4031_v52 = vpop.permute.xlu0 %4030 }
 0x577   : > { %v7552_v16 = vpop.f32.mrf.mxu1  ;;  %5577 = vmatmul.msk.f32.gmra.mxu3 %vm1731_vm13, %v7496_v0  ;;  %v4041_v28 = vsel %vm788_vm7, %v4029_v60, %v4031_v52  ;;  %v4042_v56 = vsel %vm788_vm7, %v4031_v52, %v4033_v31 }
 0x578   : > { %8671 = vst [vmem:[#allocation61_spill] sm:$0xff] %v7550_v33  ;;  %5582 = vmatmul.msk.f32.gmra.mxu0 %vm1731_vm13, %v7496_v0 }
 0x579   : > { %8672 = vst [vmem:[#allocation62_spill] sm:$0xff] %v7552_v16 }
 0x57a   : > { %5586 = vmatmul.msk.f32.gmra.mxu1 %vm1731_vm13, %v7472_v3  ;;  %5591 = vmatmul.msk.f32.gmra.mxu2 %vm1731_vm13, %v7472_v3  ;;  %v3118_v55 = vpop.f32.mrf.mxu3 }
 0x57b   : > { %v7563_v45 = vadd.f32 %v3118_v55, %v7389_v27  ;;  %v4339_v55 = vpop.permute.xlu1 %4338 }
 0x57d   : > { %v7565_v18 = vpop.f32.mrf.mxu0  ;;  %v3202_v33 = vpop.f32.mrf.mxu2 }
 0x57e   : > { %v7568_v16 = vadd.f32 %v3202_v33, %v7393_v23 }
 0x57f   : > { %v7572_v32 = vpop.f32.mrf.mxu1  ;;  %5594 = vmatmul.msk.f32.vlgmr.msrb.gmra.mxu3 %vm1731_vm13, %v7424_v21 }
 0x580   : > { %8673 = vst [vmem:[#allocation63_spill] sm:$0xff] %v7568_v16  ;;  %5599 = vmatmul.msk.f32.vlgmr.msra.gmra.mxu0 %vm1731_vm13, %v7424_v21  ;;  %5633 = vmatpush.msk.msrb.mxu3 %vm1744_vm12, %v4041_v28  ;;  %v4337_v28 = vpop.permute.xlu0 %4336 }
 0x581   : > { %5638 = vmatpush.msk.msra.mxu0 %vm1744_vm12, %v4042_v56  ;;  %v7595_v56 = vld [vmem:[%s8611_s7] ss:$4 sm:$0xff] }
 0x582   : > { %5587 = vmatmul.msk.f32.gmra.mxu1 %vm1731_vm13, %v7496_v0  ;;  %5592 = vmatmul.msk.f32.gmra.mxu2 %vm1731_vm13, %v7496_v0  ;;  %v3225_v27 = vpop.f32.mrf.mxu3 }
 0x583   : > { %v7585_v23 = vadd.f32 %v3225_v27, %v7409_v41  ;;  %v4035_v41 = vpop.permute.xlu2 %4034 }
 0x584   : > { %v4043_v27 = vsel %vm788_vm7, %v4033_v31, %v4035_v41  ;;  %vm4829_vm7 = vcmask 261120  }
 0x585   : > { %8674 = vst [vmem:[#allocation64_spill] sm:$0xff] %v7585_v23  ;;  %v7587_v60 = vpop.f32.mrf.mxu0  ;;  %v3205_v33 = vpop.f32.mrf.mxu2 }
 0x586   : > { %8675 = vst [vmem:[#allocation65_spill] sm:$0xff] %v7587_v60  ;;  %v7590_v52 = vadd.f32 %v3205_v33, %v7413_v17  ;;  %v7606_v17 = vld [vmem:[%s8609_s5 + $0x40] sm:$0xff]  ;;  %v4355_v33 = vsel %vm4354_vm9, %v4337_v28, %v4339_v55 }
 0x587   : > { %v7597_v16 = vpop.f32.mrf.mxu1  ;;  %5595 = vmatmul.msk.f32.gmra.mxu3 %vm1731_vm13, %v7450_v49 }
 0x588   : > { %8676 = vst [vmem:[#allocation66_spill] sm:$0xff] %v7590_v52  ;;  %5600 = vmatmul.msk.f32.gmra.mxu0 %vm1731_vm13, %v7450_v49  ;;  %v7611_v52 = vperm.slane %v7595_v56, 0 }
 0x589   : > { %8677 = vst [vmem:[#allocation67_spill] sm:$0xff] %v7597_v16 }
 0x58a   : > { %5604 = vmatmul.msk.f32.vlgmr.msra.gmra.mxu1 %vm1731_vm13, %v7424_v21  ;;  %5609 = vmatmul.msk.f32.vlgmr.msra.gmra.mxu2 %vm1731_vm13, %v7606_v17  ;;  %v3228_v16 = vpop.f32.mrf.mxu3  ;;  %v2637_v41 = vmul.f32 %v7611_v52, %v7088_v61 }
 0x58b   : > { %5643 = vmatpush.msk.msra.mxu1 %vm1744_vm12, %v4043_v27  ;;  %5652 = vmatpush.msk.msra.mxu2 %vm1744_vm12, %v4355_v33  ;;  %v7620_v23 = vadd.f32 %v3228_v16, %v7432_v1  ;;  %v7636_v1 = vld [vmem:[%s8609_s5 + $0x48] sm:$0xff] }
 0x58d   : > { %v7622_v31 = vpop.f32.mrf.mxu0  ;;  %v3399_v28 = vpop.f32.mrf.mxu2 }
 0x58e   : > { %v3614_v60 = vadd.f32 %v3399_v28, %v7439_v63  ;;  %v2645_v28 = vmul.f32 %v7611_v52, %v7112_v43 }
 0x58f   : > { %v7627_v21 = vpop.f32.mrf.mxu1  ;;  %5596 = vmatmul.msk.f32.gmra.mxu3 %vm1731_vm13, %v7472_v3 }
 0x590   : > { %8678 = vst [vmem:[#allocation68_spill] sm:$0xff] %v7627_v21  ;;  %5601 = vmatmul.msk.f32.gmra.mxu0 %vm1731_vm13, %v7472_v3  ;;  %v7638_v16 = vadd.f32 %v3614_v60, %v2637_v41  ;;  %v4343_v41 = vpop.permute.xlu0 %4342 }
 0x592   : > { %8679 = vst [vmem:[#allocation69_spill] sm:$0xff] %v7638_v16  ;;  %5605 = vmatmul.msk.f32.gmra.mxu1 %vm1731_vm13, %v7450_v49  ;;  %5610 = vmatmul.msk.f32.gmra.mxu2 %vm1731_vm13, %v7636_v1  ;;  %v3231_v63 = vpop.f32.mrf.mxu3  ;;  %v7661_v49 = vld [vmem:[%s8609_s5 + $0x50] sm:$0xff]  ;;  %v4341_v16 = vpop.permute.xlu2 %4340 }
 0x593   : > { %v7645_v61 = vadd.f32 %v3231_v63, %v7456_v54 }
 0x595   : > { %v7647_v27 = vpop.f32.mrf.mxu0  ;;  %v3402_v33 = vpop.f32.mrf.mxu2 }
 0x596   : > { %v3622_v21 = vadd.f32 %v3402_v33, %v7461_v46 }
 0x597   : > { %v7652_v60 = vpop.f32.mrf.mxu1  ;;  %5597 = vmatmul.msk.f32.gmra.mxu3 %vm1731_vm13, %v7496_v0 }
 0x598   : > { %8680 = vst [vmem:[#allocation70_spill] sm:$0xff] %v7652_v60  ;;  %5602 = vmatmul.msk.f32.gmra.mxu0 %vm1731_vm13, %v7496_v0  ;;  %v7663_v54 = vadd.f32 %v3622_v21, %v2645_v28  ;;  %v2653_v60 = vmul.f32 %v7611_v52, %v7136_v39  ;;  %v4356_v28 = vsel %vm4354_vm9, %v4339_v55, %v4341_v16  ;;  %v7693_v39 = vld [vmem:[%s8609_s5 + $0x58] sm:$0xff] }
 0x59a   : > { %8681 = vst [vmem:[#allocation71_spill] sm:$0xff] %v7663_v54  ;;  %5606 = vmatmul.msk.f32.gmra.mxu1 %vm1731_vm13, %v7472_v3  ;;  %5611 = vmatmul.msk.f32.gmra.mxu2 %vm1731_vm13, %v7661_v49  ;;  %v3234_v43 = vpop.f32.mrf.mxu3  ;;  %v2115_v3 = vadd.f32 %v6979_v51, %v6798_v57  ;;  %v4357_v54 = vsel %vm4354_vm9, %v4341_v16, %v4343_v41  ;;  %v7707_v16 = vperm.slane %v7595_v56, 2 }
 0x59b   : > { %v7670_v46 = vadd.f32 %v3234_v43, %v7478_v25  ;;  %v7682_v25 = vperm.slane %v7595_v56, 1  ;;  %v2141_v51 = vadd.f32 %v6984_v58, %v6821_v6  ;;  %v7716_v58 = vperm.slane %v7595_v56, 3 }
 0x59c   : > { %v2597_v57 = vadd.f32 %v7161_v48, %v2115_v3 }
 0x59d   : > { %v7672_v63 = vpop.f32.mrf.mxu0  ;;  %v3405_v33 = vpop.f32.mrf.mxu2  ;;  %v2590_v6 = vadd.f32 %v7166_v12, %v2141_v51  ;;  %v2118_v12 = vadd.f32 %v7000_v10, %v6827_v7 }
 0x59e   : > { %v3630_v21 = vadd.f32 %v3405_v33, %v7483_v50  ;;  %v2647_v33 = vmul.f32 %v7707_v16, %v2597_v57  ;;  %v7734_v57 = vpop.permute.xlu2 %4346 }
 0x59f   : > { %v7684_v43 = vpop.f32.mrf.mxu1  ;;  %5614 = vmatmul.msk.f32.vlgmr.msra.gmra.mxu3 %vm1731_vm13, %v7606_v17  ;;  %v2605_v7 = vadd.f32 %v7184_v40, %v2118_v12  ;;  %v2646_v40 = vmul.f32 %v7682_v25, %v7182_v36  ;;  %v8684_v12 = vld [vmem:[#allocation31_spill] sm:$0xff] }
 0x5a0   : > { %5619 = vmatmul.msk.f32.vlgmr.msrb.gmra.mxu0 %vm1731_vm13, %v7606_v17  ;;  %v7695_v50 = vadd.f32 %v3630_v21, %v2653_v60  ;;  %5657 = vmatpush.msk.msra.mxu3 %vm1744_vm12, %v4356_v28  ;;  %v2638_v60 = vmul.f32 %v7682_v25, %v7159_v8  ;;  %v2661_v8 = vmul.f32 %v7611_v52, %v7164_v14 }
 0x5a1   : > { %5662 = vmatpush.msk.msrb.mxu0 %vm1744_vm12, %v4357_v54  ;;  %v3142_v54 = vadd.f32 %v7507_v22, %v7339_v19  ;;  %v3168_v19 = vadd.f32 %v7512_v5, %v7343_v44  ;;  %v2640_v14 = vmul.f32 %v7716_v58, %v2590_v6  ;;  %v2144_v5 = vadd.f32 %v7005_v29, %v6839_v2 }
 0x5a2   : > { %8682 = vst [vmem:[#allocation72_spill] sm:$0xff] %v7695_v50  ;;  %5607 = vmatmul.msk.f32.gmra.mxu1 %vm1731_vm13, %v7496_v0  ;;  %5612 = vmatmul.msk.f32.gmra.mxu2 %vm1731_vm13, %v7693_v39  ;;  %v3428_v55 = vpop.f32.mrf.mxu3  ;;  %v4345_v50 = vpop.permute.xlu1 %4344 }
 0x5a3   : > { %v3615_v48 = vadd.f32 %v3428_v55, %v7505_v38  ;;  %v4358_v10 = vsel %vm4354_vm9, %v4343_v41, %v4345_v50  ;;  %v7746_v55 = vperm.slane %v7595_v56, 4  ;;  %v3145_v41 = vadd.f32 %v7529_v35, %v7359_v11 }
 0x5a4   : > { %v2598_v29 = vadd.f32 %v7189_v34, %v2144_v5  ;;  %v3171_v11 = vadd.f32 %v7534_v37, %v7363_v24  ;;  %v2654_v37 = vmul.f32 %v7682_v25, %v7201_v9  ;;  %v8686_v5 = vld [vmem:[#allocation49_spill] sm:$0xff] }
 0x5a5   : > { %v3460_v0 = vpop.f32.mrf.mxu0  ;;  %v7719_v21 = vadd.f32 %v3615_v48, %v2638_v60  ;;  %v3408_v28 = vpop.f32.mrf.mxu2  ;;  %v2655_v48 = vmul.f32 %v7707_v16, %v2605_v7  ;;  %v2641_v36 = vmul.f32 %v7746_v55, %v7187_v4  ;;  %v8685_v7 = vld [vmem:[#allocation30_spill] sm:$0xff] }
 0x5a6   : > { %v3624_v3 = vadd.f32 %v3460_v0, %v3142_v54  ;;  %v3638_v38 = vadd.f32 %v3408_v28, %v7510_v42  ;;  %v4359_v42 = vsel %vm4354_vm9, %v4345_v50, %v7734_v57 }
 0x5a7   : > { %v3486_v51 = vpop.f32.mrf.mxu1  ;;  %5615 = vmatmul.msk.f32.gmra.mxu3 %vm1731_vm13, %v7636_v1 }
 0x5a8   : > { %v7728_v22 = vadd.f32 %v3624_v3, %v2647_v33  ;;  %5620 = vmatmul.msk.f32.gmra.mxu0 %vm1731_vm13, %v7636_v1  ;;  %v7737_v52 = vadd.f32 %v3638_v38, %v2661_v8  ;;  %v3617_v44 = vadd.f32 %v3486_v51, %v3168_v19  ;;  %v2648_v3 = vmul.f32 %v7716_v58, %v2598_v29  ;;  %v8683_v38 = vld [vmem:[#allocation60_spill] sm:$0xff] }
 0x5a9   : > { %v3148_v19 = vadd.f32 %v7547_v30, %v7375_v26  ;;  %v8689_v26 = vld [vmem:[#allocation10_spill] sm:$0xff]  ;;  %v8690_v30 = vld [vmem:[#allocation20_spill] sm:$0xff] }
 0x5aa   : > { %v7748_v60 = vadd.f32 %v3617_v44, %v2640_v14  ;;  %5624 = vmatmul.msk.f32.vlgmr.msrb.gmra.mxu1 %vm1731_vm13, %v7606_v17  ;;  %5629 = vmatmul.msk.f32.vlgmr.msrb.gmra.mxu2 %vm1731_vm13, %v7606_v17  ;;  %v3431_v54 = vpop.f32.mrf.mxu3 }
 0x5ab   : > { %5667 = vmatpush.msk.msrb.mxu1 %vm1744_vm12, %v4358_v10  ;;  %5672 = vmatpush.msk.msrb.mxu2 %vm1744_vm12, %v4359_v42  ;;  %v3623_v2 = vadd.f32 %v3431_v54, %v7527_v59  ;;  %v2121_v59 = vadd.f32 %v7017_v62, %v6851_v13  ;;  %v2649_v10 = vmul.f32 %v7746_v55, %v8685_v7  ;;  %v8687_v54 = vld [vmem:[#allocation62_spill] sm:$0xff] }
 0x5ac   : > { %v3174_v9 = vadd.f32 %v8687_v54, %v8686_v5  ;;  %v8699_v54 = vld [vmem:[#allocation34_spill] sm:$0xff] }
 0x5ad   : > { %v3463_v50 = vpop.f32.mrf.mxu0  ;;  %v7763_v6 = vadd.f32 %v3623_v2, %v2646_v40  ;;  %v3515_v0 = vpop.f32.mrf.mxu2  ;;  %v2613_v24 = vadd.f32 %v7203_v47, %v2121_v59  ;;  %v8688_v40 = vld [vmem:[#allocation61_spill] sm:$0xff]  ;;  %v2228_v2 = vadd.f32 %v8690_v30, %v8689_v26  ;;  %v8692_v59 = vld [vmem:[#allocation11_spill] sm:$0xff]  ;;  %v8702_v26 = vld [vmem:[#allocation12_spill] sm:$0xff] }
 0x5ae   : > { %v3632_v33 = vadd.f32 %v3463_v50, %v3145_v41  ;;  %v3618_v35 = vadd.f32 %v3515_v0, %v7532_v53  ;;  %v2147_v53 = vadd.f32 %v7022_v20, %v6855_v15  ;;  %v8703_v30 = vld [vmem:[#allocation22_spill] sm:$0xff] }
 0x5af   : > { %v3489_v34 = vpop.f32.mrf.mxu1  ;;  %5616 = vmatmul.msk.f32.gmra.mxu3 %vm1731_vm13, %v7661_v49  ;;  %v2663_v20 = vmul.f32 %v7707_v16, %v2613_v24 }
 0x5b0   : > { %v7772_v28 = vadd.f32 %v3632_v33, %v2655_v48  ;;  %5621 = vmatmul.msk.f32.gmra.mxu0 %vm1731_vm13, %v7661_v49  ;;  %v7779_v4 = vadd.f32 %v3618_v35, %v2641_v36  ;;  %v3625_v8 = vadd.f32 %v3489_v34, %v3171_v11  ;;  %v2606_v51 = vadd.f32 %v8684_v12, %v2147_v53  ;;  %v8691_v36 = vld [vmem:[#allocation33_spill] sm:$0xff]  ;;  %v4349_v53 = vpop.permute.xlu0 %4348  ;;  %v4351_v12 = vpop.permute.xlu1 %4350 }
 0x5b1   : > { %v2593_v11 = vadd.f32 %v8691_v36, %v2228_v2  ;;  %v7817_v35 = vperm.slane %v7595_v56, 6  ;;  %v8693_v34 = vld [vmem:[#allocation21_spill] sm:$0xff]  ;;  %v4360_v5 = vsel %vm4354_vm9, %v7734_v57, %v4349_v53  ;;  %v2231_v2 = vadd.f32 %v8703_v30, %v8702_v26  ;;  %v8719_v30 = vld [vmem:[#allocation66_spill] sm:$0xff] }
 0x5b2   : > { %v7784_v13 = vadd.f32 %v3625_v8, %v2648_v3  ;;  %5625 = vmatmul.msk.f32.gmra.mxu1 %vm1731_vm13, %v7636_v1  ;;  %5630 = vmatmul.msk.f32.gmra.mxu2 %vm1731_vm13, %v7636_v1  ;;  %v3434_v62 = vpop.f32.mrf.mxu3  ;;  %v2656_v48 = vmul.f32 %v7716_v58, %v2606_v51  ;;  %v2150_v3 = vadd.f32 %v8693_v34, %v8692_v59  ;;  %v8697_v51 = vld [vmem:[#allocation35_spill] sm:$0xff]  ;;  %v8707_v34 = vld [vmem:[#allocation13_spill] sm:$0xff] }
 0x5b3   : > { %v3631_v47 = vadd.f32 %v3434_v62, %v8683_v38  ;;  %v8695_v62 = vld [vmem:[#allocation32_spill] sm:$0xff] }
 0x5b5   : > { %v3466_v15 = vpop.f32.mrf.mxu0  ;;  %v7797_v14 = vadd.f32 %v3631_v47, %v2654_v37  ;;  %v3518_v44 = vpop.f32.mrf.mxu2  ;;  %v2662_v37 = vmul.f32 %v7682_v25, %v8695_v62  ;;  %v2657_v25 = vmul.f32 %v7746_v55, %v8699_v54  ;;  %v8710_v62 = vld [vmem:[#allocation36_spill] sm:$0xff] }
 0x5b6   : > { %v3640_v42 = vadd.f32 %v3466_v15, %v3148_v19  ;;  %v3626_v41 = vadd.f32 %v3518_v44, %v8688_v40  ;;  %v8696_v19 = vld [vmem:[#allocation50_spill] sm:$0xff]  ;;  %v2614_v15 = vadd.f32 %v8697_v51, %v2150_v3  ;;  %v2643_v44 = vmul.f32 %v7817_v35, %v2593_v11  ;;  %v8706_v11 = vld [vmem:[#allocation37_spill] sm:$0xff]  ;;  %v8708_v3 = vld [vmem:[#allocation23_spill] sm:$0xff] }
 0x5b7   : > { %v3492_v50 = vpop.f32.mrf.mxu1  ;;  %5617 = vmatmul.msk.f32.gmra.mxu3 %vm1731_vm13, %v7693_v39  ;;  %v3255_v38 = vadd.f32 %v7565_v18, %v8696_v19  ;;  %v2601_v59 = vadd.f32 %v8706_v11, %v2231_v2  ;;  %v8711_v19 = vld [vmem:[#allocation52_spill] sm:$0xff] }
 0x5b8   : > { %v7806_v29 = vadd.f32 %v3640_v42, %v2663_v20  ;;  %5622 = vmatmul.msk.f32.gmra.mxu0 %vm1731_vm13, %v7693_v39  ;;  %v7813_v0 = vadd.f32 %v3626_v41, %v2649_v10  ;;  %v3633_v33 = vadd.f32 %v3492_v50, %v3174_v9  ;;  %v8700_v9 = vld [vmem:[#allocation51_spill] sm:$0xff]  ;;  %v4361_v41 = vsel %vm4354_vm9, %v4349_v53, %v4351_v12  ;;  %v8713_v51 = vld [vmem:[#allocation64_spill] sm:$0xff] }
 0x5b9   : > { %v3177_v18 = vadd.f32 %v7572_v32, %v8700_v9  ;;  %v7847_v50 = vperm.slane %v7595_v56, 5  ;;  %v2664_v32 = vmul.f32 %v7716_v58, %v2614_v15 }
 0x5ba   : > { %v7821_v8 = vadd.f32 %v3633_v33, %v2656_v48  ;;  %5626 = vmatmul.msk.f32.gmra.mxu1 %vm1731_vm13, %v7661_v49  ;;  %5631 = vmatmul.msk.f32.gmra.mxu2 %vm1731_vm13, %v7661_v49  ;;  %v3437_v24 = vpop.f32.mrf.mxu3 }
 0x5bb   : > { %v3639_v47 = vadd.f32 %v3437_v24, %v7563_v45  ;;  %v8701_v45 = vld [vmem:[#allocation63_spill] sm:$0xff]  ;;  %v2257_v24 = vadd.f32 %v8708_v3, %v8707_v34 }
 0x5bc   : > { %8694 = vst [vmem:[#allocation60_spill] sm:$0xff] %v7821_v8 }
 0x5bd   : > { %v3573_v20 = vpop.f32.mrf.mxu0  ;;  %v7834_v42 = vadd.f32 %v3639_v47, %v2662_v37  ;;  %v3521_v7 = vpop.f32.mrf.mxu2  ;;  %v2642_v37 = vmul.f32 %v7847_v50, %v8710_v62 }
 0x5be   : > { %v3620_v10 = vadd.f32 %v3573_v20, %v3255_v38  ;;  %v3634_v40 = vadd.f32 %v3521_v7, %v8701_v45  ;;  %v8712_v38 = vld [vmem:[#allocation65_spill] sm:$0xff]  ;;  %v8714_v20 = vld [vmem:[#allocation39_spill] sm:$0xff]  ;;  %v7876_v7 = vperm.slane %v7595_v56, 7 }
 0x5bf   : > { %8698 = vst [vmem:[#allocation31_spill] sm:$0xff] %v7834_v42  ;;  %v3495_v33 = vpop.f32.mrf.mxu1  ;;  %5634 = vmatmul.msk.f32.vlgmr.msrb.gmra.mxu3 %vm1731_vm13, %v7606_v17  ;;  %v3258_v47 = vadd.f32 %v8712_v38, %v8711_v19  ;;  %v8725_v19 = vld [vmem:[#allocation15_spill] sm:$0xff]  ;;  %v8726_v38 = vld [vmem:[#allocation25_spill] sm:$0xff] }
 0x5c0   : > { %v7849_v48 = vadd.f32 %v3620_v10, %v2643_v44  ;;  %5639 = vmatmul.msk.f32.vlgmr.msra.gmra.mxu0 %vm1731_vm13, %v7606_v17  ;;  %v7856_v57 = vadd.f32 %v3634_v40, %v2657_v25  ;;  %v3641_v36 = vadd.f32 %v3495_v33, %v3177_v18  ;;  %5677 = vmatpush.msk.msrb.mxu3 %vm1744_vm12, %v4360_v5  ;;  %v8716_v18 = vld [vmem:[#allocation38_spill] sm:$0xff]  ;;  %v8717_v40 = vld [vmem:[#allocation53_spill] sm:$0xff] }
 0x5c1   : > { %5682 = vmatpush.msk.msra.mxu0 %vm1744_vm12, %v4361_v41  ;;  %v2594_v44 = vadd.f32 %v8714_v20, %v2257_v24  ;;  %v2651_v5 = vmul.f32 %v7817_v35, %v2601_v59  ;;  %v2665_v45 = vmul.f32 %v7746_v55, %v8716_v18  ;;  %v8718_v41 = vld [vmem:[#allocation67_spill] sm:$0xff]  ;;  %v8720_v33 = vld [vmem:[#allocation14_spill] sm:$0xff]  ;;  %v4353_v24 = vpop.permute.xlu2 %4352  ;;  %v8728_v20 = vld [vmem:[#allocation40_spill] sm:$0xff] }
 0x5c2   : > { %8704 = vst [vmem:[#allocation30_spill] sm:$0xff] %v7849_v48  ;;  %v7863_v53 = vadd.f32 %v3641_v36, %v2664_v32  ;;  %5627 = vmatmul.msk.f32.gmra.mxu1 %vm1731_vm13, %v7693_v39  ;;  %5632 = vmatmul.msk.f32.gmra.mxu2 %vm1731_vm13, %v7693_v39  ;;  %v3544_v58 = vpop.f32.mrf.mxu3  ;;  %v3284_v26 = vadd.f32 %v8718_v41, %v8717_v40  ;;  %v8721_v32 = vld [vmem:[#allocation24_spill] sm:$0xff]  ;;  %v7897_v55 = vld [vmem:[%s8609_s5 + $0x100] sm:$0xff] }
 0x5c3   : > { %8705 = vst [vmem:[#allocation49_spill] sm:$0xff] %v7856_v57  ;;  %v3619_v15 = vadd.f32 %v3544_v58, %v8713_v51  ;;  %v2234_v36 = vadd.f32 %v8721_v32, %v8720_v33  ;;  %v2644_v59 = vmul.f32 %v7876_v7, %v2594_v44  ;;  %v8724_v58 = vld [vmem:[#allocation41_spill] sm:$0xff]  ;;  %v2650_v44 = vmul.f32 %v7847_v50, %v8728_v20  ;;  %v8734_v33 = vld [vmem:[#allocation16_spill] sm:$0xff]  ;;  %v8735_v32 = vld [vmem:[#allocation26_spill] sm:$0xff] }
 0x5c4   : > { %8709 = vst [vmem:[#allocation62_spill] sm:$0xff] %v7863_v53  ;;  %v8741_v20 = vld [vmem:[#allocation43_spill] sm:$0xff] }
 0x5c5   : > { %v3576_v10 = vpop.f32.mrf.mxu0  ;;  %v7879_v54 = vadd.f32 %v3619_v15, %v2642_v37  ;;  %v3524_v25 = vpop.f32.mrf.mxu2  ;;  %v2609_v62 = vadd.f32 %v8724_v58, %v2234_v36  ;;  %v4362_v37 = vsel %vm4354_vm9, %v4351_v12, %v4353_v24  ;;  %v8737_v58 = vld [vmem:[#allocation44_spill] sm:$0xff] }
 0x5c6   : > { %v3628_v9 = vadd.f32 %v3576_v10, %v3258_v47  ;;  %v3642_v2 = vadd.f32 %v3524_v25, %v8719_v30  ;;  %v2260_v47 = vadd.f32 %v8726_v38, %v8725_v19  ;;  %v8729_v10 = vld [vmem:[#allocation54_spill] sm:$0xff]  ;;  %v8733_v30 = vld [vmem:[#allocation68_spill] sm:$0xff]  ;;  %v8739_v19 = vld [vmem:[#allocation27_spill] sm:$0xff] }
 0x5c7   : > { %8715 = vst [vmem:[#allocation61_spill] sm:$0xff] %v7879_v54  ;;  %v3602_v11 = vpop.f32.mrf.mxu1  ;;  %5635 = vmatmul.msk.f32.gmra.mxu3 %vm1731_vm13, %v7636_v1  ;;  %v8730_v25 = vld [vmem:[#allocation42_spill] sm:$0xff] }
 0x5c8   : > { %v7888_v56 = vadd.f32 %v3628_v9, %v2651_v5  ;;  %5640 = vmatmul.msk.f32.gmra.mxu0 %vm1731_vm13, %v7636_v1  ;;  %v7900_v34 = vadd.f32 %v3642_v2, %v2665_v45  ;;  %v3621_v3 = vadd.f32 %v3602_v11, %v3284_v26  ;;  %v3261_v5 = vadd.f32 %v7622_v31, %v8729_v10  ;;  %v8732_v26 = vld [vmem:[#allocation55_spill] sm:$0xff]  ;;  %v8742_v10 = vld [vmem:[#allocation56_spill] sm:$0xff] }
 0x5c9   : > { %v2602_v9 = vadd.f32 %v8730_v25, %v2260_v47  ;;  %v2659_v45 = vmul.f32 %v7817_v35, %v2609_v62  ;;  %v3287_v2 = vadd.f32 %v8733_v30, %v8732_v26  ;;  %v2237_v31 = vadd.f32 %v8735_v32, %v8734_v33  ;;  %v8743_v25 = vld [vmem:[#allocation45_spill] sm:$0xff] }
 0x5ca   : > { %8722 = vst [vmem:[#allocation10_spill] sm:$0xff] %v7888_v56  ;;  %v7906_v51 = vadd.f32 %v3621_v3, %v2644_v59  ;;  %5644 = vmatmul.msk.f32.vlgmr.msra.gmra.mxu1 %vm1731_vm13, %v7606_v17  ;;  %5653 = vmatmul.msk.f32.vlgmr.msra.gmra.mxu2 %vm1731_vm13, %v7897_v55  ;;  %v3547_v15 = vpop.f32.mrf.mxu3  ;;  %v4740_v59 = vld [vmem:[%s8610_s6 + $0x10] sm:$0xff] }
 0x5cb   : > { %8723 = vst [vmem:[#allocation20_spill] sm:$0xff] %v7900_v34  ;;  %5687 = vmatpush.msk.msra.mxu1 %vm1744_vm12, %v4362_v37  ;;  %v3627_v12 = vadd.f32 %v3547_v15, %v7620_v23  ;;  %v7937_v23 = vld [vmem:[%s8609_s5 + $0x108] sm:$0xff]  ;;  %v2652_v3 = vmul.f32 %v7876_v7, %v2602_v9  ;;  %4754 = vperm.xlu1 %5816, %v4740_v59   ;;  %v8738_v37 = vld [vmem:[#allocation17_spill] sm:$0xff] }
 0x5cc   : > { %8727 = vst [vmem:[#allocation33_spill] sm:$0xff] %v7906_v51  ;;  %v2617_v62 = vadd.f32 %v8737_v58, %v2237_v31  ;;  %v2263_v38 = vadd.f32 %v8739_v19, %v8738_v37  ;;  %v8745_v30 = vld [vmem:[#allocation57_spill] sm:$0xff] }
 0x5cd   : > { %v3579_v18 = vpop.f32.mrf.mxu0  ;;  %v7920_v17 = vadd.f32 %v3627_v12, %v2650_v44  ;;  %v7922_v40 = vpop.f32.mrf.mxu2  ;;  %v2658_v44 = vmul.f32 %v7847_v50, %v8741_v20  ;;  %v8749_v59 = vld [vmem:[#allocation29_spill] sm:$0xff] }
 0x5ce   : > { %v3636_v41 = vadd.f32 %v3579_v18, %v3261_v5  ;;  %v3264_v5 = vadd.f32 %v7647_v27, %v8742_v10  ;;  %v2610_v9 = vadd.f32 %v8743_v25, %v2263_v38  ;;  %v8752_v38 = vld [vmem:[#allocation48_spill] sm:$0xff] }
 0x5cf   : > { %8731 = vst [vmem:[#allocation11_spill] sm:$0xff] %v7920_v17  ;;  %v3605_v11 = vpop.f32.mrf.mxu1  ;;  %5636 = vmatmul.msk.f32.gmra.mxu3 %vm1731_vm13, %v7661_v49 }
 0x5d0   : > { %v7928_v36 = vadd.f32 %v3636_v41, %v2659_v45  ;;  %5641 = vmatmul.msk.f32.gmra.mxu0 %vm1731_vm13, %v7661_v49  ;;  %v3629_v24 = vadd.f32 %v3605_v11, %v3287_v2  ;;  %v2667_v45 = vmul.f32 %v7817_v35, %v2617_v62  ;;  %v8746_v2 = vld [vmem:[#allocation70_spill] sm:$0xff]  ;;  %v2660_v27 = vmul.f32 %v7876_v7, %v2610_v9  ;;  %v8748_v11 = vld [vmem:[#allocation19_spill] sm:$0xff] }
 0x5d1   : > { %v3290_v33 = vadd.f32 %v8746_v2, %v8745_v30  ;;  %v8751_v62 = vld [vmem:[#allocation46_spill] sm:$0xff] }
 0x5d2   : > { %8736 = vst [vmem:[#allocation21_spill] sm:$0xff] %v7928_v36  ;;  %v7946_v47 = vadd.f32 %v3629_v24, %v2652_v3  ;;  %5645 = vmatmul.msk.f32.gmra.mxu1 %vm1731_vm13, %v7636_v1  ;;  %5654 = vmatmul.msk.f32.gmra.mxu2 %vm1731_vm13, %v7937_v23  ;;  %v3550_v15 = vpop.f32.mrf.mxu3  ;;  %v2266_v3 = vadd.f32 %v8749_v59, %v8748_v11 }
 0x5d3   : > { %v3635_v12 = vadd.f32 %v3550_v15, %v7645_v61  ;;  %v7974_v61 = vld [vmem:[%s8609_s5 + $0x110] sm:$0xff]  ;;  %v2666_v37 = vmul.f32 %v7847_v50, %v8751_v62  ;;  %v4739_v50 = vld [vmem:[%s8610_s6 + $0x8] sm:$0xff] }
 0x5d4   : > { %8740 = vst [vmem:[#allocation32_spill] sm:$0xff] %v7946_v47  ;;  %v2618_v15 = vadd.f32 %v8752_v38, %v2266_v3  ;;  %4749 = vperm.xlu2 %5817, %v4739_v50  }
 0x5d5   : > { %v3582_v18 = vpop.f32.mrf.mxu0  ;;  %v7959_v41 = vadd.f32 %v3635_v12, %v2658_v44  ;;  %v7961_v1 = vpop.f32.mrf.mxu2 }
 0x5d6   : > { %v3644_v26 = vadd.f32 %v3582_v18, %v3264_v5  ;;  %v8754_v5 = vld [vmem:[#allocation59_spill] sm:$0xff]  ;;  %v2668_v25 = vmul.f32 %v7876_v7, %v2618_v15 }
 0x5d7   : > { %8744 = vst [vmem:[#allocation50_spill] sm:$0xff] %v7959_v41  ;;  %v3608_v31 = vpop.f32.mrf.mxu1  ;;  %5637 = vmatmul.msk.f32.gmra.mxu3 %vm1731_vm13, %v7693_v39 }
 0x5d8   : > { %v7965_v32 = vadd.f32 %v3644_v26, %v2667_v45  ;;  %5642 = vmatmul.msk.f32.gmra.mxu0 %vm1731_vm13, %v7693_v39  ;;  %v3637_v35 = vadd.f32 %v3608_v31, %v3290_v33 }
 0x5da   : > { %8747 = vst [vmem:[#allocation35_spill] sm:$0xff] %v7965_v32  ;;  %v7979_v24 = vadd.f32 %v3637_v35, %v2660_v27  ;;  %5646 = vmatmul.msk.f32.gmra.mxu1 %vm1731_vm13, %v7661_v49  ;;  %5655 = vmatmul.msk.f32.gmra.mxu2 %vm1731_vm13, %v7974_v61  ;;  %v3553_v58 = vpop.f32.mrf.mxu3  ;;  %v3293_v49 = vadd.f32 %v7684_v43, %v8754_v5 }
 0x5db   : > { %v3643_v19 = vadd.f32 %v3553_v58, %v7670_v46  ;;  %v8004_v46 = vld [vmem:[%s8609_s5 + $0x118] sm:$0xff] }
 0x5dc   : > { %8750 = vst [vmem:[#allocation34_spill] sm:$0xff] %v7979_v24 }
 0x5dd   : > { %v7989_v20 = vpop.f32.mrf.mxu0  ;;  %v7991_v44 = vadd.f32 %v3643_v19, %v2666_v37  ;;  %v7993_v10 = vpop.f32.mrf.mxu2 }
 0x5df   : > { %8753 = vst [vmem:[#allocation51_spill] sm:$0xff] %v7991_v44  ;;  %v3611_v12 = vpop.f32.mrf.mxu1  ;;  %5658 = vmatmul.msk.f32.vlgmr.msra.gmra.mxu3 %vm1731_vm13, %v7897_v55 }
 0x5e0   : > { %5663 = vmatmul.msk.f32.vlgmr.msrb.gmra.mxu0 %vm1731_vm13, %v7897_v55  ;;  %v3645_v9 = vadd.f32 %v3611_v12, %v3293_v49 }
 0x5e2   : > { %v8010_v43 = vadd.f32 %v3645_v9, %v2668_v25  ;;  %5647 = vmatmul.msk.f32.gmra.mxu1 %vm1731_vm13, %v7693_v39  ;;  %5656 = vmatmul.msk.f32.gmra.mxu2 %vm1731_vm13, %v8004_v46  ;;  %v8016_v18 = vpop.f32.mrf.mxu3 }
 0x5e4   : > { %8755 = vst [vmem:[#allocation63_spill] sm:$0xff] %v8010_v43 }
 0x5e5   : > { %v8018_v45 = vpop.f32.mrf.mxu0  ;;  %v8020_v26 = vpop.f32.mrf.mxu2 }
 0x5e7   : > { %v8022_v30 = vpop.f32.mrf.mxu1  ;;  %5659 = vmatmul.msk.f32.gmra.mxu3 %vm1731_vm13, %v7937_v23 }
 0x5e8   : > { %5664 = vmatmul.msk.f32.gmra.mxu0 %vm1731_vm13, %v7937_v23 }
 0x5ea   : > { %5668 = vmatmul.msk.f32.vlgmr.msrb.gmra.mxu1 %vm1731_vm13, %v7897_v55  ;;  %5673 = vmatmul.msk.f32.vlgmr.msrb.gmra.mxu2 %vm1731_vm13, %v7897_v55  ;;  %v8032_v39 = vpop.f32.mrf.mxu3 }
 0x5ed   : > { %v3850_v7 = vpop.f32.mrf.mxu0  ;;  %v3902_v2 = vpop.f32.mrf.mxu2 }
 0x5ef   : > { %v8034_v33 = vpop.f32.mrf.mxu1  ;;  %5660 = vmatmul.msk.f32.gmra.mxu3 %vm1731_vm13, %v7974_v61 }
 0x5f0   : > { %5665 = vmatmul.msk.f32.gmra.mxu0 %vm1731_vm13, %v7974_v61 }
 0x5f2   : > { %5669 = vmatmul.msk.f32.gmra.mxu1 %vm1731_vm13, %v7937_v23  ;;  %5674 = vmatmul.msk.f32.gmra.mxu2 %vm1731_vm13, %v7937_v23  ;;  %v3821_v31 = vpop.f32.mrf.mxu3 }
 0x5f5   : > { %v8044_v27 = vpop.f32.mrf.mxu0  ;;  %v3905_v35 = vpop.f32.mrf.mxu2 }
 0x5f7   : > { %v3879_v11 = vpop.f32.mrf.mxu1  ;;  %5661 = vmatmul.msk.f32.gmra.mxu3 %vm1731_vm13, %v8004_v46 }
 0x5f8   : > { %5666 = vmatmul.msk.f32.gmra.mxu0 %vm1731_vm13, %v8004_v46 }
 0x5fa   : > { %5670 = vmatmul.msk.f32.gmra.mxu1 %vm1731_vm13, %v7974_v61  ;;  %5675 = vmatmul.msk.f32.gmra.mxu2 %vm1731_vm13, %v7974_v61  ;;  %v8054_v59 = vpop.f32.mrf.mxu3 }
 0x5fd   : > { %v3960_v3 = vpop.f32.mrf.mxu0  ;;  %v3908_v58 = vpop.f32.mrf.mxu2 }
 0x5ff   : > { %v8056_v62 = vpop.f32.mrf.mxu1  ;;  %5678 = vmatmul.msk.f32.vlgmr.msrb.gmra.mxu3 %vm1731_vm13, %v7897_v55 }
 0x600   : > { %8756 = vst [vmem:[#allocation12_spill] sm:$0xff] %v8056_v62  ;;  %5683 = vmatmul.msk.f32.vlgmr.msra.gmra.mxu0 %vm1731_vm13, %v7897_v55 }
 0x602   : > { %5671 = vmatmul.msk.f32.gmra.mxu1 %vm1731_vm13, %v8004_v46  ;;  %5676 = vmatmul.msk.f32.gmra.mxu2 %vm1731_vm13, %v8004_v46  ;;  %v3931_v37 = vpop.f32.mrf.mxu3 }
 0x605   : > { %v3963_v19 = vpop.f32.mrf.mxu0  ;;  %v8066_v38 = vpop.f32.mrf.mxu2 }
 0x606   : > { %8757 = vst [vmem:[#allocation22_spill] sm:$0xff] %v8066_v38 }
 0x607   : > { %v3989_v15 = vpop.f32.mrf.mxu1  ;;  %5679 = vmatmul.msk.f32.gmra.mxu3 %vm1731_vm13, %v7937_v23 }
 0x608   : > { %5684 = vmatmul.msk.f32.gmra.mxu0 %vm1731_vm13, %v7937_v23 }
 0x60a   : > { %5688 = vmatmul.msk.f32.vlgmr.msra.gmra.mxu1 %vm1731_vm13, %v7897_v55  ;;  %v3934_v5 = vpop.f32.mrf.mxu3 }
 0x60d   : > { %v3966_v49 = vpop.f32.mrf.mxu0  ;;  %v4089_v12 = vpop.f32.mrf.mxu2 }
 0x60f   : > { %v3992_v50 = vpop.f32.mrf.mxu1  ;;  %5680 = vmatmul.msk.f32.gmra.mxu3 %vm1731_vm13, %v7974_v61 }
 0x610   : > { %5685 = vmatmul.msk.f32.gmra.mxu0 %vm1731_vm13, %v7974_v61 }
 0x612   : > { %5689 = vmatmul.msk.f32.gmra.mxu1 %vm1731_vm13, %v7937_v23  ;;  %v3937_v25 = vpop.f32.mrf.mxu3 }
 0x615   : > { %v8080_v9 = vpop.f32.mrf.mxu0  ;;  %v4092_v43 = vpop.f32.mrf.mxu2 }
 0x616   : > { %8758 = vst [vmem:[#allocation37_spill] sm:$0xff] %v8080_v9 }
 0x617   : > { %v3995_v44 = vpop.f32.mrf.mxu1  ;;  %5681 = vmatmul.msk.f32.gmra.mxu3 %vm1731_vm13, %v8004_v46 }
 0x618   : > { %5686 = vmatmul.msk.f32.gmra.mxu0 %vm1731_vm13, %v8004_v46 }
 0x61a   : > { %5690 = vmatmul.msk.f32.gmra.mxu1 %vm1731_vm13, %v7974_v61  ;;  %v8088_v55 = vpop.f32.mrf.mxu3 }
 0x61b   : > { %8759 = vst [vmem:[#allocation13_spill] sm:$0xff] %v8088_v55 }
 0x61d   : > { %v8090_v24 = vpop.f32.mrf.mxu0  ;;  %v4095_v32 = vpop.f32.mrf.mxu2 }
 0x61e   : > { %v8093_v23 = vadd.f32 %v4095_v32, %v7993_v10 }
 0x61f   : > { %v8095_v41 = vpop.f32.mrf.mxu1 }
 0x620   : > { %8760 = vst [vmem:[#allocation23_spill] sm:$0xff] %v8095_v41 }
 0x622   : > { %5691 = vmatmul.msk.f32.gmra.mxu1 %vm1731_vm13, %v8004_v46  ;;  %v8099_v47 = vpop.f32.mrf.mxu3 }
 0x625   : > { %v8101_v9 = vpop.f32.mrf.mxu0  ;;  %v8103_v36 = vpop.f32.mrf.mxu2 }
 0x627   : > { %v8105_v61 = vpop.f32.mrf.mxu1 }
 0x62a   : > { %v8107_v55 = vpop.f32.mrf.mxu3 }
 0x62d   : > { %v4153_v17 = vpop.f32.mrf.mxu0  ;;  %v4205_v51 = vpop.f32.mrf.mxu2 }
 0x62e   : > { %v8109_v34 = vadd.f32 %v4153_v17, %v3850_v7  ;;  %v8111_v32 = vadd.f32 %v4205_v51, %v3902_v2 }
 0x62f   : > { %v8113_v10 = vpop.f32.mrf.mxu1 }
 0x632   : > { %v4124_v41 = vpop.f32.mrf.mxu3 }
 0x633   : > { %v8115_v46 = vadd.f32 %v4124_v41, %v3821_v31 }
 0x635   : > { %v8117_v56 = vpop.f32.mrf.mxu0  ;;  %v4208_v54 = vpop.f32.mrf.mxu2 }
 0x636   : > { %v8119_v53 = vadd.f32 %v4208_v54, %v3905_v35 }
 0x637   : > { %v4182_v38 = vpop.f32.mrf.mxu1 }
 0x638   : > { %v8121_v57 = vadd.f32 %v4182_v38, %v3879_v11  ;;  %v4090_v38 = vadd.f32 %v4089_v12, %v7922_v40 }
 0x63a   : > { %v8123_v48 = vpop.f32.mrf.mxu3 }
 0x63d   : > { %v4263_v42 = vpop.f32.mrf.mxu0  ;;  %v4211_v17 = vpop.f32.mrf.mxu2 }
 0x63e   : > { %v8125_v7 = vadd.f32 %v4263_v42, %v3960_v3  ;;  %v8127_v51 = vadd.f32 %v4211_v17, %v3908_v58  ;;  %v8142_v42 = vld [vmem:[%s8611_s7 + $0x2] ss:$4 sm:$0xff] }
 0x63f   : > { %v8129_v2 = vpop.f32.mrf.mxu1 }
 0x640   : > { %8761 = vst [vmem:[#allocation36_spill] sm:$0xff] %v8127_v51 }
 0x642   : > { %v4234_v41 = vpop.f32.mrf.mxu3 }
 0x643   : > { %v8131_v31 = vadd.f32 %v4234_v41, %v3931_v37  ;;  %v4658_v37 = vperm.slane %v8142_v42, 0 }
 0x645   : > { %8762 = vst [vmem:[#allocation52_spill] sm:$0xff] %v8131_v31  ;;  %v4266_v62 = vpop.f32.mrf.mxu0  ;;  %v8133_v8 = vpop.f32.mrf.mxu2 }
 0x646   : > { %8763 = vst [vmem:[#allocation65_spill] sm:$0xff] %v8133_v8  ;;  %v8135_v54 = vadd.f32 %v4266_v62, %v3963_v19 }
 0x647   : > { %v4292_v35 = vpop.f32.mrf.mxu1 }
 0x648   : > { %8764 = vst [vmem:[#allocation64_spill] sm:$0xff] %v8135_v54  ;;  %v8137_v11 = vadd.f32 %v4292_v35, %v3989_v15 }
 0x64a   : > { %8765 = vst [vmem:[#allocation39_spill] sm:$0xff] %v8137_v11  ;;  %v4237_v3 = vpop.f32.mrf.mxu3  ;;  %v8768_v11 = vld [vmem:[#allocation69_spill] sm:$0xff] }
 0x64b   : > { %v8144_v58 = vadd.f32 %v4237_v3, %v3934_v5  ;;  %v4093_v5 = vadd.f32 %v4092_v43, %v7961_v1  ;;  %v4148_v43 = vadd.f32 %v8090_v24, %v7989_v20  ;;  %v8186_v20 = vperm.slane %v8142_v42, 1 }
 0x64d   : > { %8766 = vst [vmem:[#allocation38_spill] sm:$0xff] %v8144_v58  ;;  %v4269_v17 = vpop.f32.mrf.mxu0  ;;  %v4408_v41 = vpop.f32.mrf.mxu2  ;;  %v8770_v58 = vld [vmem:[#allocation9_spill] sm:$0xff] }
 0x64e   : > { %v8148_v8 = vadd.f32 %v4269_v17, %v3966_v49  ;;  %v4623_v62 = vadd.f32 %v4408_v41, %v4090_v38  ;;  %v8771_v49 = vld [vmem:[#allocation18_spill] sm:$0xff] }
 0x64f   : > { %v4295_v19 = vpop.f32.mrf.mxu1  ;;  %v2112_v17 = vadd.f32 %v8771_v49, %v8770_v58  ;;  %v8174_v58 = vperm.slane %v8142_v42, 2 }
 0x650   : > { %v4674_v15 = vmul.f32 %v4658_v37, %v4623_v62  ;;  %v8150_v35 = vadd.f32 %v4295_v19, %v3992_v50  ;;  %v8772_v50 = vld [vmem:[#allocation28_spill] sm:$0xff] }
 0x651   : > { %v2589_v19 = vadd.f32 %v8772_v50, %v2112_v17 }
 0x652   : > { %8767 = vst [vmem:[#allocation53_spill] sm:$0xff] %v8150_v35  ;;  %v8153_v54 = vadd.f32 %v4674_v15, %v8768_v11  ;;  %v4240_v31 = vpop.f32.mrf.mxu3  ;;  %v8773_v11 = vld [vmem:[#allocation47_spill] sm:$0xff]  ;;  %v8774_v15 = vld [vmem:[#allocation58_spill] sm:$0xff] }
 0x653   : > { %v8155_v51 = vadd.f32 %v4240_v31, %v3937_v25  ;;  %v3139_v35 = vadd.f32 %v8774_v15, %v8773_v11  ;;  %v8775_v25 = vld [vmem:[#allocation71_spill] sm:$0xff]  ;;  %v4099_v15 = vadd.f32 %v8103_v36, %v8020_v26 }
 0x655   : > { %8769 = vst [vmem:[#allocation67_spill] sm:$0xff] %v8155_v51  ;;  %v8158_v40 = vpop.f32.mrf.mxu0  ;;  %v4411_v12 = vpop.f32.mrf.mxu2  ;;  %v3616_v1 = vadd.f32 %v7672_v63, %v3139_v35  ;;  %v4119_v63 = vadd.f32 %v8099_v47, %v8016_v18  ;;  %v8776_v35 = vld [vmem:[#allocation72_spill] sm:$0xff] }
 0x656   : > { %v4631_v3 = vadd.f32 %v4411_v12, %v4093_v5 }
 0x657   : > { %v4298_v38 = vpop.f32.mrf.mxu1 }
 0x658   : > { %v4682_v41 = vmul.f32 %v4658_v37, %v4631_v3  ;;  %v8162_v62 = vadd.f32 %v4298_v38, %v3995_v44  ;;  %v2639_v44 = vmul.f32 %v7707_v16, %v2589_v19 }
 0x65a   : > { %v4714_v31 = vadd.f32 %v4682_v41, %v8775_v25  ;;  %v8168_v51 = vpop.f32.mrf.mxu3  ;;  %v3648_v17 = vadd.f32 %v3616_v1, %v2639_v44  ;;  %v8193_v1 = vpop.permute.xlu0 %4759 }
 0x65d   : > { %v4466_v5 = vpop.f32.mrf.mxu0  ;;  %v4414_v12 = vpop.f32.mrf.mxu2 }
 0x65e   : > { %v4625_v3 = vadd.f32 %v4466_v5, %v4148_v43  ;;  %v4639_v49 = vadd.f32 %v4414_v12, %v8093_v23  ;;  %v4151_v23 = vadd.f32 %v8101_v9, %v8018_v45  ;;  %v4177_v5 = vadd.f32 %v8105_v61, %v8022_v30 }
 0x65f   : > { %v8179_v41 = vpop.f32.mrf.mxu1  ;;  %v8199_v12 = vperm.slane %v8142_v42, 3 }
 0x660   : > { %v4676_v38 = vmul.f32 %v8174_v58, %v4625_v3  ;;  %v4690_v50 = vmul.f32 %v4658_v37, %v4639_v49  ;;  %v4122_v49 = vadd.f32 %v8107_v55, %v8032_v39  ;;  %v8221_v39 = vperm.slane %v8142_v42, 4 }
 0x662   : > { %v8183_v24 = vadd.f32 %v4676_v38, %v3648_v17  ;;  %v4722_v16 = vadd.f32 %v4690_v50, %v8776_v35  ;;  %v4437_v19 = vpop.f32.mrf.mxu3  ;;  %v8207_v17 = vpop.permute.xlu1 %4754 }
 0x663   : > { %v4624_v11 = vadd.f32 %v4437_v19, %v4119_v63 }
 0x665   : > { %v4469_v25 = vpop.f32.mrf.mxu0  ;;  %v4675_v47 = vmul.f32 %v8186_v20, %v4624_v11  ;;  %v4417_v18 = vpop.f32.mrf.mxu2  ;;  %v4180_v11 = vadd.f32 %v8113_v10, %v8034_v33 }
 0x666   : > { %v4633_v43 = vadd.f32 %v4469_v25, %v4151_v23  ;;  %v4647_v44 = vadd.f32 %v4417_v18, %v4099_v15 }
 0x667   : > { %v8202_v45 = vadd.f32 %v4675_v47, %v7719_v21  ;;  %v4495_v36 = vpop.f32.mrf.mxu1  ;;  %v8214_v21 = vpop.permute.xlu2 %4749 }
 0x668   : > { %v4684_v9 = vmul.f32 %v8174_v58, %v4633_v43  ;;  %v4698_v26 = vmul.f32 %v4658_v37, %v4647_v44  ;;  %v4626_v3 = vadd.f32 %v4495_v36, %v4177_v5  ;;  %v8230_v47 = vpop.permute.xlu0 %4744  ;;  %v4157_v36 = vadd.f32 %v8117_v56, %v8044_v27 }
 0x669   : > { %v4762_v33 = vadd.f32 %v8230_v47, %v8153_v54 }
 0x66a   : > { %v8210_v38 = vadd.f32 %v4684_v9, %v7728_v22  ;;  %v4730_v30 = vadd.f32 %v4698_v26, %v7737_v52  ;;  %v4677_v61 = vmul.f32 %v8199_v12, %v4626_v3  ;;  %v4440_v50 = vpop.f32.mrf.mxu3  ;;  %v4778_v22 = vadd.f32 %v8207_v17, %v4722_v16 }
 0x66b   : > { %v4632_v63 = vadd.f32 %v4440_v50, %v4122_v49  ;;  %v4794_v49 = vmax.f32 %v4762_v33, 0.0 }
 0x66c   : > { %v4786_v35 = vadd.f32 %v8193_v1, %v4730_v30  ;;  %v8218_v37 = vadd.f32 %v4677_v61, %v7748_v60  ;;  %v4770_v60 = vadd.f32 %v8214_v21, %v4714_v31 }
 0x66d   : > { %v4472_v55 = vpop.f32.mrf.mxu0  ;;  %v4683_v19 = vmul.f32 %v8186_v20, %v4632_v63  ;;  %v4524_v52 = vpop.f32.mrf.mxu2 }
 0x66e   : > { %v4641_v23 = vadd.f32 %v4472_v55, %v8109_v34  ;;  %v4818_v15 = vmax.f32 %v4786_v35, 0.0  ;;  %v4627_v25 = vadd.f32 %v4524_v52, %v8111_v32  ;;  %v4810_v34 = vmax.f32 %v4778_v22, 0.0 }
 0x66f   : > { %v8233_v18 = vadd.f32 %v4683_v19, %v7763_v6  ;;  %v4498_v43 = vpop.f32.mrf.mxu1  ;;  %v4802_v9 = vmax.f32 %v4770_v60, 0.0 }
 0x670   : > { %v4692_v16 = vmul.f32 %v8174_v58, %v4641_v23  ;;  %v4678_v5 = vmul.f32 %v8221_v39, %v4627_v25  ;;  %v4634_v44 = vadd.f32 %v4498_v43, %v4180_v11  ;;  %4845 = vmatpush.msra.mxu2 %v4818_v15  ;;  %v4772_v15 = vadd.f32 %v8214_v21, %v8210_v38  ;;  %v8778_v25 = vld [vmem:[#allocation12_spill] sm:$0xff] }
 0x671   : > { %v4186_v60 = vadd.f32 %v8129_v2, %v8778_v25  ;;  %v8282_v38 = vperm.slane %v8142_v42, 5 }
 0x672   : > { %v4724_v32 = vadd.f32 %v4692_v16, %v7772_v28  ;;  %v8241_v10 = vadd.f32 %v4678_v5, %v7779_v4  ;;  %v4685_v31 = vmul.f32 %v8199_v12, %v4634_v44  ;;  %4846 = vmatpush.msra.mxu2 %v4810_v34  ;;  %v4443_v6 = vpop.f32.mrf.mxu3  ;;  %v8779_v16 = vld [vmem:[#allocation36_spill] sm:$0xff]  ;;  %v8780_v5 = vld [vmem:[#allocation31_spill] sm:$0xff] }
 0x673   : > { %v4640_v26 = vadd.f32 %v4443_v6, %v8115_v46  ;;  %v4128_v46 = vadd.f32 %v8123_v48, %v8054_v59  ;;  %v8781_v6 = vld [vmem:[#allocation30_spill] sm:$0xff] }
 0x674   : > { %v8248_v3 = vadd.f32 %v4685_v31, %v7784_v13  ;;  %4847 = vmatpush.msra.mxu2 %v4802_v9  ;;  %v4780_v52 = vadd.f32 %v8207_v17, %v4724_v32 }
 0x675   : > { %v4475_v54 = vpop.f32.mrf.mxu0  ;;  %v4691_v28 = vmul.f32 %v8186_v20, %v4640_v26  ;;  %v4527_v4 = vpop.f32.mrf.mxu2 }
 0x676   : > { %v4649_v30 = vadd.f32 %v4475_v54, %v4157_v36  ;;  %v4635_v61 = vadd.f32 %v4527_v4, %v8119_v53  ;;  %4848 = vmatpush.msra.mxu2 %v4794_v49  ;;  %v4812_v32 = vmax.f32 %v4780_v52, 0.0  ;;  %v4804_v36 = vmax.f32 %v4772_v15, 0.0  ;;  %v8782_v54 = vld [vmem:[#allocation49_spill] sm:$0xff] }
 0x677   : > { %v4723_v50 = vadd.f32 %v4691_v28, %v7797_v14  ;;  %v4501_v56 = vpop.f32.mrf.mxu1 }
 0x678   : > { %v4700_v63 = vmul.f32 %v8174_v58, %v4649_v30  ;;  %v4686_v27 = vmul.f32 %v8221_v39, %v4635_v61  ;;  %v4642_v13 = vadd.f32 %v4501_v56, %v8121_v57  ;;  %v8265_v58 = vperm.slane %v8142_v42, 6  ;;  %v8777_v57 = vld [vmem:[#allocation60_spill] sm:$0xff] }
 0x679   : > { %v4779_v26 = vadd.f32 %v8207_v17, %v4723_v50  ;;  %v8783_v30 = vld [vmem:[#allocation52_spill] sm:$0xff]  ;;  %v4771_v56 = vadd.f32 %v8214_v21, %v8233_v18  ;;  %v4763_v50 = vadd.f32 %v8230_v47, %v8202_v45  ;;  %v8304_v18 = vld [vmem:[%s8612_s8] sm:$0x1] }
 0x67a   : > { %v4732_v35 = vadd.f32 %v4700_v63, %v7806_v29  ;;  %v8260_v55 = vadd.f32 %v4686_v27, %v7813_v0  ;;  %v4693_v53 = vmul.f32 %v8199_v12, %v4642_v13  ;;  %v4446_v22 = vpop.f32.mrf.mxu3  ;;  %v8784_v27 = vld [vmem:[#allocation22_spill] sm:$0xff]  ;;  %v8785_v13 = vld [vmem:[#allocation65_spill] sm:$0xff]  ;;  %5693 = vmatmul.msk.f32.vlgmr.msra.gmra.mxu2 %vm4829_vm7, %v8304_v18 }
 0x67b   : > { %v4648_v19 = vadd.f32 %v4446_v22, %v4128_v46  ;;  %v4215_v46 = vadd.f32 %v8785_v13, %v8784_v27  ;;  %v8794_v27 = vld [vmem:[#allocation11_spill] sm:$0xff] }
 0x67c   : > { %v4788_v14 = vadd.f32 %v8193_v1, %v4732_v35  ;;  %v4725_v23 = vadd.f32 %v4693_v53, %v8777_v57  ;;  %v8786_v35 = vld [vmem:[#allocation62_spill] sm:$0xff]  ;;  %v4811_v57 = vmax.f32 %v4779_v26, 0.0 }
 0x67d   : > { %v4582_v11 = vpop.f32.mrf.mxu0  ;;  %v4699_v29 = vmul.f32 %v8186_v20, %v4648_v19  ;;  %v4530_v59 = vpop.f32.mrf.mxu2  ;;  %v4764_v20 = vadd.f32 %v8230_v47, %v8183_v24  ;;  %v8787_v19 = vld [vmem:[#allocation64_spill] sm:$0xff] }
 0x67e   : > { %v4820_v48 = vmax.f32 %v4788_v14, 0.0  ;;  %v4629_v0 = vadd.f32 %v4582_v11, %v8125_v7  ;;  %v4643_v43 = vadd.f32 %v4530_v59, %v8779_v16  ;;  %v4781_v45 = vadd.f32 %v8207_v17, %v4725_v23  ;;  %v8788_v59 = vld [vmem:[#allocation61_spill] sm:$0xff] }
 0x67f   : > { %v4731_v44 = vadd.f32 %v4699_v29, %v8780_v5  ;;  %v4504_v33 = vpop.f32.mrf.mxu1  ;;  %v4796_v63 = vmax.f32 %v4764_v20, 0.0  ;;  %v8308_v29 = vperm.slane %v8142_v42, 7  ;;  %v4773_v23 = vadd.f32 %v8214_v21, %v8248_v3  ;;  %v8793_v3 = vld [vmem:[#allocation33_spill] sm:$0xff] }
 0x680   : > { %v4680_v34 = vmul.f32 %v8265_v58, %v4629_v0  ;;  %4885 = vmatpush.msrb.mxu0 %v4820_v48  ;;  %v4694_v7 = vmul.f32 %v8221_v39, %v4643_v43  ;;  %v4650_v31 = vadd.f32 %v4504_v33, %v4186_v60  ;;  %v4803_v60 = vmax.f32 %v4771_v56, 0.0  ;;  %v8789_v43 = vld [vmem:[#allocation39_spill] sm:$0xff] }
 0x681   : > { %v4787_v2 = vadd.f32 %v8193_v1, %v4731_v44  ;;  %v8790_v44 = vld [vmem:[#allocation10_spill] sm:$0xff]  ;;  %v4795_v33 = vmax.f32 %v4763_v50, 0.0  ;;  %v4774_v56 = vadd.f32 %v8214_v21, %v8260_v55  ;;  %v4766_v50 = vadd.f32 %v8230_v47, %v8241_v10 }
 0x682   : > { %v8286_v9 = vadd.f32 %v4680_v34, %v8781_v6  ;;  %4886 = vmatpush.msrb.mxu0 %v4812_v32  ;;  %v4726_v49 = vadd.f32 %v4694_v7, %v8782_v54  ;;  %v4701_v28 = vmul.f32 %v8199_v12, %v4650_v31  ;;  %v4553_v24 = vpop.f32.mrf.mxu3  ;;  %v8791_v32 = vld [vmem:[#allocation20_spill] sm:$0xff]  ;;  %v4765_v6 = vadd.f32 %v8230_v47, %v8218_v37 }
 0x683   : > { %v4819_v4 = vmax.f32 %v4787_v2, 0.0  ;;  %v4628_v61 = vadd.f32 %v4553_v24, %v8783_v30  ;;  %v4813_v2 = vmax.f32 %v4781_v45, 0.0  ;;  %v4805_v24 = vmax.f32 %v4773_v23, 0.0  ;;  %v8799_v45 = vld [vmem:[#allocation32_spill] sm:$0xff]  ;;  %v8801_v23 = vld [vmem:[#allocation13_spill] sm:$0xff] }
 0x684   : > { %4887 = vmatpush.msrb.mxu0 %v4804_v36  ;;  %v4733_v53 = vadd.f32 %v4701_v28, %v8786_v35  ;;  %v4798_v10 = vmax.f32 %v4766_v50, 0.0 }
 0x685   : > { %v4585_v22 = vpop.f32.mrf.mxu0  ;;  %v4679_v12 = vmul.f32 %v8282_v38, %v4628_v61  ;;  %v4533_v14 = vpop.f32.mrf.mxu2  ;;  %4865 = vmatpush.msra.mxu3 %v4819_v4  ;;  %v4782_v4 = vadd.f32 %v8207_v17, %v4726_v49 }
 0x686   : > { %v4637_v52 = vadd.f32 %v4585_v22, %v8787_v19  ;;  %4888 = vmatpush.msrb.mxu0 %v4796_v63  ;;  %v4789_v11 = vadd.f32 %v8193_v1, %v4733_v53  ;;  %v4651_v48 = vadd.f32 %v4533_v14, %v4215_v46  ;;  %v4797_v63 = vmax.f32 %v4765_v6, 0.0  ;;  %v8795_v53 = vld [vmem:[#allocation53_spill] sm:$0xff] }
 0x687   : > { %5695 = vmatmul.msk.f32.vlgmr.msrb.gmra.mxu0 %vm4829_vm7, %v8304_v18  ;;  %v8316_v0 = vadd.f32 %v4679_v12, %v8788_v59  ;;  %v4611_v25 = vpop.f32.mrf.mxu1  ;;  %4866 = vmatpush.msra.mxu3 %v4811_v57  ;;  %v4814_v22 = vmax.f32 %v4782_v4, 0.0  ;;  %v4806_v19 = vmax.f32 %v4774_v56, 0.0 }
 0x688   : > { %v4688_v15 = vmul.f32 %v8265_v58, %v4637_v52  ;;  %v4821_v16 = vmax.f32 %v4789_v11, 0.0  ;;  %v4702_v42 = vmul.f32 %v8221_v39, %v4651_v48  ;;  %v4630_v5 = vadd.f32 %v4611_v25, %v8789_v43  ;;  %v8792_v39 = vld [vmem:[#allocation38_spill] sm:$0xff]  ;;  %v8797_v52 = vld [vmem:[#allocation37_spill] sm:$0xff]  ;;  %v8798_v11 = vld [vmem:[#allocation67_spill] sm:$0xff] }
 0x689   : > { %4867 = vmatpush.msra.mxu3 %v4803_v60  ;;  %v4273_v57 = vadd.f32 %v8158_v40, %v8797_v52 }
 0x68a   : > { %v4720_v34 = vadd.f32 %v4688_v15, %v8790_v44  ;;  %v4734_v20 = vadd.f32 %v4702_v42, %v8791_v32  ;;  %v4681_v7 = vmul.f32 %v8308_v29, %v4630_v5  ;;  %4905 = vmatpush.msrb.mxu1 %v4821_v16  ;;  %v4556_v31 = vpop.f32.mrf.mxu3  ;;  %v8800_v16 = vld [vmem:[#allocation50_spill] sm:$0xff]  ;;  %v4244_v44 = vadd.f32 %v8168_v51, %v8801_v23 }
 0x68b   : > { %v4636_v36 = vadd.f32 %v4556_v31, %v8792_v39  ;;  %4868 = vmatpush.msra.mxu3 %v4795_v33  ;;  %v8802_v33 = vld [vmem:[#allocation35_spill] sm:$0xff] }
 0x68c   : > { %v4790_v26 = vadd.f32 %v8193_v1, %v4734_v20  ;;  %v8331_v54 = vadd.f32 %v4681_v7, %v8793_v3  ;;  %4906 = vmatpush.msrb.mxu1 %v4813_v2  ;;  %5694 = vmatmul.msk.f32.vlgmr.msra.gmra.mxu3 %vm4829_vm7, %v8304_v18  ;;  %v8804_v3 = vld [vmem:[#allocation23_spill] sm:$0xff] }
 0x68d   : > { %v4588_v28 = vpop.f32.mrf.mxu0  ;;  %v4687_v30 = vmul.f32 %v8282_v38, %v4636_v36  ;;  %v4302_v51 = vadd.f32 %v8179_v41, %v8804_v3 }
 0x68e   : > { %v4645_v37 = vadd.f32 %v4588_v28, %v8148_v8  ;;  %v4822_v61 = vmax.f32 %v4790_v26, 0.0  ;;  %4907 = vmatpush.msrb.mxu1 %v4805_v24  ;;  %v8796_v8 = vld [vmem:[#allocation21_spill] sm:$0xff]  ;;  %v8805_v28 = vld [vmem:[#allocation51_spill] sm:$0xff] }
 0x68f   : > { %v4719_v13 = vadd.f32 %v4687_v30, %v8794_v27  ;;  %v4614_v35 = vpop.f32.mrf.mxu1 }
 0x690   : > { %v4696_v46 = vmul.f32 %v8265_v58, %v4645_v37  ;;  %v4638_v49 = vadd.f32 %v4614_v35, %v8795_v53  ;;  %4908 = vmatpush.msrb.mxu1 %v4797_v63  ;;  %4925 = vmatpush.msrb.mxu2 %v4822_v61  ;;  %v4768_v37 = vadd.f32 %v8230_v47, %v8286_v9  ;;  %v8806_v35 = vld [vmem:[#allocation63_spill] sm:$0xff] }
 0x691   : > { %5696 = vmatmul.msk.f32.vlgmr.msrb.gmra.mxu1 %vm4829_vm7, %v8304_v18  ;;  %v4767_v9 = vadd.f32 %v8230_v47, %v8316_v0  ;;  %v4828_v0 = vstv %s4827_s14 }
 0x692   : > { %v4728_v12 = vadd.f32 %v4696_v46, %v8796_v8  ;;  %v4689_v55 = vmul.f32 %v8308_v29, %v4638_v49  ;;  %4926 = vmatpush.msrb.mxu2 %v4814_v22  ;;  %v4559_v14 = vpop.f32.mrf.mxu3  ;;  %v4800_v41 = vmax.f32 %v4768_v37, 0.0  ;;  %v4775_v46 = vadd.f32 %v8214_v21, %v4719_v13 }
 0x693   : > { %v4644_v48 = vadd.f32 %v4559_v14, %v8798_v11  ;;  %v4769_v14 = vadd.f32 %v8230_v47, %v8331_v54 }
 0x694   : > { %v4721_v59 = vadd.f32 %v4689_v55, %v8799_v45  ;;  %4927 = vmatpush.msrb.mxu2 %v4806_v19  ;;  %v4784_v6 = vadd.f32 %v8207_v17, %v4728_v12  ;;  %v4799_v12 = vmax.f32 %v4767_v9, 0.0 }
 0x695   : > { %v4591_v15 = vpop.f32.mrf.mxu0  ;;  %v4695_v25 = vmul.f32 %v8282_v38, %v4644_v48 }
 0x696   : > { %v4653_v60 = vadd.f32 %v4591_v15, %v4273_v57  ;;  %4928 = vmatpush.msrb.mxu2 %v4798_v10  ;;  %v4816_v30 = vmax.f32 %v4784_v6, 0.0  ;;  %v4777_v13 = vadd.f32 %v8214_v21, %v4721_v59 }
 0x697   : > { %v4727_v42 = vadd.f32 %v4695_v25, %v8800_v16  ;;  %v4617_v5 = vpop.f32.mrf.mxu1  ;;  %5697 = vmatmul.msk.f32.vlgmr.msrb.gmra.mxu2 %vm4829_vm7, %v8304_v18 }
 0x698   : > { %v4704_v43 = vmul.f32 %v8265_v58, %v4653_v60  ;;  %v4646_v40 = vadd.f32 %v4617_v5, %v8162_v62  ;;  %v8803_v58 = vld [vmem:[#allocation34_spill] sm:$0xff]  ;;  %v4776_v62 = vadd.f32 %v8214_v21, %v4720_v34 }
 0x69a   : > { %v4736_v32 = vadd.f32 %v4704_v43, %v8802_v33  ;;  %v4697_v20 = vmul.f32 %v8308_v29, %v4646_v40  ;;  %v4562_v7 = vpop.f32.mrf.mxu3  ;;  %v4808_v56 = vmax.f32 %v4776_v62, 0.0 }
 0x69b   : > { %v4652_v2 = vadd.f32 %v4562_v7, %v4244_v44 }
 0x69c   : > { %v4792_v31 = vadd.f32 %v8193_v1, %v4736_v32  ;;  %v4729_v39 = vadd.f32 %v4697_v20, %v8803_v58 }
 0x69d   : > { %v4703_v26 = vmul.f32 %v8282_v38, %v4652_v2  ;;  %v4783_v38 = vadd.f32 %v8207_v17, %v4727_v42 }
 0x69e   : > { %v4824_v36 = vmax.f32 %v4792_v31, 0.0  ;;  %v4785_v50 = vadd.f32 %v8207_v17, %v4729_v39  ;;  %v4801_v17 = vmax.f32 %v4769_v14, 0.0 }
 0x69f   : > { %v4735_v24 = vadd.f32 %v4703_v26, %v8805_v28  ;;  %v4620_v4 = vpop.f32.mrf.mxu1  ;;  %v4815_v49 = vmax.f32 %v4783_v38, 0.0 }
 0x6a0   : > { %4965 = vmatpush.msra.mxu0 %v4824_v36  ;;  %v4654_v61 = vadd.f32 %v4620_v4, %v4302_v51  ;;  %v4817_v55 = vmax.f32 %v4785_v50, 0.0 }
 0x6a1   : > { %v4791_v63 = vadd.f32 %v8193_v1, %v4735_v24 }
 0x6a2   : > { %4966 = vmatpush.msra.mxu0 %v4816_v30  ;;  %v4705_v34 = vmul.f32 %v8308_v29, %v4654_v61  ;;  %v4807_v29 = vmax.f32 %v4775_v46, 0.0 }
 0x6a3   : > { %v4823_v27 = vmax.f32 %v4791_v63, 0.0 }
 0x6a4   : > { %4967 = vmatpush.msra.mxu0 %v4808_v56  ;;  %v4737_v53 = vadd.f32 %v4705_v34, %v8806_v35 }
 0x6a5   : > { %4945 = vmatpush.msrb.mxu3 %v4823_v27 }
 0x6a6   : > { %4968 = vmatpush.msra.mxu0 %v4800_v41  ;;  %v4793_v22 = vadd.f32 %v8193_v1, %v4737_v53  ;;  %v4809_v1 = vmax.f32 %v4777_v13, 0.0 }
 0x6a7   : > { %5699 = vmatmul.msk.f32.vlgmr.msra.gmra.mxu0 %vm4829_vm7, %v8304_v18  ;;  %4946 = vmatpush.msrb.mxu3 %v4815_v49 }
 0x6a8   : > { %v4825_v8 = vmax.f32 %v4793_v22, 0.0 }
 0x6a9   : > { %4947 = vmatpush.msrb.mxu3 %v4807_v29 }
 0x6aa   : > { %4985 = vmatpush.msra.mxu1 %v4825_v8 }
 0x6ab   : > { %4948 = vmatpush.msrb.mxu3 %v4799_v12 }
 0x6ac   : > { %4986 = vmatpush.msra.mxu1 %v4817_v55  ;;  %5698 = vmatmul.msk.f32.vlgmr.msrb.gmra.mxu3 %vm4829_vm7, %v8304_v18 }
 0x6ae   : > { %4987 = vmatpush.msra.mxu1 %v4809_v1 }
 0x6b0   : > { %4988 = vmatpush.msra.mxu1 %v4801_v17 }
 0x6b1   : > { %5700 = vmatmul.msk.f32.vlgmr.msra.gmra.mxu1 %vm4829_vm7, %v8304_v18 }
 0x6fd   : > { %v4850_v21 = vpop.f32.mrf.mxu2 }
 0x6fe   : > { %v4851_v52 = vadd.f32 %v4850_v21, %v4828_v0 }
 0x700   : > { %v5701_v45 = vmul.f32 -1.442695, %v4851_v52 }
 0x702   : > { %5818 = vpow2.f32 %v5701_v45 }
 0x704   : > { %v4890_v19 = vpop.f32.mrf.mxu0 }
 0x705   : > { %v4891_v47 = vadd.f32 %v4890_v19, %v4828_v0 }
 0x707   : > { %v5703_v59 = vmul.f32 -1.442695, %v4891_v47 }
 0x708   : > { %v5819_v60 = vpop.eup %5818 }
 0x709   : > { %5820 = vpow2.f32 %v5703_v59  ;;  %v8391_v40 = vadd.f32 1.0, %v5819_v60 }
 0x70b   : > { %vm5030_vm11 = vweird.f32 %v8391_v40  ;;  %v5036_v35 = vand.u32 2147483648, %v8391_v40  ;;  %v5034_v47 = vand.u32 2147483647, %v8391_v40 }
 0x70d   : > { %vm5035_vm9 = vcmp.eq.f32.partialorder %v5034_v47, 8.507059e+37 }
 0x70e   : > { %v4910_v57 = vpop.f32.mrf.mxu1 }
 0x70f   : > { %v4870_v11 = vpop.f32.mrf.mxu3  ;;  %v4911_v54 = vadd.f32 %v4910_v57, %v4828_v0  ;;  %v5821_v16 = vpop.eup %5820 }
 0x710   : > { %v4871_v48 = vadd.f32 %v4870_v11, %v4828_v0  ;;  %v8393_v23 = vadd.f32 1.0, %v5821_v16 }
 0x711   : > { %v5704_v15 = vmul.f32 -1.442695, %v4911_v54 }
 0x712   : > { %v5702_v10 = vmul.f32 -1.442695, %v4871_v48  ;;  %vm5060_vm14 = vweird.f32 %v8393_v23  ;;  %v5064_v49 = vand.u32 2147483647, %v8393_v23  ;;  %v5066_v22 = vand.u32 2147483648, %v8393_v23 }
 0x713   : > { %5822 = vpow2.f32 %v5704_v15 }
 0x714   : > { %5824 = vpow2.f32 %v5702_v10  ;;  %v5067_v52 = vor.u32 1.1754944e-38, %v5066_v22  ;;  %vm5065_vm7 = vcmp.eq.f32.partialorder %v5064_v49, 8.507059e+37 }
 0x719   : > { %v5823_v42 = vpop.eup %5822 }
 0x71a   : > { %v4930_v25 = vpop.f32.mrf.mxu2  ;;  %v5825_v5 = vpop.eup %5824  ;;  %v8395_v44 = vadd.f32 1.0, %v5823_v42  ;;  %v5037_v42 = vor.u32 1.1754944e-38, %v5036_v35 }
 0x71b   : > { %v4931_v18 = vadd.f32 %v4930_v25, %v4828_v0  ;;  %v8397_v33 = vadd.f32 1.0, %v5825_v5 }
 0x71c   : > { %vm5075_vm0 = vweird.f32 %v8395_v44  ;;  %v5081_v55 = vand.u32 2147483648, %v8395_v44  ;;  %v5079_v57 = vand.u32 2147483647, %v8395_v44 }
 0x71d   : > { %v5705_v43 = vmul.f32 -1.442695, %v4931_v18  ;;  %vm5045_vm2 = vweird.f32 %v8397_v33  ;;  %v5051_v12 = vand.u32 2147483648, %v8397_v33  ;;  %v5049_v14 = vand.u32 2147483647, %v8397_v33 }
 0x71e   : > { %v5082_v60 = vor.u32 1.1754944e-38, %v5081_v55 }
 0x71f   : > { %5826 = vpow2.f32 %v5705_v43  ;;  %v5052_v18 = vor.u32 1.1754944e-38, %v5051_v12  ;;  %vm8493_vm5 = vcmp.eq.f32.partialorder %v5049_v14, 8.507059e+37 }
 0x720   : > { %5828 = vrcp.f32 %v8391_v40 }
 0x721   : > { %5830 = vrcp.f32 %v8393_v23 }
 0x722   : > { %5832 = vrcp.f32 %v8395_v44 }
 0x723   : > { %5834 = vrcp.f32 %v8397_v33 }
 0x724   : > { %v4970_v32 = vpop.f32.mrf.mxu0 }
 0x725   : > { %v4971_v20 = vadd.f32 %v4970_v32, %v4828_v0  ;;  %v5827_v31 = vpop.eup %5826 }
 0x726   : > { %v8403_v2 = vpop.eup %5828  ;;  %v8407_v58 = vadd.f32 1.0, %v5827_v31 }
 0x727   : > { %v5707_v7 = vmul.f32 -1.442695, %v4971_v20  ;;  %v8405_v6 = vpop.eup %5830  ;;  %v5026_v26 = vmul.f32 %v8403_v2, %v8391_v40  ;;  %vm5031_vm1 = vweird.f32 %v8403_v2 }
 0x728   : > { %v8409_v39 = vpop.eup %5832  ;;  %v5056_v3 = vmul.f32 %v8405_v6, %v8393_v23  ;;  %vm5061_vm15 = vweird.f32 %v8405_v6  ;;  %vm8462_vm10 = vmor %vm5030_vm11, %vm5031_vm1  ;;  %vm5080_vm11 = vcmp.eq.f32.partialorder %v5079_v57, 8.507059e+37  ;;  %v5094_v20 = vand.u32 2147483647, %v8407_v58 }
 0x729   : > { %5836 = vpow2.f32 %v5707_v7  ;;  %v8411_v36 = vpop.eup %5834  ;;  %v5071_v24 = vmul.f32 %v8409_v39, %v8395_v44  ;;  %v5027_v63 = vsub.f32 1.0, %v5026_v26  ;;  %vm5076_vm3 = vweird.f32 %v8409_v39  ;;  %vm8451_vm6 = vmor %vm5060_vm14, %vm5061_vm15 }
 0x72a   : > { %5838 = vrcp.f32 %v8407_v58  ;;  %v5041_v28 = vmul.f32 %v8411_v36, %v8397_v33  ;;  %v5057_v56 = vsub.f32 1.0, %v5056_v3  ;;  %vm5046_vm4 = vweird.f32 %v8411_v36  ;;  %vm8473_vm13 = vmor %vm5075_vm0, %vm5076_vm3 }
 0x72b   : > { %v5072_v41 = vsub.f32 1.0, %v5071_v24  ;;  %v5028_v53 = vmul.f32 %v8403_v2, %v5027_v63  ;;  %vm8483_vm8 = vmor %vm5045_vm2, %vm5046_vm4  ;;  %v5096_v7 = vand.u32 2147483648, %v8407_v58  ;;  %vm5090_vm14 = vweird.f32 %v8407_v58 }
 0x72c   : > { %v5042_v27 = vsub.f32 1.0, %v5041_v28  ;;  %v5058_v9 = vmul.f32 %v8405_v6, %v5057_v56  ;;  %vm8529_vm3 = vcmp.eq.f32.partialorder %v5094_v20, 8.507059e+37 }
 0x72d   : > { %v5073_v8 = vmul.f32 %v8409_v39, %v5072_v41  ;;  %v5029_v21 = vadd.f32 %v8403_v2, %v5028_v53  ;;  %v5097_v24 = vor.u32 1.1754944e-38, %v5096_v7 }
 0x72e   : > { %v4990_v51 = vpop.f32.mrf.mxu1  ;;  %v5043_v29 = vmul.f32 %v8411_v36, %v5042_v27  ;;  %v5059_v19 = vadd.f32 %v8405_v6, %v5058_v9 }
 0x72f   : > { %v5837_v62 = vpop.eup %5836  ;;  %v4950_v4 = vpop.f32.mrf.mxu3  ;;  %v4991_v37 = vadd.f32 %v4990_v51, %v4828_v0  ;;  %v5074_v45 = vadd.f32 %v8409_v39, %v5073_v8  ;;  %v5033_v5 = vsel %vm8462_vm10, %v8403_v2, %v5029_v21  ;;  %vm5162_vm10 = vcmask 1042434  }
 0x730   : > { %v8422_v30 = vadd.f32 1.0, %v5837_v62  ;;  %v4951_v61 = vadd.f32 %v4950_v4, %v4828_v0  ;;  %v8425_v46 = vpop.eup %5838  ;;  %v5044_v48 = vadd.f32 %v8411_v36, %v5043_v29  ;;  %v5063_v23 = vsel %vm8451_vm6, %v8405_v6, %v5059_v19 }
 0x731   : > { %v5708_v34 = vmul.f32 -1.442695, %v4991_v37  ;;  %v5086_v13 = vmul.f32 %v8425_v46, %v8407_v58  ;;  %v5078_v32 = vsel %vm8473_vm13, %v8409_v39, %v5074_v45  ;;  %vm5091_vm15 = vweird.f32 %v8425_v46 }
 0x732   : > { %5840 = vrcp.f32 %v8422_v30  ;;  %v5706_v38 = vmul.f32 -1.442695, %v4951_v61  ;;  %v5048_v33 = vsel %vm8483_vm8, %v8411_v36, %v5044_v48  ;;  %v5068_v2 = vsel %vm5065_vm7, %v5067_v52, %v5063_v23  ;;  %vm8524_vm2 = vmor %vm5090_vm14, %vm5091_vm15 }
 0x733   : > { %v5087_v15 = vsub.f32 1.0, %v5086_v13  ;;  %v5126_v6 = vand.u32 2147483648, %v8422_v30  ;;  %v8514_v26 = vsel %vm5035_vm9, %v5037_v42, %v5033_v5  ;;  %v8518_v36 = vsel %vm8493_vm5, %v5052_v18, %v5048_v33 }
 0x734   : > { %5842 = vpow2.f32 %v5706_v38  ;;  %v5083_v39 = vsel %vm5080_vm11, %v5082_v60, %v5078_v32  ;;  %vm5120_vm0 = vweird.f32 %v8422_v30  ;;  %v5124_v58 = vand.u32 2147483647, %v8422_v30 }
 0x735   : > { %5844 = vpow2.f32 %v5708_v34  ;;  %v5088_v44 = vmul.f32 %v8425_v46, %v5087_v15  ;;  %v5154_v61 = vrot.slane %v5068_v2, 6  ;;  %v5153_v38 = vrot.slane %v8518_v36, 7 }
 0x736   : > { %v5127_v41 = vor.u32 1.1754944e-38, %v5126_v6  ;;  %vm5160_vm6 = vcmask 1040384   ;;  %vm8545_vm13 = vcmp.eq.f32.partialorder %v5124_v58, 8.507059e+37  ;;  %vm5164_vm7 = vcmask 1041408  }
 0x737   : > { %v5089_v3 = vadd.f32 %v8425_v46, %v5088_v44  ;;  %v5161_v59 = vsel %vm5160_vm6, %v8514_v26, %v5153_v38 }
 0x738   : > { %v8436_v50 = vpop.eup %5840 }
 0x739   : > { %v5116_v17 = vmul.f32 %v8436_v50, %v8422_v30  ;;  %vm5121_vm1 = vweird.f32 %v8436_v50  ;;  %v5155_v30 = vrot.slane %v5083_v39, 5  ;;  %v5093_v49 = vsel %vm8524_vm2, %v8425_v46, %v5089_v3 }
 0x73a   : > { %v5843_v0 = vpop.eup %5842  ;;  %vm8536_vm4 = vmor %vm5120_vm0, %vm5121_vm1  ;;  %v5098_v21 = vsel %vm8529_vm3, %v5097_v24, %v5093_v49  ;;  %vm5166_vm2 = vcmask 1044484   ;;  %vm5168_vm3 = vcmask 1046534  }
 0x73b   : > { %v5845_v54 = vpop.eup %5844  ;;  %v8477_v10 = vadd.f32 1.0, %v5843_v0  ;;  %v5117_v43 = vsub.f32 1.0, %v5116_v17  ;;  %v5163_v14 = vsel %vm5162_vm10, %v5154_v61, %v5155_v30  ;;  %v5156_v47 = vrot.slane %v5098_v21, 4 }
 0x73c   : > { %v8487_v16 = vadd.f32 1.0, %v5845_v54  ;;  %v5165_v25 = vsel %vm5164_vm7, %v5161_v59, %v5163_v14 }
 0x73d   : > { %5846 = vrcp.f32 %v8477_v10  ;;  %v5118_v31 = vmul.f32 %v8436_v50, %v5117_v43  ;;  %v5111_v35 = vand.u32 2147483648, %v8477_v10  ;;  %v5109_v29 = vand.u32 2147483647, %v8477_v10 }
 0x73e   : > { %5848 = vrcp.f32 %v8487_v16  ;;  %v5141_v8 = vand.u32 2147483648, %v8487_v16  ;;  %v5139_v12 = vand.u32 2147483647, %v8487_v16  ;;  %vm5105_vm9 = vweird.f32 %v8477_v10 }
 0x73f   : > { %v5119_v63 = vadd.f32 %v8436_v50, %v5118_v31  ;;  %v5112_v1 = vor.u32 1.1754944e-38, %v5111_v35  ;;  %vm5135_vm14 = vweird.f32 %v8487_v16  ;;  %vm5110_vm0 = vcmp.eq.f32.partialorder %v5109_v29, 8.507059e+37 }
 0x740   : > { %v5142_v0 = vor.u32 1.1754944e-38, %v5141_v8  ;;  %vm5140_vm1 = vcmp.eq.f32.partialorder %v5139_v12, 8.507059e+37 }
 0x741   : > { %v5123_v46 = vsel %vm8536_vm4, %v8436_v50, %v5119_v63  ;;  %vm5170_vm4 = vcmask 1045508  }
 0x742   : > { %v5128_v50 = vsel %vm8545_vm13, %v5127_v41, %v5123_v46 }
 0x743   : > { %v5847_v62 = vpop.eup %5846  ;;  %v5158_v48 = vrot.slane %v5128_v50, 2 }
 0x744   : > { %v5849_v51 = vpop.eup %5848  ;;  %v5101_v4 = vmul.f32 %v5847_v62, %v8477_v10  ;;  %vm5106_vm8 = vweird.f32 %v5847_v62 }
 0x745   : > { %v5131_v56 = vmul.f32 %v5849_v51, %v8487_v16  ;;  %vm5136_vm5 = vweird.f32 %v5849_v51  ;;  %vm5107_vm11 = vmor %vm5105_vm9, %vm5106_vm8 }
 0x746   : > { %v5102_v34 = vsub.f32 1.0, %v5101_v4  ;;  %vm5137_vm15 = vmor %vm5135_vm14, %vm5136_vm5 }
 0x747   : > { %v5132_v53 = vsub.f32 1.0, %v5131_v56 }
 0x748   : > { %v5103_v22 = vmul.f32 %v5847_v62, %v5102_v34 }
 0x749   : > { %v5133_v13 = vmul.f32 %v5849_v51, %v5132_v53 }
 0x74a   : > { %v5104_v55 = vadd.f32 %v5847_v62, %v5103_v22 }
 0x74b   : > { %v5134_v17 = vadd.f32 %v5849_v51, %v5133_v13 }
 0x74c   : > { %v5108_v19 = vsel %vm5107_vm11, %v5847_v62, %v5104_v55 }
 0x74d   : > { %v5113_v52 = vsel %vm5110_vm0, %v5112_v1, %v5108_v19  ;;  %v5138_v57 = vsel %vm5137_vm15, %v5849_v51, %v5134_v17 }
 0x74e   : > { %v5143_v11 = vsel %vm5140_vm1, %v5142_v0, %v5138_v57  ;;  %v5157_v54 = vrot.slane %v5113_v52, 3 }
 0x74f   : > { %v5159_v45 = vrot.slane %v5143_v11, 1 }
 0x750   : > { %v5167_v15 = vsel %vm5166_vm2, %v5156_v47, %v5157_v54 }
 0x751   : > { %v5169_v10 = vsel %vm5168_vm3, %v5158_v48, %v5159_v45 }
 0x752   : > { %v5171_v18 = vsel %vm5170_vm4, %v5167_v15, %v5169_v10 }
 0x753   : > { %v5172_v60 = vsel %vm1744_vm12, %v5165_v25, %v5171_v18 }
 0x754   : > { %5174 = vst [vmem:[%s353_s22] sm:$0xff] %v5172_v60 }
 0x755   : > { %5877 = shalt.err (!%p5874_p3)
}
 0x756   : > { %5714 = dma.vmem_to_hbm [thread:$0]  (%p6032_p5), %s5189_s27, 128, %s5191_s29, %s5176_s26  }
 0x757 PF: > { %p5720_p4 = scmp.ge.s32.totalorder %s5912_s18, 2  ;;  %s5202_s11 = sand.u32 1, %s5900_s15  }
 0x758   : > { %s5203_s21 = scalar_lea.sflag [#allocation7], %s5202_s11 }
 0x759   : > { %p5717_p7 = pnand %p5720_p4, %p6036_p6 }
 0x75b   : > { %p5718_p8 = pneg %p5717_p7 }
 0x75d   : > { %5895 = dma.done.wait (%p5718_p8), %s5203_s21, 128  }
 0x75e   : > { %5897 = vsyncadd (%p5718_p8), %s5203_s21, 4294967168  ;;  %p21_p9 = scmp.ge.s32.totalorder %s6019_s20, 4   ;;  %s8825_s15 = smov %s5904_s16 }
 0x75f   : > { %s8826_s16 = smov %s5908_s17  ;;  %s8827_s17 = smov %s6030_s23 }
 0x760   : > { %s8828_s18 = smov %s6019_s20  ;;  %23 = sbr.rel (!%p21_p9) target bundleno = 5 (0x5), region = 155 }
 0x765   :  { %5209 = vsyncpa [#allocation7], 1 }
 0x766   :  { %5211 = vsyncpa [#allocation7 + $0x1], 1 }

</bundles_post_ra>
